<compile_context>
chip_gen: v6e
topology: v6e:2x2x1
jax: 0.10.0
libtpu: 0.0.40
codegen_flags: <defaults>
</compile_context>

<pallas_src>
import functools
import math

import jax
import jax.numpy as jnp
from jax import lax
from jax.experimental import pallas as pl
from jax.experimental.pallas import tpu as pltpu

SLAB = 128  # lane-dense feature slab width (all feature ranges fit well inside 128)


# ---------------------------------------------------------------------------
# Fused Pallas kernel: all GN layers + node_out Linear, grid=(gn_layer_num,)
# ---------------------------------------------------------------------------

def _graphnet_fused_kernel(
    # int32 gather / scatter indices at flattened-row granularity (constant over grid)
    srci_ref,   # (EP, 1)  node-row of x[row[e]] per edge-row
    dsti_ref,   # (EP, 1)  node-row of x[col[e]] per edge-row
    colr_ref,   # (1, EP)  node-row each edge-row scatters into (scatter_add over col)
    ebat_ref,   # (EP, 1)  u-row (u[batch[row[e]]]) per edge-row
    nbat_ref,   # (NP, 1)  u-row (u[batch[n]]) per node-row
    nbatr_ref,  # (1, NP)  same, row layout (per-graph aggregation)
    # initial feature slabs (f32, 128 lanes; x at [0,FXF), e at [OFF_E,..), u at [OFF_U,..))
    x_in, e_in, u_in,
    # per-layer MLP_GN params, BlockSpec-selected for layer l (w* bf16, b* f32)
    we1a, we1b, be1, we2, be2, we3, be3,   # EdgeModel
    wn1, bn1, wn2, bn2, wn3, bn3,          # NodeModel
    wg1, bg1, wg2, bg2, wg3, bg3,          # GlobalModel
    # node_out_net Linear (constant over grid)
    ow, ob,
    # output: node_out slab (NP, 128), written on the last grid step only
    o_ref,
    # persistent VMEM scratch slabs (carried across layers)
    x_scr, e_scr, u_scr,
):
    f32, bf16 = jnp.float32, jnp.bfloat16
    l = pl.program_id(0)
    NP = x_scr.shape[0]
    EP = e_scr.shape[0]
    GP = u_scr.shape[0]

    @pl.when(l == 0)
    def _():
        x_scr[...] = x_in[...]
        e_scr[...] = e_in[...]
        u_scr[...] = u_in[...]

    x = x_scr[...]          # pre-update node slab   (valid lanes [0, FX_l))
    e = e_scr[...]          # pre-update edge slab   (valid lanes [OFF_E, OFF_E+FE_l))
    u = u_scr[...]          # pre-update global slab (valid lanes [OFF_U, OFF_U+FU_l))
    x_b = x.astype(bf16)
    u_b = u.astype(bf16)

    def gather(idx_col, table_b):
        # rows of table selected by idx_col[:, 0]; one-hot built in-kernel, bf16 MXU matmul.
        rows, nseg = idx_col.shape[0], table_b.shape[0]
        onehot = (idx_col == lax.broadcasted_iota(jnp.int32, (rows, nseg), 1))
        onehot = onehot.astype(f32).astype(bf16)   # 0/1 exact in bf16
        return jnp.dot(onehot, table_b, preferred_element_type=f32)

    def mlp_tail(h, w2, b2, w3, b3):
        # MLP_GN tail: ReLU -> Linear -> ReLU -> Linear (dropout p=0 is a no-op).
        h = jnp.maximum(h, 0.0)
        h = jnp.dot(h.astype(bf16), w2[...], preferred_element_type=f32) + b2[...]
        h = jnp.maximum(h, 0.0)
        return jnp.dot(h.astype(bf16), w3[...], preferred_element_type=f32) + b3[...]

    # ---- EdgeModel: edge_mlp(cat([x[row], x[col], edge_attr, u[batch[row]]], -1)) ----
    src = gather(srci_ref[...], x_b)                       # lanes [0, FX_l)
    dst = gather(dsti_ref[...], x_b)                       # lanes [0, FX_l)
    u_e = gather(ebat_ref[...], u_b)                       # lanes [OFF_U, ..)
    # src shares lanes with dst, so the first Linear is two K=128 dots; dst/e/u_e lanes are
    # disjoint so they pack into one operand by plain addition.
    h_e = (jnp.dot(src.astype(bf16), we1a[...], preferred_element_type=f32)
           + jnp.dot((dst + e + u_e).astype(bf16), we1b[...], preferred_element_type=f32)
           + be1[...])
    upd_e = mlp_tail(h_e, we2, be2, we3, be3)              # nonzero only at this layer's e-residual lanes
    e_scr[...] = e + upd_e                                 # == torch.cat([upd_e, e], -1)

    # ---- NodeModel: msg = scatter_add(upd_e, col); node_mlp(cat([x, msg, u[batch]], -1)) ----
    scat = (lax.broadcasted_iota(jnp.int32, (NP, EP), 0) == colr_ref[...])
    scat = scat.astype(f32).astype(bf16)
    msg = jnp.dot(scat, upd_e.astype(bf16), preferred_element_type=f32)   # e-residual lanes
    u_n = gather(nbat_ref[...], u_b)                                      # u lanes
    h_n = jnp.dot((x + msg + u_n).astype(bf16), wn1[...],
                  preferred_element_type=f32) + bn1[...]
    upd_x = mlp_tail(h_n, wn2, bn2, wn3, bn3)              # nonzero only at this layer's x-residual lanes
    x_new = x + upd_x                                      # == torch.cat([upd_x, x], -1)
    x_scr[...] = x_new

    # ---- GlobalModel: global_mlp(cat([agg(upd_x), agg(msg), u], -1)) ----
    aggm = (lax.broadcasted_iota(jnp.int32, (GP, NP), 0) == nbatr_ref[...])
    aggm = aggm.astype(f32).astype(bf16)
    agg_node = jnp.dot(aggm, upd_x.astype(bf16), preferred_element_type=f32)  # x lanes
    agg_edge = jnp.dot(aggm, msg.astype(bf16), preferred_element_type=f32)    # e lanes
    h_g = jnp.dot((agg_node + agg_edge + u).astype(bf16), wg1[...],
                  preferred_element_type=f32) + bg1[...]
    upd_u = mlp_tail(h_g, wg2, bg2, wg3, bg3)              # nonzero only at this layer's u-residual lanes
    u_scr[...] = u + upd_u                                 # == torch.cat([upd_u, u], -1)

    # ---- node_out_net Linear, folded into the last grid step ----
    @pl.when(l == pl.num_programs(0) - 1)
    def _():
        o_ref[...] = jnp.dot(x_new.astype(bf16), ow[...],
                             preferred_element_type=f32) + ob[...]


# ---------------------------------------------------------------------------
# Parameter construction (exact torch-shaped params) + kernel layout padding
# ---------------------------------------------------------------------------

# TODO(synk): torch nn.Linear default (Kaiming-uniform) init is not replicated; synthetic params.
def make_mlp_params(key, in_size, hidden, out_size):
    ks = jax.random.split(key, 6)
    s = 0.1
    return {
        "w1": (s * jax.random.normal(ks[0], (in_size, hidden))).astype(jnp.float32),
        "b1": (s * jax.random.normal(ks[1], (1, hidden))).astype(jnp.float32),
        "w2": (s * jax.random.normal(ks[2], (hidden, hidden))).astype(jnp.float32),
        "b2": (s * jax.random.normal(ks[3], (1, hidden))).astype(jnp.float32),
        "w3": (s * jax.random.normal(ks[4], (hidden, out_size))).astype(jnp.float32),
        "b3": (s * jax.random.normal(ks[5], (1, out_size))).astype(jnp.float32),
    }


def make_graphnet_params(key, node_in, edge_in, glob_in, hidden,
                         upd_node, upd_edge, upd_glob, node_out, gn_layers):
    layers = []
    fx, fe, fu = node_in, edge_in, glob_in
    for _ in range(gn_layers):
        key, ke, kn, kg = jax.random.split(key, 4)
        edge_p = make_mlp_params(ke, 2 * fx + fe + fu, hidden, upd_edge)
        fe += upd_edge
        node_p = make_mlp_params(kn, fx + upd_edge + fu, hidden, upd_node)
        fx += upd_node
        glob_p = make_mlp_params(kg, upd_node + upd_edge + fu, hidden, upd_glob)
        fu += upd_glob
        layers.append({"edge": edge_p, "node": node_p, "glob": glob_p})
    key, ko, kb = jax.random.split(key, 3)
    out_w = (0.1 * jax.random.normal(ko, (fx, node_out))).astype(jnp.float32)
    out_b = (0.1 * jax.random.normal(kb, (1, node_out))).astype(jnp.float32)
    return {"layers": layers, "out_w": out_w, "out_b": out_b}


def _lane_perm(base_width, upd_width, n_prev):
    # Lane (slab-local) of each torch-ordered feature. torch order after n_prev layers is
    # [upd^{n-1}, ..., upd^0, base]; our slab keeps [base, upd^0, ..., upd^{n-1}].
    lanes = []
    for j in range(n_prev - 1, -1, -1):
        lanes.extend(range(base_width + j * upd_width, base_width + (j + 1) * upd_width))
    lanes.extend(range(base_width))
    return lanes


def _scatter_rows(pairs, nrows):
    ncols = pairs[0][0].shape[1]
    out = jnp.zeros((nrows, ncols), jnp.float32)
    for w, lanes in pairs:
        out = out.at[jnp.asarray(lanes, dtype=jnp.int32), :].set(w)
    return out


def _place_cols(w, off, ncols):
    out = jnp.zeros((w.shape[0], ncols), jnp.float32)
    return out.at[:, off:off + w.shape[1]].set(w)


def prepare_kernel_params(params, node_in, edge_in, glob_in,
                          upd_node, upd_edge, upd_glob, slab=SLAB):
    """Map torch-shaped params onto the fixed 128-lane slab layout and stack over layers.

    Slab lane layout (fixed across layers, ranges disjoint):
      x: [0, FXF)  (x0 first, then each layer's upd_x)
      e: [OFF_E, OFF_E + FEF)
      u: [OFF_U, OFF_U + FUF)
    w1 rows are scattered to input lanes; w3/b3 columns are placed at the layer's residual
    lanes (so the in-kernel residual is a plain add); weights bf16, biases f32.
    """
    L = len(params["layers"])
    fxf = node_in + L * upd_node
    fef = edge_in + L * upd_edge
    fuf = glob_in + L * upd_glob
    off_e = fxf
    off_u = fxf + fef
    assert off_u + fuf <= slab, "feature lane layout must fit a 128-wide slab"

    keys = ("we1a", "we1b", "be1", "we2", "be2", "we3", "be3",
            "wn1", "bn1", "wn2", "bn2", "wn3", "bn3",
            "wg1", "bg1", "wg2", "bg2", "wg3", "bg3")
    stacked = {k: [] for k in keys}

    for l, lp in enumerate(params["layers"]):
        fx = node_in + l * upd_node
        fe = edge_in + l * upd_edge
        fu = glob_in + l * upd_glob
        x_lanes = _lane_perm(node_in, upd_node, l)
        e_lanes = [off_e + q for q in _lane_perm(edge_in, upd_edge, l)]
        u_lanes = [off_u + q for q in _lane_perm(glob_in, upd_glob, l)]
        msg_lanes = [off_e + edge_in + l * upd_edge + j for j in range(upd_edge)]
        an_lanes = [node_in + l * upd_node + j for j in range(upd_node)]

        edgep, nodep, globp = lp["edge"], lp["node"], lp["glob"]

        # EdgeModel MLP: torch input = [x[row] | x[col] | edge_attr | u[batch[row]]]
        w1 = edgep["w1"]
        stacked["we1a"].append(_scatter_rows([(w1[:fx], x_lanes)], slab))
        stacked["we1b"].append(_scatter_rows(
            [(w1[fx:2 * fx], x_lanes),
             (w1[2 * fx:2 * fx + fe], e_lanes),
             (w1[2 * fx + fe:], u_lanes)], slab))
        stacked["be1"].append(edgep["b1"])
        stacked["we2"].append(edgep["w2"])
        stacked["be2"].append(edgep["b2"])
        stacked["we3"].append(_place_cols(edgep["w3"], off_e + edge_in + l * upd_edge, slab))
        stacked["be3"].append(_place_cols(edgep["b3"], off_e + edge_in + l * upd_edge, slab))

        # NodeModel MLP: torch input = [x | msg | u[batch]]
        w1 = nodep["w1"]
        stacked["wn1"].append(_scatter_rows(
            [(w1[:fx], x_lanes),
             (w1[fx:fx + upd_edge], msg_lanes),
             (w1[fx + upd_edge:], u_lanes)], slab))
        stacked["bn1"].append(nodep["b1"])
        stacked["wn2"].append(nodep["w2"])
        stacked["bn2"].append(nodep["b2"])
        stacked["wn3"].append(_place_cols(nodep["w3"], node_in + l * upd_node, slab))
        stacked["bn3"].append(_place_cols(nodep["b3"], node_in + l * upd_node, slab))

        # GlobalModel MLP: torch input = [agg_node | agg_edge | u]
        w1 = globp["w1"]
        stacked["wg1"].append(_scatter_rows(
            [(w1[:upd_node], an_lanes),
             (w1[upd_node:upd_node + upd_edge], msg_lanes),
             (w1[upd_node + upd_edge:], u_lanes)], slab))
        stacked["bg1"].append(globp["b1"])
        stacked["wg2"].append(globp["w2"])
        stacked["bg2"].append(globp["b2"])
        stacked["wg3"].append(_place_cols(globp["w3"], off_u + glob_in + l * upd_glob, slab))
        stacked["bg3"].append(_place_cols(globp["b3"], off_u + glob_in + l * upd_glob, slab))

    kp = {}
    for k, vs in stacked.items():
        arr = jnp.stack(vs, axis=0)
        kp[k] = arr.astype(jnp.bfloat16) if k.startswith("w") else arr.astype(jnp.float32)

    # node_out_net Linear, rows permuted to the slab layout, lane-dense 128-wide output.
    out_lanes = _lane_perm(node_in, upd_node, L)
    node_out = params["out_w"].shape[1]
    ow = _scatter_rows([(params["out_w"], out_lanes)], slab)
    kp["out_w"] = jnp.pad(ow, ((0, 0), (0, slab - node_out))).astype(jnp.bfloat16)
    kp["out_b"] = jnp.pad(params["out_b"], ((0, 0), (0, slab - node_out))).astype(jnp.float32)

    layout = {"fx0": node_in, "fe0": edge_in, "fu0": glob_in,
              "off_e": off_e, "off_u": off_u}
    return kp, layout


# ---------------------------------------------------------------------------
# Graph-structure preprocessing (hoisted out of the jitted per-call path)
# ---------------------------------------------------------------------------

def prepare_graph(edge_index, batch, edge_attr_raw, N, D1, D2, layout, slab=SLAB):
    P = D1 * D2
    E = edge_index.shape[1]
    G = int(jnp.max(batch)) + 1  # Batch.from_data_list([data]) => 1

    row = edge_index[0].astype(jnp.int32)
    col = edge_index[1].astype(jnp.int32)
    batch = batch.astype(jnp.int32)

    def expand(idx, count):
        # per-entity index -> per flattened (entity, D1, D2)-row index
        return (jnp.repeat(idx, P) * P
                + jnp.tile(jnp.arange(P, dtype=jnp.int32), count))

    row_e = expand(row, E)
    col_e = expand(col, E)
    ebat_e = expand(jnp.take(batch, row), E)
    nbat_e = expand(batch, N)
    idx = (row_e.reshape(E * P, 1), col_e.reshape(E * P, 1), col_e.reshape(1, E * P),
           ebat_e.reshape(E * P, 1), nbat_e.reshape(N * P, 1), nbat_e.reshape(1, N * P))

    fe0, off_e = layout["fe0"], layout["off_e"]
    e_full = jnp.broadcast_to(
        edge_attr_raw, (E, D1, D2, edge_attr_raw.shape[-1])).astype(jnp.float32)
    e_slab = jnp.zeros((E * P, slab), jnp.float32).at[
        :, off_e:off_e + fe0].set(e_full.reshape(E * P, fe0))
    u_slab = jnp.zeros((G * P, slab), jnp.float32)  # u = x.new_zeros(...)
    return {"idx": idx, "e_slab": e_slab, "u_slab": u_slab}


# ---------------------------------------------------------------------------
# Fused pallas_call wrapper / forward pass
# ---------------------------------------------------------------------------

def _fused_call(kp, idx, x_slab, e_slab, u_slab):
    srci, dsti, colr, ebat, nbat, nbatr = idx
    NP, slab = x_slab.shape
    EP = e_slab.shape[0]
    GP = u_slab.shape[0]
    L = kp["we1a"].shape[0]

    weight_keys = ("we1a", "we1b", "be1", "we2", "be2", "we3", "be3",
                   "wn1", "bn1", "wn2", "bn2", "wn3", "bn3",
                   "wg1", "bg1", "wg2", "bg2", "wg3", "bg3")
    weights = [kp[k] for k in weight_keys]

    def const_spec(shape):
        nd = len(shape)
        return pl.BlockSpec(tuple(shape), lambda l, _n=nd: (0,) * _n)

    def layer_spec(shape_tail):
        nd = len(shape_tail)
        return pl.BlockSpec((None,) + tuple(shape_tail),
                            lambda l, _n=nd: (l,) + (0,) * _n)

    in_specs = ([const_spec(a.shape) for a in (srci, dsti, colr, ebat, nbat, nbatr)]
                + [const_spec(a.shape) for a in (x_slab, e_slab, u_slab)]
                + [layer_spec(w.shape[1:]) for w in weights]
                + [const_spec(kp["out_w"].shape), const_spec(kp["out_b"].shape)])

    # Explicit VMEM budget: per-layer weights double-buffered + slabs/scratch + headroom
    # (headroom covers sublane/lane padding of the tiny index arrays and internal scratch).
    per_layer = sum(math.prod(w.shape[1:]) * w.dtype.itemsize for w in weights)
    io_bytes = sum(a.size * a.dtype.itemsize
                   for a in (srci, dsti, colr, ebat, nbat, nbatr,
                             x_slab, e_slab, u_slab, kp["out_w"], kp["out_b"]))
    scratch_bytes = (NP + EP + GP) * slab * 4
    out_bytes = NP * slab * 4
    vmem_limit = int(2 * per_layer + 4 * io_bytes + scratch_bytes
                     + 2 * out_bytes + (8 << 20))

    grid_spec = pltpu.PrefetchScalarGridSpec(
        num_scalar_prefetch=0,
        grid=(L,),
        in_specs=in_specs,
        out_specs=pl.BlockSpec((NP, slab), lambda l: (0, 0)),
        scratch_shapes=[pltpu.VMEM((NP, slab), jnp.float32),
                        pltpu.VMEM((EP, slab), jnp.float32),
                        pltpu.VMEM((GP, slab), jnp.float32)])

    return pl.pallas_call(
        _graphnet_fused_kernel,
        out_shape=jax.ShapeDtypeStruct((NP, slab), jnp.float32),
        grid_spec=grid_spec,
        compiler_params=pltpu.CompilerParams(
            dimension_semantics=("arbitrary",),   # layers are sequentially dependent
            vmem_limit_bytes=vmem_limit),
    )(srci, dsti, colr, ebat, nbat, nbatr, x_slab, e_slab, u_slab,
      *weights, kp["out_w"], kp["out_b"])


def graphnet_forward(kparams, graph, x, *, node_out, fx0, slab=SLAB):
    N, D1, D2, _ = x.shape
    NP = N * D1 * D2
    x_slab = jnp.zeros((NP, slab), jnp.float32).at[:, :fx0].set(
        x.reshape(NP, fx0).astype(jnp.float32))
    out_slab = _fused_call(kparams, graph["idx"], x_slab,
                           graph["e_slab"], graph["u_slab"])
    return out_slab[:, :node_out].reshape(N, D1, D2, node_out)


# ---------------------------------------------------------------------------
# Pure-JAX (XLA) reference mirroring GraphNet.forward, with the same bf16-operand /
# f32-accumulation precision convention as the kernel.
# ---------------------------------------------------------------------------

def reference_forward(params, x, edge_index, edge_attr_raw, batch, global_input_size):
    f32, bf16 = jnp.float32, jnp.bfloat16
    N, D1, D2, _ = x.shape
    E = edge_index.shape[1]
    row, col = edge_index[0], edge_index[1]
    num_graphs = 1

    def rb(a):  # matches the kernel's bf16 rounding of scatter/aggregation MXU operands
        return a.astype(bf16).astype(f32)

    def mlp(h, p):
        h = jnp.dot(h.astype(bf16), p["w1"].astype(bf16), preferred_element_type=f32) + p["b1"]
        h = jnp.maximum(h, 0.0)
        h = jnp.dot(h.astype(bf16), p["w2"].astype(bf16), preferred_element_type=f32) + p["b2"]
        h = jnp.maximum(h, 0.0)
        return jnp.dot(h.astype(bf16), p["w3"].astype(bf16), preferred_element_type=f32) + p["b3"]

    edge_attr = jnp.broadcast_to(
        edge_attr_raw, (E, D1, D2, edge_attr_raw.shape[-1])).astype(f32)
    u = jnp.zeros((num_graphs, D1, D2, global_input_size), f32)
    xc = x.astype(f32)
    for lp in params["layers"]:
        src = jnp.take(xc, row, axis=0)
        dst = jnp.take(xc, col, axis=0)
        u_e = jnp.take(u, jnp.take(batch, row), axis=0)
        upd_e = mlp(jnp.concatenate([src, dst, edge_attr, u_e], -1), lp["edge"])
        msg = jax.ops.segment_sum(rb(upd_e), col, num_segments=N)
        u_n = jnp.take(u, batch, axis=0)
        upd_x = mlp(jnp.concatenate([xc, msg, u_n], -1), lp["node"])
        agg_node = jax.ops.segment_sum(rb(upd_x), batch, num_segments=num_graphs)
        agg_edge = jax.ops.segment_sum(rb(msg), batch, num_segments=num_graphs)
        upd_u = mlp(jnp.concatenate([agg_node, agg_edge, u], -1), lp["glob"])
        xc = jnp.concatenate([upd_x, xc], -1)
        edge_attr = jnp.concatenate([upd_e, edge_attr], -1)
        u = jnp.concatenate([upd_u, u], -1)
    return jnp.dot(xc.astype(bf16), params["out_w"].astype(bf16),
                   preferred_element_type=f32) + params["out_b"]


# ---------------------------------------------------------------------------
# Demo
# ---------------------------------------------------------------------------

if __name__ == "__main__":
    key = jax.random.PRNGKey(0)

    # Config consistent with the module's constructor.
    node_input_size = 4
    edge_input_size = 3
    global_input_size = 5
    hidden_size = 128            # MXU / 128-lane friendly hidden width
    updated_node_size = 6
    updated_edge_size = 6
    updated_global_size = 6
    node_output_size = 4
    gn_layer_num = 2

    N, E, D1, D2 = 8, 16, 2, 2   # node rows = 32, edge rows = 64 (flattened with D1*D2)

    kx, ke, ki, kprm = jax.random.split(key, 4)
    x = jax.random.normal(kx, (N, D1, D2, node_input_size), dtype=jnp.float32)
    edge_attr = jax.random.normal(ke, (E, 1, 1, edge_input_size), dtype=jnp.float32)
    edge_index = jax.random.randint(ki, (2, E), 0, N, dtype=jnp.int32)
    batch = jnp.zeros((N,), dtype=jnp.int32)  # Batch.from_data_list([data]): single graph

    params = make_graphnet_params(
        kprm, node_input_size, edge_input_size, global_input_size, hidden_size,
        updated_node_size, updated_edge_size, updated_global_size,
        node_output_size, gn_layer_num)
    kparams, layout = prepare_kernel_params(
        params, node_input_size, edge_input_size, global_input_size,
        updated_node_size, updated_edge_size, updated_global_size)
    graph = prepare_graph(edge_index, batch, edge_attr, N, D1, D2, layout)

    fwd = jax.jit(functools.partial(
        graphnet_forward, node_out=node_output_size, fx0=node_input_size))

    out = fwd(kparams, graph, x)
    jax.block_until_ready(out)
    assert out.shape == (N, D1, D2, node_output_size), out.shape

    # Correctness check against the pure-XLA reference (same precision convention).
    ref = reference_forward(params, x, edge_index, edge_attr, batch, global_input_size)
    err = float(jnp.max(jnp.abs(out - ref)))
    assert err < 1e-2, f"max |pallas - reference| = {err}"

    print("KERNEL_OK")
</pallas_src>

<mosaic_0001>
module attributes {stable_mosaic.version = 11 : i64} {
  func.func @_graphnet_fused_kernel(%arg0: i32, %arg1: memref<64x1xi32, #tpu.memory_space<vmem>>, %arg2: memref<64x1xi32, #tpu.memory_space<vmem>>, %arg3: memref<1x64xi32, #tpu.memory_space<vmem>>, %arg4: memref<64x1xi32, #tpu.memory_space<vmem>>, %arg5: memref<32x1xi32, #tpu.memory_space<vmem>>, %arg6: memref<1x32xi32, #tpu.memory_space<vmem>>, %arg7: memref<32x128xf32, #tpu.memory_space<vmem>>, %arg8: memref<64x128xf32, #tpu.memory_space<vmem>>, %arg9: memref<4x128xf32, #tpu.memory_space<vmem>>, %arg10: memref<1x128x128xbf16, #tpu.memory_space<vmem>>, %arg11: memref<1x128x128xbf16, #tpu.memory_space<vmem>>, %arg12: memref<1x1x128xf32, #tpu.memory_space<vmem>>, %arg13: memref<1x128x128xbf16, #tpu.memory_space<vmem>>, %arg14: memref<1x1x128xf32, #tpu.memory_space<vmem>>, %arg15: memref<1x128x128xbf16, #tpu.memory_space<vmem>>, %arg16: memref<1x1x128xf32, #tpu.memory_space<vmem>>, %arg17: memref<1x128x128xbf16, #tpu.memory_space<vmem>>, %arg18: memref<1x1x128xf32, #tpu.memory_space<vmem>>, %arg19: memref<1x128x128xbf16, #tpu.memory_space<vmem>>, %arg20: memref<1x1x128xf32, #tpu.memory_space<vmem>>, %arg21: memref<1x128x128xbf16, #tpu.memory_space<vmem>>, %arg22: memref<1x1x128xf32, #tpu.memory_space<vmem>>, %arg23: memref<1x128x128xbf16, #tpu.memory_space<vmem>>, %arg24: memref<1x1x128xf32, #tpu.memory_space<vmem>>, %arg25: memref<1x128x128xbf16, #tpu.memory_space<vmem>>, %arg26: memref<1x1x128xf32, #tpu.memory_space<vmem>>, %arg27: memref<1x128x128xbf16, #tpu.memory_space<vmem>>, %arg28: memref<1x1x128xf32, #tpu.memory_space<vmem>>, %arg29: memref<128x128xbf16, #tpu.memory_space<vmem>>, %arg30: memref<1x128xf32, #tpu.memory_space<vmem>>, %arg31: memref<32x128xf32, #tpu.memory_space<vmem>>, %arg32: memref<32x128xf32, #tpu.memory_space<vmem>>, %arg33: memref<64x128xf32, #tpu.memory_space<vmem>>, %arg34: memref<4x128xf32, #tpu.memory_space<vmem>>) attributes {dimension_semantics = [#tpu.dimension_semantics<arbitrary>], iteration_bounds = array<i64: 2>, scalar_prefetch = 0 : i64, scratch_operands = 3 : i64, tpu.core_type = #tpu.core_type<tc>, window_params = [{pipeline_mode = #tpu.pipeline_mode<synchronous>, transform_indices = @transform_0, window_bounds = array<i64: 64, 1>}, {pipeline_mode = #tpu.pipeline_mode<synchronous>, transform_indices = @transform_1, window_bounds = array<i64: 64, 1>}, {pipeline_mode = #tpu.pipeline_mode<synchronous>, transform_indices = @transform_2, window_bounds = array<i64: 1, 64>}, {pipeline_mode = #tpu.pipeline_mode<synchronous>, transform_indices = @transform_3, window_bounds = array<i64: 64, 1>}, {pipeline_mode = #tpu.pipeline_mode<synchronous>, transform_indices = @transform_4, window_bounds = array<i64: 32, 1>}, {pipeline_mode = #tpu.pipeline_mode<synchronous>, transform_indices = @transform_5, window_bounds = array<i64: 1, 32>}, {pipeline_mode = #tpu.pipeline_mode<synchronous>, transform_indices = @transform_6, window_bounds = array<i64: 32, 128>}, {pipeline_mode = #tpu.pipeline_mode<synchronous>, transform_indices = @transform_7, window_bounds = array<i64: 64, 128>}, {pipeline_mode = #tpu.pipeline_mode<synchronous>, transform_indices = @transform_8, window_bounds = array<i64: 4, 128>}, {transform_indices = @transform_9, window_bounds = array<i64: 1, 128, 128>}, {transform_indices = @transform_10, window_bounds = array<i64: 1, 128, 128>}, {transform_indices = @transform_11, window_bounds = array<i64: 1, 1, 128>}, {transform_indices = @transform_12, window_bounds = array<i64: 1, 128, 128>}, {transform_indices = @transform_13, window_bounds = array<i64: 1, 1, 128>}, {transform_indices = @transform_14, window_bounds = array<i64: 1, 128, 128>}, {transform_indices = @transform_15, window_bounds = array<i64: 1, 1, 128>}, {transform_indices = @transform_16, window_bounds = array<i64: 1, 128, 128>}, {transform_indices = @transform_17, window_bounds = array<i64: 1, 1, 128>}, {transform_indices = @transform_18, window_bounds = array<i64: 1, 128, 128>}, {transform_indices = @transform_19, window_bounds = array<i64: 1, 1, 128>}, {transform_indices = @transform_20, window_bounds = array<i64: 1, 128, 128>}, {transform_indices = @transform_21, window_bounds = array<i64: 1, 1, 128>}, {transform_indices = @transform_22, window_bounds = array<i64: 1, 128, 128>}, {transform_indices = @transform_23, window_bounds = array<i64: 1, 1, 128>}, {transform_indices = @transform_24, window_bounds = array<i64: 1, 128, 128>}, {transform_indices = @transform_25, window_bounds = array<i64: 1, 1, 128>}, {transform_indices = @transform_26, window_bounds = array<i64: 1, 128, 128>}, {transform_indices = @transform_27, window_bounds = array<i64: 1, 1, 128>}, {pipeline_mode = #tpu.pipeline_mode<synchronous>, transform_indices = @transform_28, window_bounds = array<i64: 128, 128>}, {pipeline_mode = #tpu.pipeline_mode<synchronous>, transform_indices = @transform_29, window_bounds = array<i64: 1, 128>}, {pipeline_mode = #tpu.pipeline_mode<synchronous>, transform_indices = @transform_30, window_bounds = array<i64: 32, 128>}]} {
    %c0_i32 = arith.constant 0 : i32
    %0 = arith.cmpi eq, %arg0, %c0_i32 : i32
    %1 = arith.extui %0 : i1 to i32
    %c0_i32_0 = arith.constant 0 : i32
    %2 = arith.cmpi ne, %1, %c0_i32_0 : i32
    scf.if %2 {
      %c0_104 = arith.constant 0 : index
      %c0_105 = arith.constant 0 : index
      %164 = vector.load %arg7[%c0_104, %c0_105] : memref<32x128xf32, #tpu.memory_space<vmem>>, vector<32x128xf32>
      %c0_106 = arith.constant 0 : index
      %c0_107 = arith.constant 0 : index
      %165 = vector.load %arg32[%c0_106, %c0_107] : memref<32x128xf32, #tpu.memory_space<vmem>>, vector<32x128xf32>
      tpu.vector_store %arg32[%c0_106, %c0_107], %164 {strides = array<i32>} : memref<32x128xf32, #tpu.memory_space<vmem>>, vector<32x128xf32>,
      %c0_108 = arith.constant 0 : index
      %c0_109 = arith.constant 0 : index
      %166 = vector.load %arg8[%c0_108, %c0_109] : memref<64x128xf32, #tpu.memory_space<vmem>>, vector<64x128xf32>
      %c0_110 = arith.constant 0 : index
      %c0_111 = arith.constant 0 : index
      %167 = vector.load %arg33[%c0_110, %c0_111] : memref<64x128xf32, #tpu.memory_space<vmem>>, vector<64x128xf32>
      tpu.vector_store %arg33[%c0_110, %c0_111], %166 {strides = array<i32>} : memref<64x128xf32, #tpu.memory_space<vmem>>, vector<64x128xf32>,
      %c0_112 = arith.constant 0 : index
      %c0_113 = arith.constant 0 : index
      %168 = vector.load %arg9[%c0_112, %c0_113] : memref<4x128xf32, #tpu.memory_space<vmem>>, vector<4x128xf32>
      %c0_114 = arith.constant 0 : index
      %c0_115 = arith.constant 0 : index
      %169 = vector.load %arg34[%c0_114, %c0_115] : memref<4x128xf32, #tpu.memory_space<vmem>>, vector<4x128xf32>
      tpu.vector_store %arg34[%c0_114, %c0_115], %168 {strides = array<i32>} : memref<4x128xf32, #tpu.memory_space<vmem>>, vector<4x128xf32>,
    } else {
    }
    %c0 = arith.constant 0 : index
    %c0_1 = arith.constant 0 : index
    %3 = vector.load %arg32[%c0, %c0_1] : memref<32x128xf32, #tpu.memory_space<vmem>>, vector<32x128xf32>
    %c0_2 = arith.constant 0 : index
    %c0_3 = arith.constant 0 : index
    %4 = vector.load %arg33[%c0_2, %c0_3] : memref<64x128xf32, #tpu.memory_space<vmem>>, vector<64x128xf32>
    %c0_4 = arith.constant 0 : index
    %c0_5 = arith.constant 0 : index
    %5 = vector.load %arg34[%c0_4, %c0_5] : memref<4x128xf32, #tpu.memory_space<vmem>>, vector<4x128xf32>
    %6 = arith.truncf %3 : vector<32x128xf32> to vector<32x128xbf16>
    %7 = arith.truncf %5 : vector<4x128xf32> to vector<4x128xbf16>
    %c0_6 = arith.constant 0 : index
    %c0_7 = arith.constant 0 : index
    %8 = vector.load %arg1[%c0_6, %c0_7] : memref<64x1xi32, #tpu.memory_space<vmem>>, vector<64x1xi32>
    %9 = tpu.iota {dimensions = array<i32: 1>} : vector<64x32xi32>
    %10 = vector.broadcast %8 : vector<64x1xi32> to vector<64x32xi32>
    %11 = arith.cmpi eq, %10, %9 : vector<64x32xi32>
    %12 = arith.extui %11 : vector<64x32xi1> to vector<64x32xi32>
    %13 = arith.sitofp %12 : vector<64x32xi32> to vector<64x32xf32>
    %14 = arith.truncf %13 : vector<64x32xf32> to vector<64x32xbf16>
    %cst = arith.constant dense<0.000000e+00> : vector<64x128xf32>
    %15 = tpu.matmul %14, %6, %cst {dimension_numbers = #tpu.dot_dimension_numbers<[1], [0], [0], [1], [0, 0, 1, 1], [], []>} : vector<64x32xbf16>, vector<32x128xbf16>, vector<64x128xf32> -> vector<64x128xf32>
    %c0_8 = arith.constant 0 : index
    %c0_9 = arith.constant 0 : index
    %16 = vector.load %arg2[%c0_8, %c0_9] : memref<64x1xi32, #tpu.memory_space<vmem>>, vector<64x1xi32>
    %17 = tpu.iota {dimensions = array<i32: 1>} : vector<64x32xi32>
    %18 = vector.broadcast %16 : vector<64x1xi32> to vector<64x32xi32>
    %19 = arith.cmpi eq, %18, %17 : vector<64x32xi32>
    %20 = arith.extui %19 : vector<64x32xi1> to vector<64x32xi32>
    %21 = arith.sitofp %20 : vector<64x32xi32> to vector<64x32xf32>
    %22 = arith.truncf %21 : vector<64x32xf32> to vector<64x32xbf16>
    %cst_10 = arith.constant dense<0.000000e+00> : vector<64x128xf32>
    %23 = tpu.matmul %22, %6, %cst_10 {dimension_numbers = #tpu.dot_dimension_numbers<[1], [0], [0], [1], [0, 0, 1, 1], [], []>} : vector<64x32xbf16>, vector<32x128xbf16>, vector<64x128xf32> -> vector<64x128xf32>
    %c0_11 = arith.constant 0 : index
    %c0_12 = arith.constant 0 : index
    %24 = vector.load %arg4[%c0_11, %c0_12] : memref<64x1xi32, #tpu.memory_space<vmem>>, vector<64x1xi32>
    %25 = tpu.iota {dimensions = array<i32: 1>} : vector<64x4xi32>
    %26 = vector.broadcast %24 : vector<64x1xi32> to vector<64x4xi32>
    %27 = arith.cmpi eq, %26, %25 : vector<64x4xi32>
    %28 = arith.extui %27 : vector<64x4xi1> to vector<64x4xi32>
    %29 = arith.sitofp %28 : vector<64x4xi32> to vector<64x4xf32>
    %30 = arith.truncf %29 : vector<64x4xf32> to vector<64x4xbf16>
    %cst_13 = arith.constant dense<0.000000e+00> : vector<64x128xf32>
    %31 = tpu.matmul %30, %7, %cst_13 {dimension_numbers = #tpu.dot_dimension_numbers<[1], [0], [0], [1], [0, 0, 1, 1], [], []>} : vector<64x4xbf16>, vector<4x128xbf16>, vector<64x128xf32> -> vector<64x128xf32>
    %32 = arith.truncf %15 : vector<64x128xf32> to vector<64x128xbf16>
    %c0_14 = arith.constant 0 : index
    %c0_15 = arith.constant 0 : index
    %c0_16 = arith.constant 0 : index
    %33 = vector.load %arg10[%c0_14, %c0_15, %c0_16] : memref<1x128x128xbf16, #tpu.memory_space<vmem>>, vector<1x128x128xbf16>
    %34 = vector.shape_cast %33 : vector<1x128x128xbf16> to vector<128x128xbf16>
    %cst_17 = arith.constant dense<0.000000e+00> : vector<64x128xf32>
    %35 = tpu.matmul %32, %34, %cst_17 {dimension_numbers = #tpu.dot_dimension_numbers<[1], [0], [0], [1], [0, 0, 1, 1], [], []>} : vector<64x128xbf16>, vector<128x128xbf16>, vector<64x128xf32> -> vector<64x128xf32>
    %36 = arith.addf %23, %4 : vector<64x128xf32>
    %37 = arith.addf %36, %31 : vector<64x128xf32>
    %38 = arith.truncf %37 : vector<64x128xf32> to vector<64x128xbf16>
    %c0_18 = arith.constant 0 : index
    %c0_19 = arith.constant 0 : index
    %c0_20 = arith.constant 0 : index
    %39 = vector.load %arg11[%c0_18, %c0_19, %c0_20] : memref<1x128x128xbf16, #tpu.memory_space<vmem>>, vector<1x128x128xbf16>
    %40 = vector.shape_cast %39 : vector<1x128x128xbf16> to vector<128x128xbf16>
    %cst_21 = arith.constant dense<0.000000e+00> : vector<64x128xf32>
    %41 = tpu.matmul %38, %40, %cst_21 {dimension_numbers = #tpu.dot_dimension_numbers<[1], [0], [0], [1], [0, 0, 1, 1], [], []>} : vector<64x128xbf16>, vector<128x128xbf16>, vector<64x128xf32> -> vector<64x128xf32>
    %42 = arith.addf %35, %41 : vector<64x128xf32>
    %c0_22 = arith.constant 0 : index
    %c0_23 = arith.constant 0 : index
    %c0_24 = arith.constant 0 : index
    %43 = vector.load %arg12[%c0_22, %c0_23, %c0_24] : memref<1x1x128xf32, #tpu.memory_space<vmem>>, vector<1x1x128xf32>
    %44 = vector.shape_cast %43 : vector<1x1x128xf32> to vector<1x128xf32>
    %45 = vector.broadcast %44 : vector<1x128xf32> to vector<64x128xf32>
    %46 = arith.addf %42, %45 : vector<64x128xf32>
    %cst_25 = arith.constant 0.000000e+00 : f32
    %47 = vector.broadcast %cst_25 : f32 to vector<64x128xf32>
    %48 = arith.maximumf %46, %47 : vector<64x128xf32>
    %49 = arith.truncf %48 : vector<64x128xf32> to vector<64x128xbf16>
    %c0_26 = arith.constant 0 : index
    %c0_27 = arith.constant 0 : index
    %c0_28 = arith.constant 0 : index
    %50 = vector.load %arg13[%c0_26, %c0_27, %c0_28] : memref<1x128x128xbf16, #tpu.memory_space<vmem>>, vector<1x128x128xbf16>
    %51 = vector.shape_cast %50 : vector<1x128x128xbf16> to vector<128x128xbf16>
    %cst_29 = arith.constant dense<0.000000e+00> : vector<64x128xf32>
    %52 = tpu.matmul %49, %51, %cst_29 {dimension_numbers = #tpu.dot_dimension_numbers<[1], [0], [0], [1], [0, 0, 1, 1], [], []>} : vector<64x128xbf16>, vector<128x128xbf16>, vector<64x128xf32> -> vector<64x128xf32>
    %c0_30 = arith.constant 0 : index
    %c0_31 = arith.constant 0 : index
    %c0_32 = arith.constant 0 : index
    %53 = vector.load %arg14[%c0_30, %c0_31, %c0_32] : memref<1x1x128xf32, #tpu.memory_space<vmem>>, vector<1x1x128xf32>
    %54 = vector.shape_cast %53 : vector<1x1x128xf32> to vector<1x128xf32>
    %55 = vector.broadcast %54 : vector<1x128xf32> to vector<64x128xf32>
    %56 = arith.addf %52, %55 : vector<64x128xf32>
    %cst_33 = arith.constant 0.000000e+00 : f32
    %57 = vector.broadcast %cst_33 : f32 to vector<64x128xf32>
    %58 = arith.maximumf %56, %57 : vector<64x128xf32>
    %59 = arith.truncf %58 : vector<64x128xf32> to vector<64x128xbf16>
    %c0_34 = arith.constant 0 : index
    %c0_35 = arith.constant 0 : index
    %c0_36 = arith.constant 0 : index
    %60 = vector.load %arg15[%c0_34, %c0_35, %c0_36] : memref<1x128x128xbf16, #tpu.memory_space<vmem>>, vector<1x128x128xbf16>
    %61 = vector.shape_cast %60 : vector<1x128x128xbf16> to vector<128x128xbf16>
    %cst_37 = arith.constant dense<0.000000e+00> : vector<64x128xf32>
    %62 = tpu.matmul %59, %61, %cst_37 {dimension_numbers = #tpu.dot_dimension_numbers<[1], [0], [0], [1], [0, 0, 1, 1], [], []>} : vector<64x128xbf16>, vector<128x128xbf16>, vector<64x128xf32> -> vector<64x128xf32>
    %c0_38 = arith.constant 0 : index
    %c0_39 = arith.constant 0 : index
    %c0_40 = arith.constant 0 : index
    %63 = vector.load %arg16[%c0_38, %c0_39, %c0_40] : memref<1x1x128xf32, #tpu.memory_space<vmem>>, vector<1x1x128xf32>
    %64 = vector.shape_cast %63 : vector<1x1x128xf32> to vector<1x128xf32>
    %65 = vector.broadcast %64 : vector<1x128xf32> to vector<64x128xf32>
    %66 = arith.addf %62, %65 : vector<64x128xf32>
    %67 = arith.addf %4, %66 : vector<64x128xf32>
    %c0_41 = arith.constant 0 : index
    %c0_42 = arith.constant 0 : index
    %68 = vector.load %arg33[%c0_41, %c0_42] : memref<64x128xf32, #tpu.memory_space<vmem>>, vector<64x128xf32>
    tpu.vector_store %arg33[%c0_41, %c0_42], %67 {strides = array<i32>} : memref<64x128xf32, #tpu.memory_space<vmem>>, vector<64x128xf32>,
    %69 = tpu.iota {dimensions = array<i32: 0>} : vector<32x64xi32>
    %c0_43 = arith.constant 0 : index
    %c0_44 = arith.constant 0 : index
    %70 = vector.load %arg3[%c0_43, %c0_44] : memref<1x64xi32, #tpu.memory_space<vmem>>, vector<1x64xi32>
    %71 = vector.broadcast %70 : vector<1x64xi32> to vector<32x64xi32>
    %72 = arith.cmpi eq, %69, %71 : vector<32x64xi32>
    %73 = arith.extui %72 : vector<32x64xi1> to vector<32x64xi32>
    %74 = arith.sitofp %73 : vector<32x64xi32> to vector<32x64xf32>
    %75 = arith.truncf %74 : vector<32x64xf32> to vector<32x64xbf16>
    %76 = arith.truncf %66 : vector<64x128xf32> to vector<64x128xbf16>
    %cst_45 = arith.constant dense<0.000000e+00> : vector<32x128xf32>
    %77 = tpu.matmul %75, %76, %cst_45 {dimension_numbers = #tpu.dot_dimension_numbers<[1], [0], [0], [1], [0, 0, 1, 1], [], []>} : vector<32x64xbf16>, vector<64x128xbf16>, vector<32x128xf32> -> vector<32x128xf32>
    %c0_46 = arith.constant 0 : index
    %c0_47 = arith.constant 0 : index
    %78 = vector.load %arg5[%c0_46, %c0_47] : memref<32x1xi32, #tpu.memory_space<vmem>>, vector<32x1xi32>
    %79 = tpu.iota {dimensions = array<i32: 1>} : vector<32x4xi32>
    %80 = vector.broadcast %78 : vector<32x1xi32> to vector<32x4xi32>
    %81 = arith.cmpi eq, %80, %79 : vector<32x4xi32>
    %82 = arith.extui %81 : vector<32x4xi1> to vector<32x4xi32>
    %83 = arith.sitofp %82 : vector<32x4xi32> to vector<32x4xf32>
    %84 = arith.truncf %83 : vector<32x4xf32> to vector<32x4xbf16>
    %cst_48 = arith.constant dense<0.000000e+00> : vector<32x128xf32>
    %85 = tpu.matmul %84, %7, %cst_48 {dimension_numbers = #tpu.dot_dimension_numbers<[1], [0], [0], [1], [0, 0, 1, 1], [], []>} : vector<32x4xbf16>, vector<4x128xbf16>, vector<32x128xf32> -> vector<32x128xf32>
    %86 = arith.addf %3, %77 : vector<32x128xf32>
    %87 = arith.addf %86, %85 : vector<32x128xf32>
    %88 = arith.truncf %87 : vector<32x128xf32> to vector<32x128xbf16>
    %c0_49 = arith.constant 0 : index
    %c0_50 = arith.constant 0 : index
    %c0_51 = arith.constant 0 : index
    %89 = vector.load %arg17[%c0_49, %c0_50, %c0_51] : memref<1x128x128xbf16, #tpu.memory_space<vmem>>, vector<1x128x128xbf16>
    %90 = vector.shape_cast %89 : vector<1x128x128xbf16> to vector<128x128xbf16>
    %cst_52 = arith.constant dense<0.000000e+00> : vector<32x128xf32>
    %91 = tpu.matmul %88, %90, %cst_52 {dimension_numbers = #tpu.dot_dimension_numbers<[1], [0], [0], [1], [0, 0, 1, 1], [], []>} : vector<32x128xbf16>, vector<128x128xbf16>, vector<32x128xf32> -> vector<32x128xf32>
    %c0_53 = arith.constant 0 : index
    %c0_54 = arith.constant 0 : index
    %c0_55 = arith.constant 0 : index
    %92 = vector.load %arg18[%c0_53, %c0_54, %c0_55] : memref<1x1x128xf32, #tpu.memory_space<vmem>>, vector<1x1x128xf32>
    %93 = vector.shape_cast %92 : vector<1x1x128xf32> to vector<1x128xf32>
    %94 = vector.broadcast %93 : vector<1x128xf32> to vector<32x128xf32>
    %95 = arith.addf %91, %94 : vector<32x128xf32>
    %cst_56 = arith.constant 0.000000e+00 : f32
    %96 = vector.broadcast %cst_56 : f32 to vector<32x128xf32>
    %97 = arith.maximumf %95, %96 : vector<32x128xf32>
    %98 = arith.truncf %97 : vector<32x128xf32> to vector<32x128xbf16>
    %c0_57 = arith.constant 0 : index
    %c0_58 = arith.constant 0 : index
    %c0_59 = arith.constant 0 : index
    %99 = vector.load %arg19[%c0_57, %c0_58, %c0_59] : memref<1x128x128xbf16, #tpu.memory_space<vmem>>, vector<1x128x128xbf16>
    %100 = vector.shape_cast %99 : vector<1x128x128xbf16> to vector<128x128xbf16>
    %cst_60 = arith.constant dense<0.000000e+00> : vector<32x128xf32>
    %101 = tpu.matmul %98, %100, %cst_60 {dimension_numbers = #tpu.dot_dimension_numbers<[1], [0], [0], [1], [0, 0, 1, 1], [], []>} : vector<32x128xbf16>, vector<128x128xbf16>, vector<32x128xf32> -> vector<32x128xf32>
    %c0_61 = arith.constant 0 : index
    %c0_62 = arith.constant 0 : index
    %c0_63 = arith.constant 0 : index
    %102 = vector.load %arg20[%c0_61, %c0_62, %c0_63] : memref<1x1x128xf32, #tpu.memory_space<vmem>>, vector<1x1x128xf32>
    %103 = vector.shape_cast %102 : vector<1x1x128xf32> to vector<1x128xf32>
    %104 = vector.broadcast %103 : vector<1x128xf32> to vector<32x128xf32>
    %105 = arith.addf %101, %104 : vector<32x128xf32>
    %cst_64 = arith.constant 0.000000e+00 : f32
    %106 = vector.broadcast %cst_64 : f32 to vector<32x128xf32>
    %107 = arith.maximumf %105, %106 : vector<32x128xf32>
    %108 = arith.truncf %107 : vector<32x128xf32> to vector<32x128xbf16>
    %c0_65 = arith.constant 0 : index
    %c0_66 = arith.constant 0 : index
    %c0_67 = arith.constant 0 : index
    %109 = vector.load %arg21[%c0_65, %c0_66, %c0_67] : memref<1x128x128xbf16, #tpu.memory_space<vmem>>, vector<1x128x128xbf16>
    %110 = vector.shape_cast %109 : vector<1x128x128xbf16> to vector<128x128xbf16>
    %cst_68 = arith.constant dense<0.000000e+00> : vector<32x128xf32>
    %111 = tpu.matmul %108, %110, %cst_68 {dimension_numbers = #tpu.dot_dimension_numbers<[1], [0], [0], [1], [0, 0, 1, 1], [], []>} : vector<32x128xbf16>, vector<128x128xbf16>, vector<32x128xf32> -> vector<32x128xf32>
    %c0_69 = arith.constant 0 : index
    %c0_70 = arith.constant 0 : index
    %c0_71 = arith.constant 0 : index
    %112 = vector.load %arg22[%c0_69, %c0_70, %c0_71] : memref<1x1x128xf32, #tpu.memory_space<vmem>>, vector<1x1x128xf32>
    %113 = vector.shape_cast %112 : vector<1x1x128xf32> to vector<1x128xf32>
    %114 = vector.broadcast %113 : vector<1x128xf32> to vector<32x128xf32>
    %115 = arith.addf %111, %114 : vector<32x128xf32>
    %116 = arith.addf %3, %115 : vector<32x128xf32>
    %c0_72 = arith.constant 0 : index
    %c0_73 = arith.constant 0 : index
    %117 = vector.load %arg32[%c0_72, %c0_73] : memref<32x128xf32, #tpu.memory_space<vmem>>, vector<32x128xf32>
    tpu.vector_store %arg32[%c0_72, %c0_73], %116 {strides = array<i32>} : memref<32x128xf32, #tpu.memory_space<vmem>>, vector<32x128xf32>,
    %118 = tpu.iota {dimensions = array<i32: 0>} : vector<4x32xi32>
    %c0_74 = arith.constant 0 : index
    %c0_75 = arith.constant 0 : index
    %119 = vector.load %arg6[%c0_74, %c0_75] : memref<1x32xi32, #tpu.memory_space<vmem>>, vector<1x32xi32>
    %120 = vector.broadcast %119 : vector<1x32xi32> to vector<4x32xi32>
    %121 = arith.cmpi eq, %118, %120 : vector<4x32xi32>
    %122 = arith.extui %121 : vector<4x32xi1> to vector<4x32xi32>
    %123 = arith.sitofp %122 : vector<4x32xi32> to vector<4x32xf32>
    %124 = arith.truncf %123 : vector<4x32xf32> to vector<4x32xbf16>
    %125 = arith.truncf %115 : vector<32x128xf32> to vector<32x128xbf16>
    %cst_76 = arith.constant dense<0.000000e+00> : vector<4x128xf32>
    %126 = tpu.matmul %124, %125, %cst_76 {dimension_numbers = #tpu.dot_dimension_numbers<[1], [0], [0], [1], [0, 0, 1, 1], [], []>} : vector<4x32xbf16>, vector<32x128xbf16>, vector<4x128xf32> -> vector<4x128xf32>
    %127 = arith.truncf %77 : vector<32x128xf32> to vector<32x128xbf16>
    %cst_77 = arith.constant dense<0.000000e+00> : vector<4x128xf32>
    %128 = tpu.matmul %124, %127, %cst_77 {dimension_numbers = #tpu.dot_dimension_numbers<[1], [0], [0], [1], [0, 0, 1, 1], [], []>} : vector<4x32xbf16>, vector<32x128xbf16>, vector<4x128xf32> -> vector<4x128xf32>
    %129 = arith.addf %126, %128 : vector<4x128xf32>
    %130 = arith.addf %129, %5 : vector<4x128xf32>
    %131 = arith.truncf %130 : vector<4x128xf32> to vector<4x128xbf16>
    %c0_78 = arith.constant 0 : index
    %c0_79 = arith.constant 0 : index
    %c0_80 = arith.constant 0 : index
    %132 = vector.load %arg23[%c0_78, %c0_79, %c0_80] : memref<1x128x128xbf16, #tpu.memory_space<vmem>>, vector<1x128x128xbf16>
    %133 = vector.shape_cast %132 : vector<1x128x128xbf16> to vector<128x128xbf16>
    %cst_81 = arith.constant dense<0.000000e+00> : vector<4x128xf32>
    %134 = tpu.matmul %131, %133, %cst_81 {dimension_numbers = #tpu.dot_dimension_numbers<[1], [0], [0], [1], [0, 0, 1, 1], [], []>} : vector<4x128xbf16>, vector<128x128xbf16>, vector<4x128xf32> -> vector<4x128xf32>
    %c0_82 = arith.constant 0 : index
    %c0_83 = arith.constant 0 : index
    %c0_84 = arith.constant 0 : index
    %135 = vector.load %arg24[%c0_82, %c0_83, %c0_84] : memref<1x1x128xf32, #tpu.memory_space<vmem>>, vector<1x1x128xf32>
    %136 = vector.shape_cast %135 : vector<1x1x128xf32> to vector<1x128xf32>
    %137 = vector.broadcast %136 : vector<1x128xf32> to vector<4x128xf32>
    %138 = arith.addf %134, %137 : vector<4x128xf32>
    %cst_85 = arith.constant 0.000000e+00 : f32
    %139 = vector.broadcast %cst_85 : f32 to vector<4x128xf32>
    %140 = arith.maximumf %138, %139 : vector<4x128xf32>
    %141 = arith.truncf %140 : vector<4x128xf32> to vector<4x128xbf16>
    %c0_86 = arith.constant 0 : index
    %c0_87 = arith.constant 0 : index
    %c0_88 = arith.constant 0 : index
    %142 = vector.load %arg25[%c0_86, %c0_87, %c0_88] : memref<1x128x128xbf16, #tpu.memory_space<vmem>>, vector<1x128x128xbf16>
    %143 = vector.shape_cast %142 : vector<1x128x128xbf16> to vector<128x128xbf16>
    %cst_89 = arith.constant dense<0.000000e+00> : vector<4x128xf32>
    %144 = tpu.matmul %141, %143, %cst_89 {dimension_numbers = #tpu.dot_dimension_numbers<[1], [0], [0], [1], [0, 0, 1, 1], [], []>} : vector<4x128xbf16>, vector<128x128xbf16>, vector<4x128xf32> -> vector<4x128xf32>
    %c0_90 = arith.constant 0 : index
    %c0_91 = arith.constant 0 : index
    %c0_92 = arith.constant 0 : index
    %145 = vector.load %arg26[%c0_90, %c0_91, %c0_92] : memref<1x1x128xf32, #tpu.memory_space<vmem>>, vector<1x1x128xf32>
    %146 = vector.shape_cast %145 : vector<1x1x128xf32> to vector<1x128xf32>
    %147 = vector.broadcast %146 : vector<1x128xf32> to vector<4x128xf32>
    %148 = arith.addf %144, %147 : vector<4x128xf32>
    %cst_93 = arith.constant 0.000000e+00 : f32
    %149 = vector.broadcast %cst_93 : f32 to vector<4x128xf32>
    %150 = arith.maximumf %148, %149 : vector<4x128xf32>
    %151 = arith.truncf %150 : vector<4x128xf32> to vector<4x128xbf16>
    %c0_94 = arith.constant 0 : index
    %c0_95 = arith.constant 0 : index
    %c0_96 = arith.constant 0 : index
    %152 = vector.load %arg27[%c0_94, %c0_95, %c0_96] : memref<1x128x128xbf16, #tpu.memory_space<vmem>>, vector<1x128x128xbf16>
    %153 = vector.shape_cast %152 : vector<1x128x128xbf16> to vector<128x128xbf16>
    %cst_97 = arith.constant dense<0.000000e+00> : vector<4x128xf32>
    %154 = tpu.matmul %151, %153, %cst_97 {dimension_numbers = #tpu.dot_dimension_numbers<[1], [0], [0], [1], [0, 0, 1, 1], [], []>} : vector<4x128xbf16>, vector<128x128xbf16>, vector<4x128xf32> -> vector<4x128xf32>
    %c0_98 = arith.constant 0 : index
    %c0_99 = arith.constant 0 : index
    %c0_100 = arith.constant 0 : index
    %155 = vector.load %arg28[%c0_98, %c0_99, %c0_100] : memref<1x1x128xf32, #tpu.memory_space<vmem>>, vector<1x1x128xf32>
    %156 = vector.shape_cast %155 : vector<1x1x128xf32> to vector<1x128xf32>
    %157 = vector.broadcast %156 : vector<1x128xf32> to vector<4x128xf32>
    %158 = arith.addf %154, %157 : vector<4x128xf32>
    %159 = arith.addf %5, %158 : vector<4x128xf32>
    %c0_101 = arith.constant 0 : index
    %c0_102 = arith.constant 0 : index
    %160 = vector.load %arg34[%c0_101, %c0_102] : memref<4x128xf32, #tpu.memory_space<vmem>>, vector<4x128xf32>
    tpu.vector_store %arg34[%c0_101, %c0_102], %159 {strides = array<i32>} : memref<4x128xf32, #tpu.memory_space<vmem>>, vector<4x128xf32>,
    %c1_i32 = arith.constant 1 : i32
    %161 = arith.cmpi eq, %arg0, %c1_i32 : i32
    %162 = arith.extui %161 : i1 to i32
    %c0_i32_103 = arith.constant 0 : i32
    %163 = arith.cmpi ne, %162, %c0_i32_103 : i32
    scf.if %163 {
      %164 = arith.truncf %116 : vector<32x128xf32> to vector<32x128xbf16>
      %c0_104 = arith.constant 0 : index
      %c0_105 = arith.constant 0 : index
      %165 = vector.load %arg29[%c0_104, %c0_105] : memref<128x128xbf16, #tpu.memory_space<vmem>>, vector<128x128xbf16>
      %cst_106 = arith.constant dense<0.000000e+00> : vector<32x128xf32>
      %166 = tpu.matmul %164, %165, %cst_106 {dimension_numbers = #tpu.dot_dimension_numbers<[1], [0], [0], [1], [0, 0, 1, 1], [], []>} : vector<32x128xbf16>, vector<128x128xbf16>, vector<32x128xf32> -> vector<32x128xf32>
      %c0_107 = arith.constant 0 : index
      %c0_108 = arith.constant 0 : index
      %167 = vector.load %arg30[%c0_107, %c0_108] : memref<1x128xf32, #tpu.memory_space<vmem>>, vector<1x128xf32>
      %168 = vector.broadcast %167 : vector<1x128xf32> to vector<32x128xf32>
      %169 = arith.addf %166, %168 : vector<32x128xf32>
      %c0_109 = arith.constant 0 : index
      %c0_110 = arith.constant 0 : index
      %170 = vector.load %arg31[%c0_109, %c0_110] : memref<32x128xf32, #tpu.memory_space<vmem>>, vector<32x128xf32>
      tpu.vector_store %arg31[%c0_109, %c0_110], %169 {strides = array<i32>} : memref<32x128xf32, #tpu.memory_space<vmem>>, vector<32x128xf32>,
    } else {
    }
    return
  }
  func.func @transform_0(%arg0: i32) -> (i32, i32) {
    %c0_i32 = arith.constant 0 : i32
    %c0_i32_0 = arith.constant 0 : i32
    %c0_i32_1 = arith.constant 0 : i32
    return %c0_i32, %c0_i32_0 : i32, i32
  }
  func.func @transform_1(%arg0: i32) -> (i32, i32) {
    %c0_i32 = arith.constant 0 : i32
    %c0_i32_0 = arith.constant 0 : i32
    %c0_i32_1 = arith.constant 0 : i32
    return %c0_i32, %c0_i32_0 : i32, i32
  }
  func.func @transform_2(%arg0: i32) -> (i32, i32) {
    %c0_i32 = arith.constant 0 : i32
    %c0_i32_0 = arith.constant 0 : i32
    %c0_i32_1 = arith.constant 0 : i32
    return %c0_i32, %c0_i32_0 : i32, i32
  }
  func.func @transform_3(%arg0: i32) -> (i32, i32) {
    %c0_i32 = arith.constant 0 : i32
    %c0_i32_0 = arith.constant 0 : i32
    %c0_i32_1 = arith.constant 0 : i32
    return %c0_i32, %c0_i32_0 : i32, i32
  }
  func.func @transform_4(%arg0: i32) -> (i32, i32) {
    %c0_i32 = arith.constant 0 : i32
    %c0_i32_0 = arith.constant 0 : i32
    %c0_i32_1 = arith.constant 0 : i32
    return %c0_i32, %c0_i32_0 : i32, i32
  }
  func.func @transform_5(%arg0: i32) -> (i32, i32) {
    %c0_i32 = arith.constant 0 : i32
    %c0_i32_0 = arith.constant 0 : i32
    %c0_i32_1 = arith.constant 0 : i32
    return %c0_i32, %c0_i32_0 : i32, i32
  }
  func.func @transform_6(%arg0: i32) -> (i32, i32) {
    %c0_i32 = arith.constant 0 : i32
    %c0_i32_0 = arith.constant 0 : i32
    %c0_i32_1 = arith.constant 0 : i32
    return %c0_i32, %c0_i32_0 : i32, i32
  }
  func.func @transform_7(%arg0: i32) -> (i32, i32) {
    %c0_i32 = arith.constant 0 : i32
    %c0_i32_0 = arith.constant 0 : i32
    %c0_i32_1 = arith.constant 0 : i32
    return %c0_i32, %c0_i32_0 : i32, i32
  }
  func.func @transform_8(%arg0: i32) -> (i32, i32) {
    %c0_i32 = arith.constant 0 : i32
    %c0_i32_0 = arith.constant 0 : i32
    %c0_i32_1 = arith.constant 0 : i32
    return %c0_i32, %c0_i32_0 : i32, i32
  }
  func.func @transform_9(%arg0: i32) -> (i32, i32, i32) {
    %c0_i32 = arith.constant 0 : i32
    %c0_i32_0 = arith.constant 0 : i32
    %c0_i32_1 = arith.constant 0 : i32
    return %arg0, %c0_i32, %c0_i32_0 : i32, i32, i32
  }
  func.func @transform_10(%arg0: i32) -> (i32, i32, i32) {
    %c0_i32 = arith.constant 0 : i32
    %c0_i32_0 = arith.constant 0 : i32
    %c0_i32_1 = arith.constant 0 : i32
    return %arg0, %c0_i32, %c0_i32_0 : i32, i32, i32
  }
  func.func @transform_11(%arg0: i32) -> (i32, i32, i32) {
    %c0_i32 = arith.constant 0 : i32
    %c0_i32_0 = arith.constant 0 : i32
    %c0_i32_1 = arith.constant 0 : i32
    return %arg0, %c0_i32, %c0_i32_0 : i32, i32, i32
  }
  func.func @transform_12(%arg0: i32) -> (i32, i32, i32) {
    %c0_i32 = arith.constant 0 : i32
    %c0_i32_0 = arith.constant 0 : i32
    %c0_i32_1 = arith.constant 0 : i32
    return %arg0, %c0_i32, %c0_i32_0 : i32, i32, i32
  }
  func.func @transform_13(%arg0: i32) -> (i32, i32, i32) {
    %c0_i32 = arith.constant 0 : i32
    %c0_i32_0 = arith.constant 0 : i32
    %c0_i32_1 = arith.constant 0 : i32
    return %arg0, %c0_i32, %c0_i32_0 : i32, i32, i32
  }
  func.func @transform_14(%arg0: i32) -> (i32, i32, i32) {
    %c0_i32 = arith.constant 0 : i32
    %c0_i32_0 = arith.constant 0 : i32
    %c0_i32_1 = arith.constant 0 : i32
    return %arg0, %c0_i32, %c0_i32_0 : i32, i32, i32
  }
  func.func @transform_15(%arg0: i32) -> (i32, i32, i32) {
    %c0_i32 = arith.constant 0 : i32
    %c0_i32_0 = arith.constant 0 : i32
    %c0_i32_1 = arith.constant 0 : i32
    return %arg0, %c0_i32, %c0_i32_0 : i32, i32, i32
  }
  func.func @transform_16(%arg0: i32) -> (i32, i32, i32) {
    %c0_i32 = arith.constant 0 : i32
    %c0_i32_0 = arith.constant 0 : i32
    %c0_i32_1 = arith.constant 0 : i32
    return %arg0, %c0_i32, %c0_i32_0 : i32, i32, i32
  }
  func.func @transform_17(%arg0: i32) -> (i32, i32, i32) {
    %c0_i32 = arith.constant 0 : i32
    %c0_i32_0 = arith.constant 0 : i32
    %c0_i32_1 = arith.constant 0 : i32
    return %arg0, %c0_i32, %c0_i32_0 : i32, i32, i32
  }
  func.func @transform_18(%arg0: i32) -> (i32, i32, i32) {
    %c0_i32 = arith.constant 0 : i32
    %c0_i32_0 = arith.constant 0 : i32
    %c0_i32_1 = arith.constant 0 : i32
    return %arg0, %c0_i32, %c0_i32_0 : i32, i32, i32
  }
  func.func @transform_19(%arg0: i32) -> (i32, i32, i32) {
    %c0_i32 = arith.constant 0 : i32
    %c0_i32_0 = arith.constant 0 : i32
    %c0_i32_1 = arith.constant 0 : i32
    return %arg0, %c0_i32, %c0_i32_0 : i32, i32, i32
  }
  func.func @transform_20(%arg0: i32) -> (i32, i32, i32) {
    %c0_i32 = arith.constant 0 : i32
    %c0_i32_0 = arith.constant 0 : i32
    %c0_i32_1 = arith.constant 0 : i32
    return %arg0, %c0_i32, %c0_i32_0 : i32, i32, i32
  }
  func.func @transform_21(%arg0: i32) -> (i32, i32, i32) {
    %c0_i32 = arith.constant 0 : i32
    %c0_i32_0 = arith.constant 0 : i32
    %c0_i32_1 = arith.constant 0 : i32
    return %arg0, %c0_i32, %c0_i32_0 : i32, i32, i32
  }
  func.func @transform_22(%arg0: i32) -> (i32, i32, i32) {
    %c0_i32 = arith.constant 0 : i32
    %c0_i32_0 = arith.constant 0 : i32
    %c0_i32_1 = arith.constant 0 : i32
    return %arg0, %c0_i32, %c0_i32_0 : i32, i32, i32
  }
  func.func @transform_23(%arg0: i32) -> (i32, i32, i32) {
    %c0_i32 = arith.constant 0 : i32
    %c0_i32_0 = arith.constant 0 : i32
    %c0_i32_1 = arith.constant 0 : i32
    return %arg0, %c0_i32, %c0_i32_0 : i32, i32, i32
  }
  func.func @transform_24(%arg0: i32) -> (i32, i32, i32) {
    %c0_i32 = arith.constant 0 : i32
    %c0_i32_0 = arith.constant 0 : i32
    %c0_i32_1 = arith.constant 0 : i32
    return %arg0, %c0_i32, %c0_i32_0 : i32, i32, i32
  }
  func.func @transform_25(%arg0: i32) -> (i32, i32, i32) {
    %c0_i32 = arith.constant 0 : i32
    %c0_i32_0 = arith.constant 0 : i32
    %c0_i32_1 = arith.constant 0 : i32
    return %arg0, %c0_i32, %c0_i32_0 : i32, i32, i32
  }
  func.func @transform_26(%arg0: i32) -> (i32, i32, i32) {
    %c0_i32 = arith.constant 0 : i32
    %c0_i32_0 = arith.constant 0 : i32
    %c0_i32_1 = arith.constant 0 : i32
    return %arg0, %c0_i32, %c0_i32_0 : i32, i32, i32
  }
  func.func @transform_27(%arg0: i32) -> (i32, i32, i32) {
    %c0_i32 = arith.constant 0 : i32
    %c0_i32_0 = arith.constant 0 : i32
    %c0_i32_1 = arith.constant 0 : i32
    return %arg0, %c0_i32, %c0_i32_0 : i32, i32, i32
  }
  func.func @transform_28(%arg0: i32) -> (i32, i32) {
    %c0_i32 = arith.constant 0 : i32
    %c0_i32_0 = arith.constant 0 : i32
    %c0_i32_1 = arith.constant 0 : i32
    return %c0_i32, %c0_i32_0 : i32, i32
  }
  func.func @transform_29(%arg0: i32) -> (i32, i32) {
    %c0_i32 = arith.constant 0 : i32
    %c0_i32_0 = arith.constant 0 : i32
    %c0_i32_1 = arith.constant 0 : i32
    return %c0_i32, %c0_i32_0 : i32, i32
  }
  func.func @transform_30(%arg0: i32) -> (i32, i32) {
    %c0_i32 = arith.constant 0 : i32
    %c0_i32_0 = arith.constant 0 : i32
    %c0_i32_1 = arith.constant 0 : i32
    return %c0_i32, %c0_i32_0 : i32, i32
  }
}

</mosaic_0001>

<bundles_post_ra>
// kernel: graphnet_forward.1
= control target key start
LH: loop header
LB: loop body
LE: loop exit
PB: predicated region body
PF: predicated region fallthrough
CT: control target
= control target key end

     0   :  { %s5531_s6 = smov 1   ;;  %s5532_s10 = smov 2   ;;  %s6663_s0 = inlined_call_operand.smem [shape: u32[31], index: -1, kind: input, shape index: {}] }
   0x1   :  { %s5595_s5 = sld [smem:[%s6663_s0]]   ;;  %s5533_s14 = smov 3  }
   0x2   :  { %s5600_s9 = sld [smem:[%s6663_s0 + %s5531_s6]]   ;;  %s5534_s18 = smov 4  }
   0x3   :  { %s5605_s13 = sld [smem:[%s6663_s0 + %s5532_s10]]   ;;  %s5535_s22 = smov 5  }
   0x4   :  { %s5610_s17 = sld [smem:[%s6663_s0 + %s5533_s14]]   ;;  %s5536_s26 = smov 6  }
   0x5   :  { %s5615_s21 = sld [smem:[%s6663_s0 + %s5534_s18]]   ;;  %s5537_s30 = smov 7  }
   0x6   :  { %s5620_s25 = sld [smem:[%s6663_s0 + %s5535_s22]]   ;;  %s5538_s4 = smov 8  }
   0x7   :  { %6691 = sst [smem:[#allocation40_spill]] %s5595_s5  ;;  %s5539_s10 = smov 9  }
   0x8   :  { %6692 = sst [smem:[#allocation41_spill]] %s5600_s9  ;;  %s5540_s15 = smov 10  }
   0x9   :  { %6693 = sst [smem:[#allocation42_spill]] %s5605_s13  ;;  %s5541_s20 = smov 11  }
   0xa   :  { %6694 = sst [smem:[#allocation43_spill]] %s5610_s17  ;;  %s5543_s1 = smov 13  }
   0xb   :  { %6695 = sst [smem:[#allocation44_spill]] %s5615_s21  ;;  %s5544_s7 = smov 14  }
   0xc   :  { %6696 = sst [smem:[#allocation45_spill]] %s5620_s25  ;;  %s5546_s22 = smov 16  }
   0xd   :  { %s5625_s29 = sld [smem:[%s6663_s0 + %s5536_s26]]   ;;  %s5542_s26 = smov 12  }
   0xe   :  { %s5630_s3 = sld [smem:[%s6663_s0 + %s5537_s30]]   ;;  %s5547_s28 = smov 17  }
   0xf   :  { %s5635_s8 = sld [smem:[%s6663_s0 + %s5538_s4]]  }
  0x10   :  { %s5640_s14 = sld [smem:[%s6663_s0 + %s5539_s10]]  }
  0x11   :  { %s5645_s19 = sld [smem:[%s6663_s0 + %s5540_s15]]   ;;  %s5545_s15 = smov 15  }
  0x12   :  { %s5650_s24 = sld [smem:[%s6663_s0 + %s5541_s20]]  }
  0x13   :  { %6697 = sst [smem:[#allocation46_spill]] %s5625_s29 }
  0x14   :  { %6698 = sst [smem:[#allocation47_spill]] %s5630_s3 }
  0x15   :  { %6699 = sst [smem:[#allocation48_spill]] %s5635_s8 }
  0x16   :  { %6700 = sst [smem:[#allocation49_spill]] %s5640_s14 }
  0x17   :  { %6701 = sst [smem:[#allocation50_spill]] %s5645_s19 }
  0x18   :  { %6702 = sst [smem:[#allocation51_spill]] %s5650_s24 }
  0x19   :  { %s5655_s30 = sld [smem:[%s6663_s0 + %s5542_s26]]  }
  0x1a   :  { %s5660_s6 = sld [smem:[%s6663_s0 + %s5543_s1]]  }
  0x1b   :  { %s5665_s12 = sld [smem:[%s6663_s0 + %s5544_s7]]   ;;  %s5548_s7 = smov 18  }
  0x1c   :  { %s5670_s20 = sld [smem:[%s6663_s0 + %s5545_s15]]   ;;  %s5549_s15 = smov 19  }
  0x1d   :  { %s5675_s27 = sld [smem:[%s6663_s0 + %s5546_s22]]   ;;  %s5550_s22 = smov 20  }
  0x1e   :  { %s5680_s4 = sld [smem:[%s6663_s0 + %s5547_s28]]   ;;  %s5551_s28 = smov 21  }
  0x1f   :  { %6703 = sst [smem:[#allocation52_spill]] %s5655_s30 }
  0x20   :  { %6704 = sst [smem:[#allocation53_spill]] %s5660_s6 }
  0x21   :  { %s5685_s25 = sld [smem:[%s6663_s0 + %s5548_s7]]   ;;  %s5552_s7 = smov 22  }
  0x22   :  { %s5690_s13 = sld [smem:[%s6663_s0 + %s5549_s15]]   ;;  %s5553_s15 = smov 23  }
  0x23   :  { %s5695_s21 = sld [smem:[%s6663_s0 + %s5550_s22]]   ;;  %s5554_s22 = smov 24  }
  0x24   :  { %6705 = sst [smem:[#allocation54_spill]] %s5680_s4 }
  0x25   :  { %s5700_s9 = sld [smem:[%s6663_s0 + %s5551_s28]]   ;;  %s5555_s28 = smov 25  }
  0x26   :  { %s5705_s17 = sld [smem:[%s6663_s0 + %s5552_s7]]   ;;  %s5556_s7 = smov 26  }
  0x27   :  { %s5710_s5 = sld [smem:[%s6663_s0 + %s5553_s15]]   ;;  %s5557_s15 = smov 27  }
  0x28   :  { %6706 = sst [smem:[#allocation55_spill]] %s5690_s13 }
  0x29   :  { %s5715_s8 = sld [smem:[%s6663_s0 + %s5554_s22]]   ;;  %s5558_s22 = smov 28  }
  0x2a   :  { %s5720_s29 = sld [smem:[%s6663_s0 + %s5555_s28]]   ;;  %s5559_s28 = smov 29  }
  0x2b   :  { %6707 = sst [smem:[#allocation56_spill]] %s5700_s9 }
  0x2c   :  { %6708 = sst [smem:[#allocation57_spill]] %s5705_s17 }
  0x2d   :  { %6709 = sst [smem:[#allocation58_spill]] %s5710_s5 }
  0x2e   :  { %s5725_s9 = sld [smem:[%s6663_s0 + %s5556_s7]]   ;;  %s5560_s7 = smov 30  }
  0x2f   :  { %6710 = sst [smem:[#allocation59_spill]] %s5715_s8 }
  0x30   :  { %s5730_s30 = sld [smem:[%s6663_s0 + %s5557_s15]]  }
  0x31   :  { %s5735_s19 = sld [smem:[%s6663_s0 + %s5558_s22]]  }
  0x32   :  { %s5740_s14 = sld [smem:[%s6663_s0 + %s5559_s28]]  }
  0x33   :  { %s5745_s24 = sld [smem:[%s6663_s0 + %s5560_s7]]  }
  0x34   :  { %6711 = sst [smem:[#allocation60_spill]] %s5725_s9 }
  0x38   :  { %6712 = sst [smem:[#allocation61_spill]] %s5740_s14 }
  0x39   :  { %6713 = sst [smem:[#allocation62_spill]] %s5745_s24 }
  0x3a   :  { %66 = vsyncpa [#allocation6], 0 }
  0x3b   :  { %67 = vsyncpa [#allocation8], 0 }
  0x3c   :  { %69 = vsyncpa [#allocation8 + $0x1], 0 }
  0x3d   :  { %70 = vsyncpa [#allocation11], 0 }
  0x3e   :  { %72 = vsyncpa [#allocation11 + $0x1], 0 }
  0x3f   :  { %73 = vsyncpa [#allocation14], 0 }
  0x40   :  { %75 = vsyncpa [#allocation14 + $0x1], 0 }
  0x41   :  { %76 = vsyncpa [#allocation17], 0 }
  0x42   :  { %78 = vsyncpa [#allocation17 + $0x1], 0 }
  0x43   :  { %79 = vsyncpa [#allocation20], 0 }
  0x44   :  { %81 = vsyncpa [#allocation20 + $0x1], 0 }
  0x45   :  { %82 = vsyncpa [#allocation23], 0 }
  0x46   :  { %84 = vsyncpa [#allocation23 + $0x1], 0 }
  0x47   :  { %85 = vsyncpa [#allocation26], 0 }
  0x48   :  { %87 = vsyncpa [#allocation26 + $0x1], 0 }
  0x49   :  { %88 = vsyncpa [#allocation29], 0  ;;  %s5747_s15 = smov 0   ;;  %s5749_s0 = smov 0  }
  0x4a   :  { %s5751_s16 = smov 0   ;;  %s5753_s18 = smov 0  }
  0x4b LB: > { %s6714_s9 = sld [smem:[#allocation60_spill]]  ;;  %s5766_s22 = sadd.s32 4294967295, %s5529_s18   ;;  %s5525_s16 = sphi %s5751_s16, %s6777_s16   ;;  %s5521_s0 = sphi %s5749_s0, %s6776_s0   ;;  %s5517_s15 = sphi %s5747_s15, %s6774_s15   ;;  %s5529_s18 = sphi %s5753_s18, %s6773_s18  }
  0x4c   : > { %s6715_s5 = sld [smem:[#allocation58_spill]]  ;;  %s5769_s23 = sadd.s32 1, %s5529_s18  }
  0x4d   : > { %s6716_s8 = sld [smem:[#allocation59_spill]]  ;;  %s391_s26 = ssub.s32 %s5529_s18, %s5769_s23 }
  0x4e   : > { %s6717_s17 = sld [smem:[#allocation57_spill]]  ;;  %s394_s28 = sadd.s32 1, %s5525_s16 }
  0x4f   : > { %s6718_s13 = sld [smem:[#allocation55_spill]]  ;;  %p392_p0 = scmp.eq.s32.totalorder %s391_s26, 0 }
  0x50   : > { %s6719_s4 = sld [smem:[#allocation54_spill]]  ;;  %p401_p1 = scmp.ne.s32.totalorder %s5525_s16, %s5521_s0 }
  0x51   : > { %s6720_s6 = sld [smem:[#allocation53_spill]]  ;;  %p402_p2 = scmp.eq.s32.totalorder %s5529_s18, 0 }
  0x52   : > { %6721 = sst [smem:[#allocation63_spill]] %s5521_s0  ;;  %p407_p3 = scmp.ne.s32.totalorder %s5521_s0, %s5517_s15 }
  0x53   : > { %6722 = sst [smem:[#allocation64_spill]] %s5769_s23  ;;  %p5781_p4 = por %p402_p2, %p401_p1 }
  0x54   : > { %s5779_s1 = scalar_select %p392_p0, %s5525_s16, %s394_s28  }
  0x55   : > { %s6724_s2 = scalar_select %p5781_p4, 1, 0 }
  0x56   : > { %6723 = sst [smem:[#allocation65_spill]] %s5779_s1  ;;  %p6672_p5 = scmp.eq.s32.totalorder %s5766_s22, 0 }
  0x57   : > { %p4128_p6 = scmp.ge.s32.totalorder %s5529_s18, 1  ;;  %p845_p7 = scmp.lt.s32.totalorder %s5529_s18, 3 }
  0x58   : > { %p5790_p8 = por %p6672_p5, %p407_p3  ;;  %s5561_s11 = smov [#allocation28]  }
  0x59   : > { %p5795_p10 = pnand %p4128_p6, %p845_p7  ;;  %s894_s15 = sshll.u32 %s5561_s11, 4  ;;  %s895_s15 = int_to_ptr.vmem [resolvable:$true] %s894_s15 }
  0x5a   : > { %s6725_s7 = scalar_select %p5790_p8, 1, 0 }
  0x5b   : > { %s6727_s10 = scalar_select %p5795_p10, 1, 0 }
  0x5c   : > { %6726 = sst [smem:[#allocation66_spill]] %s6725_s7  ;;  %p4836_p11 = pneg %p5795_p10 }
  0x5d   : > { %s5562_s28 = smov [#allocation5]   ;;  %s5032_s23 = scalar_lea.vmem %s895_s15, 1024 }
  0x5e   : > { %p5803_p12 = pnand %p4836_p11, %p6672_p5  ;;  %s878_s1 = sshll.u32 %s5562_s28, 4  ;;  %s879_s1 = int_to_ptr.vmem [resolvable:$true] %s878_s1 }
  0x5f   : > { %p5033_p0 = scmp.ne.s32.totalorder %s895_s15, %s5032_s23  ;;  %p5040_p3 = scmp.lt.s32.totalorder %s895_s15, %s895_s15 }
  0x60   : > { %p5023_p13 = pneg %p5803_p12  ;;  %p5041_p6 = scmp.lt.s32.totalorder %s5032_s23, %s5032_s23 }
  0x62   : > { %p5035_p1 = pnand %p5033_p0, %p5023_p13  ;;  %p5042_p7 = por %p5041_p6, %p5040_p3 }
  0x64   : > { %p5036_p2 = pneg %p5035_p1 }
  0x66   : > { %p5043_p11 = pnand %p5042_p7, %p5036_p2 }
  0x68   : > { %5046 = shalt.err (!%p5043_p11)
}
  0x69   : > { %s5563_s11 = smov 64   ;;  %s5564_s24 = smov 4  }
  0x6a   : > { %4842 = dma.hbm_to_vmem [thread:$0]  (!%p5803_p12), %s5735_s19, 1024, %s895_s15, [#allocation29], %s5563_s11, %s5563_s11, %s5564_s24  }
  0x6b   : > { %s5058_s28 = scalar_lea.vmem %s879_s1, 1024  ;;  %p5066_p0 = scmp.lt.s32.totalorder %s879_s1, %s879_s1 }
  0x6c   : > { %p5059_p9 = scmp.ne.s32.totalorder %s879_s1, %s5058_s28  ;;  %p5067_p1 = scmp.lt.s32.totalorder %s5058_s28, %s5058_s28 }
  0x6e   : > { %p5061_p5 = pnand %p5059_p9, %p5023_p13  ;;  %p5068_p10 = por %p5067_p1, %p5066_p0 }
  0x70   : > { %p5062_p8 = pneg %p5061_p5 }
  0x72   : > { %p5069_p4 = pnand %p5068_p10, %p5062_p8 }
  0x74   : > { %5072 = shalt.err (!%p5069_p4)
}
  0x75   : > { %s5565_s23 = smov 128   ;;  %s6729_s3 = sld [smem:[#allocation47_spill]] }
  0x76   : > { %s5566_s7 = smov 8   ;;  %s5567_s0 = smov [#allocation30]  }
  0x77   : > { %s908_s24 = sshll.u32 %s5567_s0, 4  ;;  %s909_s24 = int_to_ptr.vmem [resolvable:$true] %s908_s24 }
  0x78   : > { %s5084_s15 = scalar_lea.vmem %s909_s24, 16  ;;  %s5091_s11 = scalar_lea.vmem %s909_s24, 32 }
  0x79   : > { %p5085_p2 = scmp.ne.s32.totalorder %s909_s24, %s5084_s15  ;;  %p5092_p3 = scmp.lt.s32.totalorder %s909_s24, %s909_s24 }
  0x7a   : > { %p5093_p8 = scmp.lt.s32.totalorder %s5091_s11, %s5084_s15 }
  0x7b   : > { %4839 = dma.hbm_to_vmem [thread:$0]  (!%p5803_p12), %s6729_s3, 1024, %s879_s1, [#allocation6], %s5565_s23, %s5565_s23, %s5566_s7  }
  0x7c   : > { %p5087_p5 = pnand %p5085_p2, %p5023_p13  ;;  %p5094_p4 = por %p5093_p8, %p5092_p3 }
  0x7e   : > { %p5088_p9 = pneg %p5087_p5 }
  0x80   : > { %p5095_p10 = pnand %p5094_p4, %p5088_p9 }
  0x82   : > { %5098 = shalt.err (!%p5095_p10)
}
  0x83   : > { %s6730_s14 = sld [smem:[#allocation61_spill]]  ;;  %p4132_p6 = scmp.ge.s32.totalorder %s5529_s18, 2 }
  0x84   : > { %s5829_s0 = sand.u32 (!%p4132_p6), 1, %s5529_s18   ;;  %s5832_s1 = sand.u32 (!%p4132_p6), 1, %s5525_s16  }
  0x85   : > { %915 = sbr.rel (%p4132_p6) target bundleno = 456 (0x1c8), region = 60  ;;  %s5835_s7 = sshll.u32 (!%p4132_p6), %s5529_s18, 4 }
  0x86   : > { %s952_s26 = scalar_lea.vmem (!%p4132_p6), [#allocation7], %s5832_s1  ;;  %s957_s23 = scalar_lea.hbm (!%p4132_p6), %s6720_s6, %s5835_s7 }
  0x87   : > { %s959_s28 = sshll.u32 (!%p4132_p6), %s952_s26, 4  ;;  %s5099_s15 = scalar_lea.hbm (!%p4132_p6), %s957_s23, 16  ;;  %s960_s28 = int_to_ptr.vmem [resolvable:$true] %s959_s28 }
  0x88   : > { %p6731_p13 = scmp.ne.s32.totalorder (!%p4132_p6), %s6724_s2, 0  ;;  %s5103_s11 = scalar_lea.hbm (!%p4132_p6), %s6720_s6, 32 }
  0x89   : > { %4845 = dma.hbm_to_vmem [thread:$0]  (!%p5803_p12), %s6730_s14, 16, %s909_s24, [#allocation29]  }
  0x8a   : > { %p5100_p12 = scmp.ne.s32.totalorder %s957_s23, %s5099_s15  ;;  %p5104_p0 = scmp.lt.s32.totalorder %s957_s23, %s6720_s6 }
  0x8b   : > { %p5105_p1 = scmp.lt.s32.totalorder %s5103_s11, %s5099_s15 }
  0x8c   : > { %p5101_p7 = pnand %p5100_p12, %p6731_p13 }
  0x8d   : > { %p5106_p2 = por %p5105_p1, %p5104_p0 }
  0x8e   : > { %p5102_p11 = pneg %p5101_p7 }
  0x90   : > { %p5107_p5 = pnand %p5106_p2, %p5102_p11 }
  0x92   : > { %5110 = shalt.err (!%p5107_p5)
}
  0x93   : > { %s5111_s3 = scalar_lea.vmem %s960_s28, 16  ;;  %s5568_s26 = smov [#allocation7]  }
  0x94   : > { %p5112_p9 = scmp.ne.s32.totalorder %s960_s28, %s5111_s3  ;;  %s5115_s14 = sshll.u32 %s5568_s26, 4  ;;  %s5116_s14 = int_to_ptr.vmem [resolvable:$false] %s5115_s14 }
  0x95   : > { %s5117_s24 = scalar_lea.vmem %s5116_s14, 32  ;;  %p5118_p4 = scmp.lt.s32.totalorder %s960_s28, %s5116_s14 }
  0x96   : > { %p5113_p3 = pnand %p5112_p9, %p6731_p13  ;;  %p5119_p10 = scmp.lt.s32.totalorder %s5117_s24, %s5111_s3 }
  0x98   : > { %p5114_p8 = pneg %p5113_p3  ;;  %p5120_p6 = por %p5119_p10, %p5118_p4 }
  0x9a   : > { %p5121_p12 = pnand %p5120_p6, %p5114_p8 }
  0x9c   : > { %5124 = shalt.err (!%p5121_p12)
}
  0x9d   : > { %s6732_s15 = scalar_lea.sflag [#allocation8], %s5829_s0  ;;  %s5853_s11 = scalar_lea.hbm %s5670_s20, %s5835_s7 }
  0x9e   : > { %4802 = dma.hbm_to_vmem [thread:$0]  (%p6731_p13), %s957_s23, 16, %s960_s28, %s6732_s15  }
  0x9f   : > { %s990_s3 = scalar_lea.vmem [#allocation10], %s5832_s1  ;;  %s6680_s24 = scalar_lea.sflag [#allocation11], %s5829_s0 }
  0xa0   : > { %s997_s14 = sshll.u32 %s990_s3, 4  ;;  %s5125_s26 = scalar_lea.hbm %s5853_s11, 16  ;;  %s998_s14 = int_to_ptr.vmem [resolvable:$true] %s997_s14 }
  0xa1   : > { %p5126_p7 = scmp.ne.s32.totalorder %s5853_s11, %s5125_s26  ;;  %s5129_s6 = scalar_lea.hbm %s5670_s20, 32 }
  0xa2   : > { %p5130_p1 = scmp.lt.s32.totalorder %s5853_s11, %s5670_s20  ;;  %p5131_p2 = scmp.lt.s32.totalorder %s5129_s6, %s5125_s26 }
  0xa3   : > { %p5127_p11 = pnand %p5126_p7, %p6731_p13 }
  0xa4   : > { %p5132_p5 = por %p5131_p2, %p5130_p1 }
  0xa5   : > { %p5128_p0 = pneg %p5127_p11 }
  0xa7   : > { %p5133_p9 = pnand %p5132_p5, %p5128_p0 }
  0xa9   : > { %5136 = shalt.err (!%p5133_p9)
}
  0xaa   : > { %s5137_s28 = scalar_lea.vmem %s998_s14, 16  ;;  %s5569_s23 = smov [#allocation10]  }
  0xab   : > { %p5138_p3 = scmp.ne.s32.totalorder %s998_s14, %s5137_s28  ;;  %s5141_s15 = sshll.u32 %s5569_s23, 4  ;;  %s5142_s15 = int_to_ptr.vmem [resolvable:$false] %s5141_s15 }
  0xac   : > { %s5143_s3 = scalar_lea.vmem %s5142_s15, 32  ;;  %p5144_p10 = scmp.lt.s32.totalorder %s998_s14, %s5142_s15 }
  0xad   : > { %p5139_p8 = pnand %p5138_p3, %p6731_p13  ;;  %p5145_p6 = scmp.lt.s32.totalorder %s5143_s3, %s5137_s28 }
  0xaf   : > { %p5140_p4 = pneg %p5139_p8  ;;  %p5146_p12 = por %p5145_p6, %p5144_p10 }
  0xb1   : > { %p5147_p7 = pnand %p5146_p12, %p5140_p4 }
  0xb3   : > { %5150 = shalt.err (!%p5147_p7)
}
  0xb4   : > { %4804 = dma.hbm_to_vmem [thread:$0]  (%p6731_p13), %s5853_s11, 16, %s998_s14, %s6680_s24  }
  0xb5   : > { %s5873_s6 = scalar_lea.hbm %s6719_s4, %s5835_s7  ;;  %s1028_s26 = scalar_lea.vmem [#allocation13], %s5832_s1 }
  0xb6   : > { %s1035_s28 = sshll.u32 %s1028_s26, 4  ;;  %s6682_s23 = scalar_lea.sflag [#allocation14], %s5829_s0  ;;  %s1036_s28 = int_to_ptr.vmem [resolvable:$true] %s1035_s28 }
  0xb7   : > { %s5151_s15 = scalar_lea.hbm %s5873_s6, 16  ;;  %s5155_s3 = scalar_lea.hbm %s6719_s4, 32 }
  0xb8   : > { %p5152_p11 = scmp.ne.s32.totalorder %s5873_s6, %s5151_s15  ;;  %p5156_p2 = scmp.lt.s32.totalorder %s5873_s6, %s6719_s4 }
  0xb9   : > { %p5157_p5 = scmp.lt.s32.totalorder %s5155_s3, %s5151_s15 }
  0xba   : > { %p5153_p0 = pnand %p5152_p11, %p6731_p13 }
  0xbb   : > { %p5158_p9 = por %p5157_p5, %p5156_p2 }
  0xbc   : > { %p5154_p1 = pneg %p5153_p0 }
  0xbe   : > { %p5159_p3 = pnand %p5158_p9, %p5154_p1 }
  0xc0   : > { %5162 = shalt.err (!%p5159_p3)
}
  0xc1   : > { %s5163_s11 = scalar_lea.vmem %s1036_s28, 16  ;;  %s5570_s14 = smov [#allocation13]  }
  0xc2   : > { %p5164_p8 = scmp.ne.s32.totalorder %s1036_s28, %s5163_s11  ;;  %s5167_s26 = sshll.u32 %s5570_s14, 4  ;;  %s5168_s26 = int_to_ptr.vmem [resolvable:$false] %s5167_s26 }
  0xc3   : > { %s5169_s24 = scalar_lea.vmem %s5168_s26, 32  ;;  %p5170_p6 = scmp.lt.s32.totalorder %s1036_s28, %s5168_s26 }
  0xc4   : > { %p5165_p4 = pnand %p5164_p8, %p6731_p13  ;;  %p5171_p12 = scmp.lt.s32.totalorder %s5169_s24, %s5163_s11 }
  0xc6   : > { %p5166_p10 = pneg %p5165_p4  ;;  %p5172_p7 = por %p5171_p12, %p5170_p6 }
  0xc8   : > { %p5173_p11 = pnand %p5172_p7, %p5166_p10 }
  0xca   : > { %5176 = shalt.err (!%p5173_p11)
}
  0xcb   : > { %4806 = dma.hbm_to_vmem [thread:$0]  (%p6731_p13), %s5873_s6, 16, %s1036_s28, %s6682_s23  }
  0xcc   : > { %s5893_s15 = scalar_lea.hbm %s6718_s13, %s5835_s7  ;;  %s1066_s24 = scalar_lea.vmem [#allocation16], %s5832_s1 }
  0xcd   : > { %s1073_s3 = sshll.u32 %s1066_s24, 4  ;;  %s5897_s11 = sshll.u32 %s5832_s1, 6  ;;  %s1074_s3 = int_to_ptr.vmem [resolvable:$true] %s1073_s3 }
  0xce   : > { %s6684_s14 = scalar_lea.sflag [#allocation17], %s5829_s0  ;;  %s5177_s26 = scalar_lea.hbm %s5893_s15, 16 }
  0xcf   : > { %p5178_p0 = scmp.ne.s32.totalorder %s5893_s15, %s5177_s26  ;;  %s5181_s4 = scalar_lea.hbm %s6718_s13, 32 }
  0xd0   : > { %p5182_p5 = scmp.lt.s32.totalorder %s5893_s15, %s6718_s13  ;;  %p5183_p9 = scmp.lt.s32.totalorder %s5181_s4, %s5177_s26 }
  0xd1   : > { %p5179_p1 = pnand %p5178_p0, %p6731_p13 }
  0xd2   : > { %p5184_p3 = por %p5183_p9, %p5182_p5 }
  0xd3   : > { %p5180_p2 = pneg %p5179_p1 }
  0xd5   : > { %p5185_p8 = pnand %p5184_p3, %p5180_p2 }
  0xd7   : > { %5188 = shalt.err (!%p5185_p8)
}
  0xd8   : > { %s5189_s6 = scalar_lea.vmem %s1074_s3, 16  ;;  %s5571_s28 = smov [#allocation16]  }
  0xd9   : > { %p5190_p4 = scmp.ne.s32.totalorder %s1074_s3, %s5189_s6  ;;  %s5193_s24 = sshll.u32 %s5571_s28, 4  ;;  %s5194_s24 = int_to_ptr.vmem [resolvable:$false] %s5193_s24 }
  0xda   : > { %s5195_s23 = scalar_lea.vmem %s5194_s24, 32  ;;  %p5196_p12 = scmp.lt.s32.totalorder %s1074_s3, %s5194_s24 }
  0xdb   : > { %p5191_p10 = pnand %p5190_p4, %p6731_p13  ;;  %p5197_p7 = scmp.lt.s32.totalorder %s5195_s23, %s5189_s6 }
  0xdd   : > { %p5192_p6 = pneg %p5191_p10  ;;  %p5198_p11 = por %p5197_p7, %p5196_p12 }
  0xdf   : > { %p5199_p0 = pnand %p5198_p11, %p5192_p6 }
  0xe1   : > { %5202 = shalt.err (!%p5199_p0)
}
  0xe2   : > { %4808 = dma.hbm_to_vmem [thread:$0]  (%p6731_p13), %s5893_s15, 16, %s1074_s3, %s6684_s14  }
  0xe3   : > { %s5915_s4 = sshll.u32 %s5529_s18, 10  ;;  %s1111_s26 = scalar_lea.vmem [#allocation19], %s5897_s11 }
  0xe4   : > { %s5919_s23 = scalar_lea.hbm %s6717_s17, %s5915_s4  ;;  %s1118_s6 = sshll.u32 %s1111_s26, 4  ;;  %s5922_s6 = int_to_ptr.vmem [resolvable:$true] %s1118_s6 }
  0xe5   : > { %s6686_s28 = scalar_lea.sflag [#allocation20], %s5829_s0  ;;  %s5203_s24 = scalar_lea.hbm %s5919_s23, 1024 }
  0xe6   : > { %p5204_p1 = scmp.ne.s32.totalorder %s5919_s23, %s5203_s24  ;;  %s5207_s13 = scalar_lea.hbm %s6717_s17, 2048 }
  0xe7   : > { %p5208_p9 = scmp.lt.s32.totalorder %s5919_s23, %s6717_s17  ;;  %p5209_p3 = scmp.lt.s32.totalorder %s5207_s13, %s5203_s24 }
  0xe8   : > { %p5205_p2 = pnand %p5204_p1, %p6731_p13 }
  0xe9   : > { %p5210_p8 = por %p5209_p3, %p5208_p9 }
  0xea   : > { %p5206_p5 = pneg %p5205_p2 }
  0xec   : > { %p5211_p4 = pnand %p5210_p8, %p5206_p5 }
  0xee   : > { %5214 = shalt.err (!%p5211_p4)
}
  0xef   : > { %s5215_s18 = scalar_lea.vmem %s5922_s6, 1024  ;;  %s5572_s15 = smov [#allocation19]  }
  0xf0   : > { %p5216_p10 = scmp.ne.s32.totalorder %s5922_s6, %s5215_s18  ;;  %s5219_s3 = sshll.u32 %s5572_s15, 4  ;;  %s5220_s3 = int_to_ptr.vmem [resolvable:$false] %s5219_s3 }
  0xf1   : > { %s5221_s26 = scalar_lea.vmem %s5220_s3, 2048  ;;  %p5222_p7 = scmp.lt.s32.totalorder %s5922_s6, %s5220_s3 }
  0xf2   : > { %p5217_p6 = pnand %p5216_p10, %p6731_p13  ;;  %p5223_p11 = scmp.lt.s32.totalorder %s5221_s26, %s5215_s18 }
  0xf4   : > { %p5218_p12 = pneg %p5217_p6  ;;  %p5224_p0 = por %p5223_p11, %p5222_p7 }
  0xf6   : > { %p5225_p1 = pnand %p5224_p0, %p5218_p12 }
  0xf8   : > { %5228 = shalt.err (!%p5225_p1)
}
  0xf9   : > { %s5573_s13 = smov 64   ;;  %s5574_s24 = smov 4  }
  0xfa   : > { %4810 = dma.hbm_to_vmem [thread:$0]  (%p6731_p13), %s5919_s23, 1024, %s5922_s6, %s6686_s28, %s5573_s13, %s5573_s13, %s5574_s24  }
  0xfb   : > { %s5948_s18 = scalar_lea.hbm %s6716_s8, %s5915_s4  ;;  %s1149_s15 = scalar_lea.vmem [#allocation22], %s5897_s11 }
  0xfc   : > { %s1156_s3 = sshll.u32 %s1149_s15, 4  ;;  %s6688_s26 = scalar_lea.sflag [#allocation23], %s5829_s0  ;;  %s5951_s3 = int_to_ptr.vmem [resolvable:$true] %s1156_s3 }
  0xfd   : > { %s5229_s14 = scalar_lea.hbm %s5948_s18, 1024  ;;  %s5233_s17 = scalar_lea.hbm %s6716_s8, 2048 }
  0xfe   : > { %p5230_p2 = scmp.ne.s32.totalorder %s5948_s18, %s5229_s14  ;;  %p5234_p3 = scmp.lt.s32.totalorder %s5948_s18, %s6716_s8 }
  0xff   : > { %p5235_p8 = scmp.lt.s32.totalorder %s5233_s17, %s5229_s14 }
 0x100   : > { %p5231_p5 = pnand %p5230_p2, %p6731_p13 }
 0x101   : > { %p5236_p4 = por %p5235_p8, %p5234_p3 }
 0x102   : > { %p5232_p9 = pneg %p5231_p5 }
 0x104   : > { %p5237_p10 = pnand %p5236_p4, %p5232_p9 }
 0x106   : > { %5240 = shalt.err (!%p5237_p10)
}
 0x107   : > { %s5241_s23 = scalar_lea.vmem %s5951_s3, 1024  ;;  %s5575_s6 = smov [#allocation22]  }
 0x108   : > { %p5242_p6 = scmp.ne.s32.totalorder %s5951_s3, %s5241_s23  ;;  %s5245_s15 = sshll.u32 %s5575_s6, 4  ;;  %s5246_s15 = int_to_ptr.vmem [resolvable:$false] %s5245_s15 }
 0x109   : > { %s5247_s28 = scalar_lea.vmem %s5246_s15, 2048  ;;  %p5248_p11 = scmp.lt.s32.totalorder %s5951_s3, %s5246_s15 }
 0x10a   : > { %p5243_p12 = pnand %p5242_p6, %p6731_p13  ;;  %p5249_p0 = scmp.lt.s32.totalorder %s5247_s28, %s5241_s23 }
 0x10c   : > { %p5244_p7 = pneg %p5243_p12  ;;  %p5250_p1 = por %p5249_p0, %p5248_p11 }
 0x10e   : > { %p5251_p2 = pnand %p5250_p1, %p5244_p7 }
 0x110   : > { %5254 = shalt.err (!%p5251_p2)
}
 0x111   : > { %4812 = dma.hbm_to_vmem [thread:$0]  (%p6731_p13), %s5948_s18, 1024, %s5951_s3, %s6688_s26, %s5573_s13, %s5573_s13, %s5574_s24  }
 0x112   : > { %s5977_s17 = scalar_lea.hbm %s6714_s9, %s5915_s4  ;;  %s1187_s14 = scalar_lea.vmem [#allocation25], %s5897_s11 }
 0x113   : > { %s1194_s28 = sshll.u32 %s1187_s14, 4  ;;  %s5984_s23 = scalar_lea.hbm %s5665_s12, %s5915_s4  ;;  %s5980_s28 = int_to_ptr.vmem [resolvable:$true] %s1194_s28 }
 0x114   : > { %s1184_s6 = scalar_lea.sflag [#allocation26], %s5829_s0  ;;  %s5255_s15 = scalar_lea.hbm %s5977_s17, 1024 }
 0x115   : > { %p5256_p5 = scmp.ne.s32.totalorder %s5977_s17, %s5255_s15  ;;  %s5259_s8 = scalar_lea.hbm %s6714_s9, 2048 }
 0x116   : > { %p5260_p8 = scmp.lt.s32.totalorder %s5977_s17, %s6714_s9  ;;  %p5261_p4 = scmp.lt.s32.totalorder %s5259_s8, %s5255_s15 }
 0x117   : > { %p5257_p9 = pnand %p5256_p5, %p6731_p13 }
 0x118   : > { %p5262_p10 = por %p5261_p4, %p5260_p8 }
 0x119   : > { %p5258_p3 = pneg %p5257_p9 }
 0x11b   : > { %p5263_p6 = pnand %p5262_p10, %p5258_p3 }
 0x11d   : > { %5266 = shalt.err (!%p5263_p6)
}
 0x11e   : > { %s5267_s18 = scalar_lea.vmem %s5980_s28, 1024  ;;  %s5576_s3 = smov [#allocation25]  }
 0x11f   : > { %p5268_p12 = scmp.ne.s32.totalorder %s5980_s28, %s5267_s18  ;;  %s5271_s14 = sshll.u32 %s5576_s3, 4  ;;  %s5272_s14 = int_to_ptr.vmem [resolvable:$false] %s5271_s14 }
 0x120   : > { %s5273_s26 = scalar_lea.vmem %s5272_s14, 2048  ;;  %p5274_p0 = scmp.lt.s32.totalorder %s5980_s28, %s5272_s14 }
 0x121   : > { %p5269_p7 = pnand %p5268_p12, %p6731_p13  ;;  %p5275_p1 = scmp.lt.s32.totalorder %s5273_s26, %s5267_s18 }
 0x123   : > { %p5270_p11 = pneg %p5269_p7  ;;  %p5276_p2 = por %p5275_p1, %p5274_p0 }
 0x125   : > { %p5277_p5 = pnand %p5276_p2, %p5270_p11 }
 0x127   : > { %5280 = shalt.err (!%p5277_p5)
}
 0x128   : > { %4814 = dma.hbm_to_vmem [thread:$0]  (%p6731_p13), %s5977_s17, 1024, %s5980_s28, %s1184_s6, %s5573_s13, %s5573_s13, %s5574_s24  }
 0x129   : > { %s970_s8 = scalar_lea.vmem [#allocation9], %s5897_s11  ;;  %s6013_s15 = scalar_lea.hbm %s5675_s27, %s5915_s4 }
 0x12a   : > { %s977_s26 = sshll.u32 %s970_s8, 4  ;;  %s5281_s18 = scalar_lea.hbm %s5984_s23, 1024  ;;  %s6009_s26 = int_to_ptr.vmem [resolvable:$true] %s977_s26 }
 0x12b   : > { %p5282_p9 = scmp.ne.s32.totalorder %s5984_s23, %s5281_s18  ;;  %s5285_s3 = scalar_lea.hbm %s5665_s12, 2048 }
 0x12c   : > { %p5286_p4 = scmp.lt.s32.totalorder %s5984_s23, %s5665_s12  ;;  %p5287_p10 = scmp.lt.s32.totalorder %s5285_s3, %s5281_s18 }
 0x12d   : > { %p5283_p3 = pnand %p5282_p9, %p6731_p13 }
 0x12e   : > { %p5288_p6 = por %p5287_p10, %p5286_p4 }
 0x12f   : > { %p5284_p8 = pneg %p5283_p3 }
 0x131   : > { %p5289_p12 = pnand %p5288_p6, %p5284_p8 }
 0x133   : > { %5292 = shalt.err (!%p5289_p12)
}
 0x134   : > { %s5293_s17 = scalar_lea.vmem %s6009_s26, 1024  ;;  %s5577_s28 = smov [#allocation9]  }
 0x135   : > { %p5294_p7 = scmp.ne.s32.totalorder %s6009_s26, %s5293_s17  ;;  %s5297_s14 = sshll.u32 %s5577_s28, 4  ;;  %s5298_s14 = int_to_ptr.vmem [resolvable:$false] %s5297_s14 }
 0x136   : > { %s5299_s8 = scalar_lea.vmem %s5298_s14, 2048  ;;  %p5300_p1 = scmp.lt.s32.totalorder %s6009_s26, %s5298_s14 }
 0x137   : > { %p5295_p11 = pnand %p5294_p7, %p6731_p13  ;;  %p5301_p2 = scmp.lt.s32.totalorder %s5299_s8, %s5293_s17 }
 0x139   : > { %p5296_p0 = pneg %p5295_p11  ;;  %p5302_p5 = por %p5301_p2, %p5300_p1 }
 0x13b   : > { %p5303_p9 = pnand %p5302_p5, %p5296_p0 }
 0x13d   : > { %5306 = shalt.err (!%p5303_p9)
}
 0x13e   : > { %s6733_s18 = scalar_lea.sflag [#allocation8], %s5829_s0  ;;  %s1008_s3 = scalar_lea.vmem [#allocation12], %s5897_s11 }
 0x13f   : > { %4803 = dma.hbm_to_vmem [thread:$0]  (%p6731_p13), %s5984_s23, 1024, %s6009_s26, %s6733_s18, %s5573_s13, %s5573_s13, %s5574_s24  }
 0x140   : > { %s1015_s17 = sshll.u32 %s1008_s3, 4  ;;  %s6041_s28 = scalar_lea.hbm %s5685_s25, %s5915_s4  ;;  %s6037_s17 = int_to_ptr.vmem [resolvable:$true] %s1015_s17 }
 0x141   : > { %s5307_s14 = scalar_lea.hbm %s6013_s15, 1024  ;;  %s5311_s8 = scalar_lea.hbm %s5675_s27, 2048 }
 0x142   : > { %p5308_p3 = scmp.ne.s32.totalorder %s6013_s15, %s5307_s14  ;;  %p5312_p10 = scmp.lt.s32.totalorder %s6013_s15, %s5675_s27 }
 0x143   : > { %p5313_p6 = scmp.lt.s32.totalorder %s5311_s8, %s5307_s14 }
 0x144   : > { %p5309_p8 = pnand %p5308_p3, %p6731_p13 }
 0x145   : > { %p5314_p12 = por %p5313_p6, %p5312_p10 }
 0x146   : > { %p5310_p4 = pneg %p5309_p8 }
 0x148   : > { %p5315_p7 = pnand %p5314_p12, %p5310_p4 }
 0x14a   : > { %5318 = shalt.err (!%p5315_p7)
}
 0x14b   : > { %s5319_s23 = scalar_lea.vmem %s6037_s17, 1024  ;;  %s5578_s26 = smov [#allocation12]  }
 0x14c   : > { %p5320_p11 = scmp.ne.s32.totalorder %s6037_s17, %s5319_s23  ;;  %s5323_s18 = sshll.u32 %s5578_s26, 4  ;;  %s5324_s18 = int_to_ptr.vmem [resolvable:$false] %s5323_s18 }
 0x14d   : > { %s5325_s3 = scalar_lea.vmem %s5324_s18, 2048  ;;  %p5326_p2 = scmp.lt.s32.totalorder %s6037_s17, %s5324_s18 }
 0x14e   : > { %p5321_p0 = pnand %p5320_p11, %p6731_p13  ;;  %p5327_p5 = scmp.lt.s32.totalorder %s5325_s3, %s5319_s23 }
 0x150   : > { %p5322_p1 = pneg %p5321_p0  ;;  %p5328_p9 = por %p5327_p5, %p5326_p2 }
 0x152   : > { %p5329_p3 = pnand %p5328_p9, %p5322_p1 }
 0x154   : > { %5332 = shalt.err (!%p5329_p3)
}
 0x155   : > { %s6734_s14 = scalar_lea.sflag [#allocation11], %s5829_s0  ;;  %s1046_s8 = scalar_lea.vmem [#allocation15], %s5897_s11 }
 0x156   : > { %4805 = dma.hbm_to_vmem [thread:$0]  (%p6731_p13), %s6013_s15, 1024, %s6037_s17, %s6734_s14, %s5573_s13, %s5573_s13, %s5574_s24  }
 0x157   : > { %s1053_s23 = sshll.u32 %s1046_s8, 4  ;;  %s6069_s26 = scalar_lea.hbm %s5695_s21, %s5915_s4  ;;  %s6065_s23 = int_to_ptr.vmem [resolvable:$true] %s1053_s23 }
 0x158   : > { %s5333_s18 = scalar_lea.hbm %s6041_s28, 1024  ;;  %s5337_s3 = scalar_lea.hbm %s5685_s25, 2048 }
 0x159   : > { %p5334_p8 = scmp.ne.s32.totalorder %s6041_s28, %s5333_s18  ;;  %p5338_p6 = scmp.lt.s32.totalorder %s6041_s28, %s5685_s25 }
 0x15a   : > { %p5339_p12 = scmp.lt.s32.totalorder %s5337_s3, %s5333_s18 }
 0x15b   : > { %p5335_p4 = pnand %p5334_p8, %p6731_p13 }
 0x15c   : > { %p5340_p7 = por %p5339_p12, %p5338_p6 }
 0x15d   : > { %p5336_p10 = pneg %p5335_p4 }
 0x15f   : > { %p5341_p11 = pnand %p5340_p7, %p5336_p10 }
 0x161   : > { %5344 = shalt.err (!%p5341_p11)
}
 0x162   : > { %s5345_s15 = scalar_lea.vmem %s6065_s23, 1024  ;;  %s5579_s4 = smov [#allocation15]  }
 0x163   : > { %p5346_p0 = scmp.ne.s32.totalorder %s6065_s23, %s5345_s15  ;;  %s5349_s17 = sshll.u32 %s5579_s4, 4  ;;  %s5350_s17 = int_to_ptr.vmem [resolvable:$false] %s5349_s17 }
 0x164   : > { %s5351_s14 = scalar_lea.vmem %s5350_s17, 2048  ;;  %p5352_p5 = scmp.lt.s32.totalorder %s6065_s23, %s5350_s17 }
 0x165   : > { %p5347_p1 = pnand %p5346_p0, %p6731_p13  ;;  %p5353_p9 = scmp.lt.s32.totalorder %s5351_s14, %s5345_s15 }
 0x167   : > { %p5348_p2 = pneg %p5347_p1  ;;  %p5354_p3 = por %p5353_p9, %p5352_p5 }
 0x169   : > { %p5355_p8 = pnand %p5354_p3, %p5348_p2 }
 0x16b   : > { %5358 = shalt.err (!%p5355_p8)
}
 0x16c   : > { %s6735_s8 = scalar_lea.sflag [#allocation14], %s5829_s0  ;;  %s1084_s18 = scalar_lea.vmem [#allocation18], %s5897_s11 }
 0x16d   : > { %4807 = dma.hbm_to_vmem [thread:$0]  (%p6731_p13), %s6041_s28, 1024, %s6065_s23, %s6735_s8, %s5573_s13, %s5573_s13, %s5574_s24  }
 0x16e   : > { %s1091_s3 = sshll.u32 %s1084_s18, 4  ;;  %s6097_s15 = scalar_lea.hbm %s6715_s5, %s5835_s7  ;;  %s6093_s3 = int_to_ptr.vmem [resolvable:$true] %s1091_s3 }
 0x16f   : > { %s5359_s4 = scalar_lea.hbm %s6069_s26, 1024  ;;  %s5363_s17 = scalar_lea.hbm %s5695_s21, 2048 }
 0x170   : > { %p5360_p4 = scmp.ne.s32.totalorder %s6069_s26, %s5359_s4  ;;  %p5364_p12 = scmp.lt.s32.totalorder %s6069_s26, %s5695_s21 }
 0x171   : > { %p5365_p7 = scmp.lt.s32.totalorder %s5363_s17, %s5359_s4 }
 0x172   : > { %p5361_p10 = pnand %p5360_p4, %p6731_p13 }
 0x173   : > { %p5366_p11 = por %p5365_p7, %p5364_p12 }
 0x174   : > { %p5362_p6 = pneg %p5361_p10 }
 0x176   : > { %p5367_p0 = pnand %p5366_p11, %p5362_p6 }
 0x178   : > { %5370 = shalt.err (!%p5367_p0)
}
 0x179   : > { %s5371_s11 = scalar_lea.vmem %s6093_s3, 1024  ;;  %s5580_s28 = smov [#allocation18]  }
 0x17a   : > { %p5372_p1 = scmp.ne.s32.totalorder %s6093_s3, %s5371_s11  ;;  %s5375_s23 = sshll.u32 %s5580_s28, 4  ;;  %s5376_s23 = int_to_ptr.vmem [resolvable:$false] %s5375_s23 }
 0x17b   : > { %s5377_s14 = scalar_lea.vmem %s5376_s23, 2048  ;;  %p5378_p9 = scmp.lt.s32.totalorder %s6093_s3, %s5376_s23 }
 0x17c   : > { %p5373_p2 = pnand %p5372_p1, %p6731_p13  ;;  %p5379_p3 = scmp.lt.s32.totalorder %s5377_s14, %s5371_s11 }
 0x17e   : > { %p5374_p5 = pneg %p5373_p2  ;;  %p5380_p8 = por %p5379_p3, %p5378_p9 }
 0x180   : > { %p5381_p4 = pnand %p5380_p8, %p5374_p5 }
 0x182   : > { %5384 = shalt.err (!%p5381_p4)
}
 0x183   : > { %s6736_s8 = scalar_lea.sflag [#allocation17], %s5829_s0  ;;  %s1131_s18 = scalar_lea.vmem [#allocation21], %s5832_s1 }
 0x184   : > { %4809 = dma.hbm_to_vmem [thread:$0]  (%p6731_p13), %s6069_s26, 1024, %s6093_s3, %s6736_s8, %s5573_s13, %s5573_s13, %s5574_s24  }
 0x185   : > { %s1138_s4 = sshll.u32 %s1131_s18, 4  ;;  %s6123_s17 = scalar_lea.hbm %s5720_s29, %s5835_s7  ;;  %s1139_s4 = int_to_ptr.vmem [resolvable:$true] %s1138_s4 }
 0x186   : > { %s5385_s11 = scalar_lea.hbm %s6097_s15, 16  ;;  %s5389_s28 = scalar_lea.hbm %s6715_s5, 32 }
 0x187   : > { %p5386_p10 = scmp.ne.s32.totalorder %s6097_s15, %s5385_s11  ;;  %p5390_p7 = scmp.lt.s32.totalorder %s6097_s15, %s6715_s5 }
 0x188   : > { %p5391_p11 = scmp.lt.s32.totalorder %s5389_s28, %s5385_s11 }
 0x189   : > { %p5387_p6 = pnand %p5386_p10, %p6731_p13 }
 0x18a   : > { %p5392_p0 = por %p5391_p11, %p5390_p7 }
 0x18b   : > { %p5388_p12 = pneg %p5387_p6 }
 0x18d   : > { %p5393_p1 = pnand %p5392_p0, %p5388_p12 }
 0x18f   : > { %5396 = shalt.err (!%p5393_p1)
}
 0x190   : > { %s5397_s23 = scalar_lea.vmem %s1139_s4, 16  ;;  %s5581_s13 = smov [#allocation21]  }
 0x191   : > { %p5398_p2 = scmp.ne.s32.totalorder %s1139_s4, %s5397_s23  ;;  %s5401_s24 = sshll.u32 %s5581_s13, 4  ;;  %s5402_s24 = int_to_ptr.vmem [resolvable:$false] %s5401_s24 }
 0x192   : > { %s5403_s26 = scalar_lea.vmem %s5402_s24, 32  ;;  %p5404_p3 = scmp.lt.s32.totalorder %s1139_s4, %s5402_s24 }
 0x193   : > { %p5399_p5 = pnand %p5398_p2, %p6731_p13  ;;  %p5405_p8 = scmp.lt.s32.totalorder %s5403_s26, %s5397_s23 }
 0x195   : > { %p5400_p9 = pneg %p5399_p5  ;;  %p5406_p4 = por %p5405_p8, %p5404_p3 }
 0x197   : > { %p5407_p10 = pnand %p5406_p4, %p5400_p9 }
 0x199   : > { %5410 = shalt.err (!%p5407_p10)
}
 0x19a   : > { %s6737_s3 = scalar_lea.sflag [#allocation20], %s5829_s0  ;;  %s1169_s14 = scalar_lea.vmem [#allocation24], %s5832_s1 }
 0x19b   : > { %4811 = dma.hbm_to_vmem [thread:$0]  (%p6731_p13), %s6097_s15, 16, %s1139_s4, %s6737_s3  }
 0x19c   : > { %s1176_s8 = sshll.u32 %s1169_s14, 4  ;;  %s6142_s18 = scalar_lea.hbm %s5730_s30, %s5835_s7  ;;  %s1177_s8 = int_to_ptr.vmem [resolvable:$true] %s1176_s8 }
 0x19d   : > { %s5411_s11 = scalar_lea.hbm %s6123_s17, 16  ;;  %s5415_s28 = scalar_lea.hbm %s5720_s29, 32 }
 0x19e   : > { %p5412_p6 = scmp.ne.s32.totalorder %s6123_s17, %s5411_s11  ;;  %p5416_p11 = scmp.lt.s32.totalorder %s6123_s17, %s5720_s29 }
 0x19f   : > { %p5417_p0 = scmp.lt.s32.totalorder %s5415_s28, %s5411_s11 }
 0x1a0   : > { %p5413_p12 = pnand %p5412_p6, %p6731_p13 }
 0x1a1   : > { %p5418_p1 = por %p5417_p0, %p5416_p11 }
 0x1a2   : > { %p5414_p7 = pneg %p5413_p12 }
 0x1a4   : > { %p5419_p2 = pnand %p5418_p1, %p5414_p7 }
 0x1a6   : > { %5422 = shalt.err (!%p5419_p2)
}
 0x1a7   : > { %s5423_s23 = scalar_lea.vmem %s1177_s8, 16  ;;  %s5582_s15 = smov [#allocation24]  }
 0x1a8   : > { %p5424_p5 = scmp.ne.s32.totalorder %s1177_s8, %s5423_s23  ;;  %s5427_s7 = sshll.u32 %s5582_s15, 4  ;;  %s5428_s7 = int_to_ptr.vmem [resolvable:$false] %s5427_s7 }
 0x1a9   : > { %s5429_s4 = scalar_lea.vmem %s5428_s7, 32  ;;  %p5430_p8 = scmp.lt.s32.totalorder %s1177_s8, %s5428_s7 }
 0x1aa   : > { %p5425_p9 = pnand %p5424_p5, %p6731_p13  ;;  %p5431_p4 = scmp.lt.s32.totalorder %s5429_s4, %s5423_s23 }
 0x1ac   : > { %p5426_p3 = pneg %p5425_p9  ;;  %p5432_p10 = por %p5431_p4, %p5430_p8 }
 0x1ae   : > { %p5433_p6 = pnand %p5432_p10, %p5426_p3 }
 0x1b0   : > { %5436 = shalt.err (!%p5433_p6)
}
 0x1b1   : > { %s6738_s13 = scalar_lea.sflag [#allocation23], %s5829_s0  ;;  %s1207_s24 = scalar_lea.vmem [#allocation27], %s5832_s1 }
 0x1b2   : > { %4813 = dma.hbm_to_vmem [thread:$0]  (%p6731_p13), %s6123_s17, 16, %s1177_s8, %s6738_s13  }
 0x1b3   : > { %s1214_s26 = sshll.u32 %s1207_s24, 4  ;;  %s5437_s3 = scalar_lea.hbm %s6142_s18, 16  ;;  %s1215_s26 = int_to_ptr.vmem [resolvable:$true] %s1214_s26 }
 0x1b4   : > { %p5438_p12 = scmp.ne.s32.totalorder %s6142_s18, %s5437_s3  ;;  %s5441_s14 = scalar_lea.hbm %s5730_s30, 32 }
 0x1b5   : > { %p5442_p0 = scmp.lt.s32.totalorder %s6142_s18, %s5730_s30  ;;  %p5443_p1 = scmp.lt.s32.totalorder %s5441_s14, %s5437_s3 }
 0x1b6   : > { %p5439_p7 = pnand %p5438_p12, %p6731_p13 }
 0x1b7   : > { %p5444_p2 = por %p5443_p1, %p5442_p0 }
 0x1b8   : > { %p5440_p11 = pneg %p5439_p7 }
 0x1ba   : > { %p5445_p5 = pnand %p5444_p2, %p5440_p11 }
 0x1bc   : > { %5448 = shalt.err (!%p5445_p5)
}
 0x1bd   : > { %s5449_s11 = scalar_lea.vmem %s1215_s26, 16  ;;  %s5583_s1 = smov [#allocation27]  }
 0x1be   : > { %p5450_p9 = scmp.ne.s32.totalorder %s1215_s26, %s5449_s11  ;;  %s5453_s17 = sshll.u32 %s5583_s1, 4  ;;  %s5454_s17 = int_to_ptr.vmem [resolvable:$false] %s5453_s17 }
 0x1bf   : > { %s5455_s8 = scalar_lea.vmem %s5454_s17, 32  ;;  %p5456_p4 = scmp.lt.s32.totalorder %s1215_s26, %s5454_s17 }
 0x1c0   : > { %p5451_p3 = pnand %p5450_p9, %p6731_p13  ;;  %p5457_p10 = scmp.lt.s32.totalorder %s5455_s8, %s5449_s11 }
 0x1c2   : > { %p5452_p8 = pneg %p5451_p3  ;;  %p5458_p6 = por %p5457_p10, %p5456_p4 }
 0x1c4   : > { %p5459_p12 = pnand %p5458_p6, %p5452_p8 }
 0x1c6   : > { %5462 = shalt.err (!%p5459_p12)
}
 0x1c7   : > { %4815 = dma.hbm_to_vmem [thread:$0]  (%p6731_p13), %s6142_s18, 16, %s1215_s26, %s1184_s6  }
 0x1c8 PF: > { %p6739_p7 = scmp.ne.s32.totalorder %s6727_s10, 0 }
 0x1c9   : > { %p6740_p11 = scmp.eq.s32.totalorder (!%p6739_p7), %s5766_s22, 0 }
 0x1ca   : > { %1223 = sbr.rel (%p6739_p7) target bundleno = 3390 (0xd3e), region = 140 }
 0x1cf   : > { %5480 = dma.done.wait (%p6740_p11), [#allocation6], 1024   ;;  %p6741_p0 = pmov %p6740_p11 }
 0x1d0   : > { %s6742_s28 = sld [smem:[#allocation63_spill]]  ;;  %s6180_s15 = sand.u32 1, %s5766_s22  }
 0x1d1   : > { %5482 = vsyncadd (%p6741_p0), [#allocation6], 4294966272  ;;  %s6743_s23 = sld [smem:[#allocation66_spill]]  ;;  %s1230_s0 = scalar_lea.sflag [#allocation8], %s6180_s15 }
 0x1d6   : > { %s6183_s2 = sand.u32 1, %s6742_s28  }
 0x1d7   : > { %p6744_p13 = scmp.ne.s32.totalorder %s6743_s23, 0 }
 0x1d9   : > { %5484 = dma.done.wait (%p6744_p13), %s1230_s0, 1040  }
 0x1da   : > { %5486 = vsyncadd (%p6744_p13), %s1230_s0, 4294966256  ;;  %s4163_s10 = sshll.u32 %s6183_s2, 6  ;;  %s1247_s7 = scalar_lea.sflag [#allocation11], %s6180_s15 }
 0x1db   : > { %s6192_s18 = scalar_lea.vmem [#allocation9], %s4163_s10 }
 0x1dc   : > { %5488 = dma.done.wait (%p6744_p13), %s1247_s7, 1040  }
 0x1dd   : > { %5490 = vsyncadd (%p6744_p13), %s1247_s7, 4294966256  ;;  %s6200_s13 = scalar_lea.vmem [#allocation12], %s4163_s10  ;;  %s1264_s24 = scalar_lea.sflag [#allocation14], %s6180_s15 }
 0x1de   : > { %5492 = dma.done.wait (%p6744_p13), %s1264_s24, 1040  }
 0x1df   : > { %5494 = vsyncadd (%p6744_p13), %s1264_s24, 4294966256  ;;  %s6208_s3 = scalar_lea.vmem [#allocation15], %s4163_s10  ;;  %s1281_s14 = scalar_lea.sflag [#allocation17], %s6180_s15 }
 0x1e0   : > { %5496 = dma.done.wait (%p6744_p13), %s1281_s14, 1040  }
 0x1e1   : > { %5498 = vsyncadd (%p6744_p13), %s1281_s14, 4294966256  ;;  %s6216_s1 = scalar_lea.vmem [#allocation18], %s4163_s10  ;;  %s1298_s17 = scalar_lea.sflag [#allocation20], %s6180_s15 }
 0x1e2   : > { %s6219_s8 = scalar_lea.vmem [#allocation19], %s4163_s10 }
 0x1e3   : > { %5500 = dma.done.wait (%p6744_p13), %s1298_s17, 1040  }
 0x1e4   : > { %5502 = vsyncadd (%p6744_p13), %s1298_s17, 4294966256  ;;  %s1315_s0 = scalar_lea.sflag [#allocation23], %s6180_s15  ;;  %s6227_s7 = scalar_lea.vmem [#allocation22], %s4163_s10 }
 0x1e5   : > { %5504 = dma.done.wait (%p6744_p13), %s1315_s0, 1040  }
 0x1e6   : > { %5506 = vsyncadd (%p6744_p13), %s1315_s0, 4294966256  ;;  %s1332_s14 = scalar_lea.sflag [#allocation26], %s6180_s15  ;;  %s6235_s11 = scalar_lea.vmem [#allocation25], %s4163_s10 }
 0x1e7   : > { %5508 = dma.done.wait (%p6744_p13), %s1332_s14, 1040  }
 0x1e8   : > { %5510 = vsyncadd (%p6744_p13), %s1332_s14, 4294966256  ;;  %p6745_p1 = pmov %p6741_p0 }
 0x1e9   : > { %p6746_p2 = pmov %p6741_p0 }
 0x1ea   : > { %5512 = dma.done.wait (%p6745_p1), [#allocation29], 1040  }
 0x1eb   : > { %5514 = vsyncadd (%p6746_p2), [#allocation29], 4294966256  ;;  %s6747_s0 = sld [smem:[#allocation51_spill]]  ;;  %p1502_p5 = scmp.lt.s32.totalorder %s5766_s22, 1 }
 0x1ec   : > { %s6748_s24 = sld [smem:[#allocation49_spill]]  ;;  %p6752_p9 = scmp.ne.s32.totalorder %s5766_s22, 0 }
 0x1ed   : > { %s6749_s15 = sld [smem:[#allocation50_spill]] }
 0x1ee   : > { %s6750_s10 = sld [smem:[#allocation52_spill]] }
 0x1ef   : > { %s6751_s28 = sld [smem:[#allocation56_spill]] }
 0x1f0   : > { %s6248_s26 = scalar_select %p1502_p5, %s5766_s22, 1 }
 0x1f1   : > { %1527 = sbr.rel (%p6752_p9) target bundleno = 510 (0x1fe), region = 212  ;;  %s6753_s9 = sld [smem:[#allocation46_spill]] (!%p6752_p9) }
 0x1f2   : > { %s4340_s23 = sshll.u32 %s6248_s26, 6  ;;  %s1514_s14 = scalar_lea.vmem %s6747_s0, %s6248_s26 }
 0x1f3   : > { %s6254_s17 = scalar_lea.vmem %s6748_s24, %s4340_s23  ;;  %s6257_s4 = scalar_lea.vmem %s6749_s15, %s4340_s23 }
 0x1f4   : > { %s6260_s6 = scalar_lea.vmem %s6750_s10, %s4340_s23  ;;  %s6754_s24 = sld [smem:[#allocation48_spill]] (!%p6752_p9) }
 0x1f5   : > { %s1522_s5 = scalar_lea.vmem %s6751_s28, %s6248_s26 }
 0x1f6   : > { %v1536_v4 = vld [vmem:[#allocation5] sm:$0xff]  ;;  %v1537_v5 = vld [vmem:[#allocation5 + $0x8] sm:$0xff]  ;;  %v1538_v6 = vld [vmem:[#allocation5 + $0x10] sm:$0xff] }
 0x1f7   : > { %v1528_v0 = vld [vmem:[%s6753_s9] sm:$0xff]  ;;  %v1529_v1 = vld [vmem:[%s6753_s9 + $0x8] sm:$0xff]  ;;  %v1530_v2 = vld [vmem:[%s6753_s9 + $0x10] sm:$0xff]  ;;  %1544 = vst [vmem:[#allocation3] sm:$0xff] %v1536_v4 }
 0x1f8   : > { %1532 = vst [vmem:[#allocation2 + $0x10] sm:$0xff] %v1528_v0  ;;  %1533 = vst [vmem:[#allocation2] sm:$0xff] %v1529_v1  ;;  %v1531_v3 = vld [vmem:[%s6753_s9 + $0x18] sm:$0xff]  ;;  %v1540_v8 = vld [vmem:[#allocation5 + $0x20] sm:$0xff] }
 0x1f9   : > { %1534 = vst [vmem:[#allocation2 + $0x18] sm:$0xff] %v1530_v2  ;;  %1535 = vst [vmem:[#allocation2 + $0x8] sm:$0xff] %v1531_v3  ;;  %v1539_v7 = vld [vmem:[#allocation5 + $0x18] sm:$0xff]  ;;  %v1541_v9 = vld [vmem:[#allocation5 + $0x28] sm:$0xff] }
 0x1fa   : > { %1545 = vst [vmem:[#allocation3 + $0x38] sm:$0xff] %v1537_v5  ;;  %1546 = vst [vmem:[#allocation3 + $0x8] sm:$0xff] %v1538_v6  ;;  %v1542_v10 = vld [vmem:[#allocation5 + $0x30] sm:$0xff]  ;;  %v1543_v11 = vld [vmem:[#allocation5 + $0x38] sm:$0xff] }
 0x1fb   : > { %1547 = vst [vmem:[#allocation3 + $0x18] sm:$0xff] %v1539_v7  ;;  %1548 = vst [vmem:[#allocation3 + $0x20] sm:$0xff] %v1540_v8  ;;  %v1552_v12 = vld [vmem:[%s6754_s24] sm:$0xf] }
 0x1fc   : > { %1549 = vst [vmem:[#allocation3 + $0x10] sm:$0xff] %v1541_v9  ;;  %1550 = vst [vmem:[#allocation3 + $0x30] sm:$0xff] %v1542_v10 }
 0x1fd   : > { %1551 = vst [vmem:[#allocation3 + $0x28] sm:$0xff] %v1543_v11  ;;  %1553 = vst [vmem:[#allocation4] sm:$0xf] %v1552_v12 }
 0x1fe PF: > { %s6755_s28 = sld [smem:[#allocation40_spill]]  ;;  %v5584_v15 = vmov 0   ;;  %vm1843_vm0 = vcmask 1041408   ;;  %v1578_v50 = vlaneseq  ;;  %vm1632_vm5 = vcmask 261120   ;;  %s6770_s26 = scalar_lea.vmem [#allocation24], %s6183_s2 }
 0x1ff   : > { %4927 = vset.pattern.permute.xlu1 %v5584_v15  ;;  %4926 = vset.pattern.permute.xlu0 %v5584_v15  ;;  %s6756_s0 = sld [smem:[#allocation43_spill]]  ;;  %v1554_v25 = vld [vmem:[#allocation2 + $0x10] sm:$0xff]  ;;  %v1555_v26 = vld [vmem:[#allocation2] sm:$0xff]  ;;  %v5585_v56 = vmov 0.0   ;;  %vm1830_vm12 = vcmask 31744   ;;  %p4321_p3 = scmp.ne.s32.totalorder %s5766_s22, 1 }
 0x200   : > { %v1556_v22 = vld [vmem:[#allocation2 + $0x18] sm:$0xff]  ;;  %v1557_v23 = vld [vmem:[#allocation2 + $0x8] sm:$0xff]  ;;  %v6281_v28 = vpack.c.bf16 %v1555_v26, %v1554_v25  ;;  %s6758_s15 = sld [smem:[#allocation41_spill]]  ;;  %v6312_v51 = vand.u32 127, %v1578_v50 }
 0x201   : > { %v6279_v24 = vpack.c.bf16 %v1557_v23, %v1556_v22  ;;  %s6760_s24 = sld [smem:[#allocation44_spill]] }
 0x202   : > { %s6772_s22 = sld [smem:[#allocation62_spill]] (!%p4321_p3) }
 0x203   : > { %4490 = vmatprep.subr.bf16.mxu1 %v6279_v24 }
 0x204   : > { %v1572_v13 = vld [vmem:[%s6755_s28 + $0x10] sm:$0xff]  ;;  %v1570_v14 = vld [vmem:[%s6755_s28] sm:$0xff]  ;;  %v1573_v16 = vld [vmem:[%s6755_s28 + $0x18] sm:$0xff]  ;;  %4491 = vmatpush3.bf16.msra.mxu1 %v6279_v24 }
 0x205   : > { %1587 = vperm.xlu1 %4927, %v1572_v13   ;;  %1581 = vperm.xlu0 %4926, %v1570_v14   ;;  %v1571_v17 = vld [vmem:[%s6755_s28 + $0x8] sm:$0xff]  ;;  %s6757_s10 = smov %s6756_s0  ;;  %v1574_v19 = vld [vmem:[%s6755_s28 + $0x20] sm:$0xff]  ;;  %v1577_v20 = vld [vmem:[%s6755_s28 + $0x38] sm:$0xff] }
 0x206   : > { %v1575_v18 = vld [vmem:[%s6755_s28 + $0x28] sm:$0xff]  ;;  %v1576_v21 = vld [vmem:[%s6755_s28 + $0x30] sm:$0xff]  ;;  %v1566_v27 = vld [vmem:[#allocation4] sm:$0xf]  ;;  %4492 = vmatprep.subr.bf16.mxu1 %v6281_v28  ;;  %s6759_s23 = smov %s6758_s15 }
 0x207   : > { %v1771_v29 = vld [vmem:[%s6756_s0 + $0x8] sm:$0xff]  ;;  %v1770_v30 = vld [vmem:[%s6757_s10] sm:$0xff]  ;;  %v6288_v31 = vpack.c.bf16 %v1566_v27, %v1566_v27  ;;  %v1773_v32 = vld [vmem:[%s6757_s10 + $0x18] sm:$0xff] }
 0x208   : > { %v1772_v33 = vld [vmem:[%s6757_s10 + $0x10] sm:$0xff]  ;;  %4493 = vmatpush3.bf16.msra.mxu1 %v6281_v28  ;;  %v1775_v34 = vld [vmem:[%s6757_s10 + $0x28] sm:$0xff]  ;;  %v1774_v35 = vld [vmem:[%s6757_s10 + $0x20] sm:$0xff] }
 0x209   : > { %1590 = vperm.xlu1 %4927, %v1573_v16   ;;  %1584 = vperm.xlu0 %4926, %v1571_v17   ;;  %v1777_v36 = vld [vmem:[%s6757_s10 + $0x38] sm:$0xff]  ;;  %v1776_v37 = vld [vmem:[%s6757_s10 + $0x30] sm:$0xff]  ;;  %v1711_v38 = vld [vmem:[%s6758_s15 + $0x8] sm:$0xff]  ;;  %v6324_v1 = vsel %vm1843_vm0, %v6288_v31, 0 }
 0x20a   : > { %4794 = vmatprep.subr.msk.bf16.mxu1 %vm1843_vm0, %v6288_v31  ;;  %v1710_v39 = vld [vmem:[%s6759_s23] sm:$0xff]  ;;  %v1713_v40 = vld [vmem:[%s6759_s23 + $0x18] sm:$0xff]  ;;  %v1712_v41 = vld [vmem:[%s6759_s23 + $0x10] sm:$0xff] }
 0x20b   : > { %v1715_v42 = vld [vmem:[%s6759_s23 + $0x28] sm:$0xff]  ;;  %v1714_v43 = vld [vmem:[%s6759_s23 + $0x20] sm:$0xff]  ;;  %v1717_v44 = vld [vmem:[%s6759_s23 + $0x38] sm:$0xff] }
 0x20c   : > { %v1716_v45 = vld [vmem:[%s6759_s23 + $0x30] sm:$0xff]  ;;  %v2675_v46 = vld [vmem:[%s6760_s24 + $0x8] sm:$0xff]  ;;  %v2674_v47 = vld [vmem:[%s6760_s24] sm:$0xff] }
 0x20d   : > { %1596 = vperm.xlu1 %4927, %v1575_v18   ;;  %1593 = vperm.xlu0 %4926, %v1574_v19   ;;  %v2677_v48 = vld [vmem:[%s6760_s24 + $0x18] sm:$0xff]  ;;  %v2676_v49 = vld [vmem:[%s6760_s24 + $0x10] sm:$0xff] }
 0x211   : > { %1602 = vperm.xlu1 %4927, %v1577_v20   ;;  %1599 = vperm.xlu0 %4926, %v1576_v21  }
 0x215   : > { %1782 = vperm.xlu1 %4927, %v1771_v29   ;;  %1779 = vperm.xlu0 %4926, %v1770_v30   ;;  %v4928_v29 = vld [vmem:[%s6254_s17 + $0x38] sm:$0xff]  }
 0x219   : > { %1788 = vperm.xlu1 %4927, %v1773_v32   ;;  %1785 = vperm.xlu0 %4926, %v1772_v33  }
 0x21d   : > { %1794 = vperm.xlu1 %4927, %v1775_v34   ;;  %1791 = vperm.xlu0 %4926, %v1774_v35  }
 0x221   : > { %1800 = vperm.xlu1 %4927, %v1777_v36   ;;  %1797 = vperm.xlu0 %4926, %v1776_v37  }
 0x225   : > { %1722 = vperm.xlu1 %4927, %v1711_v38   ;;  %1719 = vperm.xlu0 %4926, %v1710_v39  }
 0x229   : > { %1728 = vperm.xlu1 %4927, %v1713_v40   ;;  %1725 = vperm.xlu0 %4926, %v1712_v41  }
 0x22d   : > { %1734 = vperm.xlu1 %4927, %v1715_v42   ;;  %1731 = vperm.xlu0 %4926, %v1714_v43  }
 0x231   : > { %1740 = vperm.xlu1 %4927, %v1717_v44   ;;  %1737 = vperm.xlu0 %4926, %v1716_v45   ;;  %v4929_v44 = vld [vmem:[%s6254_s17 + $0x30] sm:$0xff]  }
 0x235   : > { %2682 = vperm.xlu1 %4927, %v2675_v46   ;;  %2679 = vperm.xlu0 %4926, %v2674_v47  }
 0x239   : > { %2688 = vperm.xlu1 %4927, %v2677_v48   ;;  %2685 = vperm.xlu0 %4926, %v2676_v49  }
 0x280   : > { %v1588_v52 = vpop.permute.xlu1 %1587  ;;  %v1582_v53 = vpop.permute.xlu0 %1581 }
 0x281   : > { %vm1606_vm1 = vcmp.eq.s32.totalorder %v1588_v52, %v6312_v51  ;;  %vm1604_vm2 = vcmp.eq.s32.totalorder %v1582_v53, %v6312_v51  ;;  %v4930_v52 = vld [vmem:[%s6254_s17 + $0x28] sm:$0xff]  }
 0x282   : > { %v4181_v57 = vsel %vm1606_vm1, 1.0, %v5585_v56  ;;  %v4179_v58 = vsel %vm1604_vm2, 1.0, %v5585_v56 }
 0x284   : > { %v1591_v54 = vpop.permute.xlu1 %1590  ;;  %v1585_v55 = vpop.permute.xlu0 %1584 }
 0x285   : > { %vm1607_vm3 = vcmp.eq.s32.totalorder %v1591_v54, %v6312_v51  ;;  %vm1605_vm4 = vcmp.eq.s32.totalorder %v1585_v55, %v6312_v51 }
 0x286   : > { %v4182_v59 = vsel %vm1607_vm3, 1.0, %v5585_v56  ;;  %v4180_v60 = vsel %vm1605_vm4, 1.0, %v5585_v56 }
 0x287   : > { %v1629_v61 = vpack.c.bf16 %v4182_v59, %v4181_v57  ;;  %v1628_v62 = vpack.c.bf16 %v4180_v60, %v4179_v58  ;;  %v4931_v57 = vld [vmem:[%s6254_s17 + $0x20] sm:$0xff]   ;;  %v4932_v58 = vld [vmem:[%s6254_s17 + $0x18] sm:$0xff]   ;;  %v4933_v59 = vld [vmem:[%s6254_s17 + $0x10] sm:$0xff]  }
 0x288   : > { %v1597_v63 = vpop.permute.xlu1 %1596  ;;  %v1594_v0 = vpop.permute.xlu0 %1593  ;;  %v4934_v60 = vld [vmem:[%s6254_s17 + $0x8] sm:$0xff]  }
 0x289   : > { %vm1609_vm6 = vcmp.eq.s32.totalorder %v1597_v63, %v6312_v51  ;;  %vm1608_vm7 = vcmp.eq.s32.totalorder %v1594_v0, %v6312_v51  ;;  %4494 = vmatprep.mubr.msk.bf16.mxu1 %vm1632_vm5, %v1628_v62  ;;  %v4936_v62 = vld [vmem:[%s6257_s4 + $0x38] sm:$0xff]   ;;  %v4937_v63 = vld [vmem:[%s6257_s4 + $0x30] sm:$0xff]   ;;  %v4938_v0 = vld [vmem:[%s6257_s4 + $0x28] sm:$0xff]  }
 0x28a   : > { %v4184_v2 = vsel %vm1609_vm6, 1.0, %v5585_v56  ;;  %v4183_v3 = vsel %vm1608_vm7, 1.0, %v5585_v56  ;;  %4495 = vmatmul.mubr.msk.bf16.vlgmr.msra.gmra.mxu1 %vm1632_vm5, %v1629_v61  ;;  %v4935_v61 = vld [vmem:[%s6254_s17] sm:$0xff]   ;;  %4524 = vmatprep.subr.bf16.mxu0 %v4936_v62  ;;  %s6764_s17 = scalar_lea.vmem [#allocation10], %s6183_s2 }
 0x28b   : > { %v1630_v4 = vpack.c.bf16 %v4184_v2, %v4183_v3  ;;  %4503 = vmatpush3.bf16.msra.mxu1 %v6324_v1  ;;  %4525 = vmatpush3.bf16.msra.mxu0 %v4936_v62  ;;  %v4939_v2 = vld [vmem:[%s6257_s4 + $0x20] sm:$0xff]   ;;  %v4940_v3 = vld [vmem:[%s6257_s4 + $0x18] sm:$0xff]  }
 0x28c   : > { %v1603_v5 = vpop.permute.xlu1 %1602  ;;  %v1600_v6 = vpop.permute.xlu0 %1599  ;;  %4512 = vmatprep.subr.bf16.mxu1 %v6279_v24  ;;  %4526 = vmatprep.subr.bf16.mxu0 %v4937_v63 }
 0x28d   : > { %vm1611_vm8 = vcmp.eq.s32.totalorder %v1603_v5, %v6312_v51  ;;  %vm1610_vm9 = vcmp.eq.s32.totalorder %v1600_v6, %v6312_v51  ;;  %4498 = vmatprep.mubr.msk.bf16.mxu1 %vm1632_vm5, %v1630_v4  ;;  %v4941_v4 = vld [vmem:[%s6257_s4 + $0x10] sm:$0xff]   ;;  %v4942_v5 = vld [vmem:[%s6257_s4 + $0x8] sm:$0xff]   ;;  %v4943_v6 = vld [vmem:[%s6257_s4] sm:$0xff]  }
 0x28e   : > { %v4186_v7 = vsel %vm1611_vm8, 1.0, %v5585_v56  ;;  %v4185_v8 = vsel %vm1610_vm9, 1.0, %v5585_v56 }
 0x28f   : > { %v1631_v9 = vpack.c.bf16 %v4186_v7, %v4185_v8  ;;  %4527 = vmatpush3.bf16.msra.mxu0 %v4937_v63 }
 0x290   : > { %v1783_v10 = vpop.permute.xlu1 %1782  ;;  %v1780_v11 = vpop.permute.xlu0 %1779  ;;  %4528 = vmatprep.subr.bf16.mxu0 %v4938_v0 }
 0x291   : > { %vm1803_vm10 = vcmp.eq.s32.totalorder %v1783_v10, %v6312_v51  ;;  %vm1802_vm11 = vcmp.eq.s32.totalorder %v1780_v11, %v6312_v51 }
 0x292   : > { %v4200_v12 = vsel %vm1803_vm10, 1.0, %v5585_v56  ;;  %v4199_v13 = vsel %vm1802_vm11, 1.0, %v5585_v56  ;;  %4499 = vmatmul.mubr.msk.bf16.gmra.mxu1 %vm1632_vm5, %v1631_v9 }
 0x293   : > { %v1826_v14 = vpack.c.bf16 %v4200_v12, %v4199_v13  ;;  %4529 = vmatpush3.bf16.msra.mxu0 %v4938_v0 }
 0x294   : > { %v1789_v15 = vpop.permute.xlu1 %1788  ;;  %v1786_v16 = vpop.permute.xlu0 %1785  ;;  %4530 = vmatprep.subr.bf16.mxu0 %v4939_v2 }
 0x295   : > { %vm1805_vm13 = vcmp.eq.s32.totalorder %v1789_v15, %v6312_v51  ;;  %vm1804_vm14 = vcmp.eq.s32.totalorder %v1786_v16, %v6312_v51  ;;  %4504 = vmatprep.mubr.msk.bf16.mxu1 %vm1830_vm12, %v1826_v14 }
 0x296   : > { %v4202_v17 = vsel %vm1805_vm13, 1.0, %v5585_v56  ;;  %v4201_v18 = vsel %vm1804_vm14, 1.0, %v5585_v56 }
 0x297   : > { %v1827_v19 = vpack.c.bf16 %v4202_v17, %v4201_v18  ;;  %4531 = vmatpush3.bf16.msra.mxu0 %v4939_v2 }
 0x298   : > { %v1795_v20 = vpop.permute.xlu1 %1794  ;;  %v1792_v21 = vpop.permute.xlu0 %1791  ;;  %4532 = vmatprep.subr.bf16.mxu0 %v4940_v3 }
 0x299   : > { %vm1807_vm15 = vcmp.eq.s32.totalorder %v1795_v20, %v6312_v51  ;;  %vm1806_vm1 = vcmp.eq.s32.totalorder %v1792_v21, %v6312_v51 }
 0x29a   : > { %v4204_v22 = vsel %vm1807_vm15, 1.0, %v5585_v56  ;;  %v4203_v23 = vsel %vm1806_vm1, 1.0, %v5585_v56  ;;  %4505 = vmatmul.mubr.msk.bf16.vlgmr.msra.gmra.mxu1 %vm1830_vm12, %v1827_v19  ;;  %vm2618_vm1 = vcmask 523264  }
 0x29b   : > { %v1828_v25 = vpack.c.bf16 %v4204_v22, %v4203_v23  ;;  %4513 = vmatpush3.bf16.msra.mxu1 %v6279_v24  ;;  %4533 = vmatpush3.bf16.msra.mxu0 %v4940_v3 }
 0x29c   : > { %v1801_v26 = vpop.permute.xlu1 %1800  ;;  %v1798_v27 = vpop.permute.xlu0 %1797  ;;  %4514 = vmatprep.subr.bf16.mxu1 %v6281_v28  ;;  %4534 = vmatprep.subr.bf16.mxu0 %v4941_v4 }
 0x29d   : > { %vm1809_vm2 = vcmp.eq.s32.totalorder %v1801_v26, %v6312_v51  ;;  %vm1808_vm3 = vcmp.eq.s32.totalorder %v1798_v27, %v6312_v51  ;;  %4508 = vmatprep.mubr.msk.bf16.mxu1 %vm1830_vm12, %v1828_v25 }
 0x29e   : > { %v4206_v30 = vsel %vm1809_vm2, 1.0, %v5585_v56  ;;  %v4205_v32 = vsel %vm1808_vm3, 1.0, %v5585_v56 }
 0x29f   : > { %v1829_v33 = vpack.c.bf16 %v4206_v30, %v4205_v32  ;;  %4515 = vmatpush3.bf16.msra.mxu1 %v6281_v28  ;;  %4535 = vmatpush3.bf16.msra.mxu0 %v4941_v4  ;;  %v6399_v32 = vld [vmem:[#allocation3] sm:$0xff]  ;;  %v4944_v4 = vld [vmem:[%s6260_s6 + $0x38] sm:$0xff]  }
 0x2a0   : > { %v1723_v34 = vpop.permute.xlu1 %1722  ;;  %v1720_v24 = vpop.permute.xlu0 %1719  ;;  %4548 = vmatprep.subr.bf16.mxu1 %v4928_v29  ;;  %4536 = vmatprep.subr.bf16.mxu0 %v4942_v5 }
 0x2a1   : > { %vm1743_vm4 = vcmp.eq.s32.totalorder %v1723_v34, %v6312_v51  ;;  %vm1742_vm6 = vcmp.eq.s32.totalorder %v1720_v24, %v6312_v51  ;;  %v6403_v34 = vld [vmem:[#allocation3 + $0x8] sm:$0xff] }
 0x2a2   : > { %v4192_v35 = vsel %vm1743_vm4, 1.0, %v5585_v56  ;;  %v4191_v36 = vsel %vm1742_vm6, 1.0, %v5585_v56  ;;  %4509 = vmatmul.mubr.msk.bf16.gmra.mxu1 %vm1830_vm12, %v1829_v33  ;;  %v6401_v33 = vld [vmem:[#allocation3 + $0x18] sm:$0xff] }
 0x2a3   : > { %v1766_v37 = vpack.c.bf16 %v4192_v35, %v4191_v36  ;;  %4537 = vmatpush3.bf16.msra.mxu0 %v4942_v5  ;;  %v6405_v35 = vld [vmem:[#allocation3 + $0x38] sm:$0xff]  ;;  %v4945_v5 = vld [vmem:[%s6260_s6 + $0x30] sm:$0xff]  }
 0x2a4   : > { %v1729_v38 = vpop.permute.xlu1 %1728  ;;  %v1726_v39 = vpop.permute.xlu0 %1725  ;;  %4538 = vmatprep.subr.bf16.mxu0 %v4943_v6 }
 0x2a5   : > { %vm1745_vm7 = vcmp.eq.s32.totalorder %v1729_v38, %v6312_v51  ;;  %vm1744_vm8 = vcmp.eq.s32.totalorder %v1726_v39, %v6312_v51  ;;  %4516 = vmatprep.mubr.msk.bf16.mxu1 %vm1632_vm5, %v1766_v37 }
 0x2a6   : > { %v4194_v28 = vsel %vm1745_vm7, 1.0, %v5585_v56  ;;  %v4193_v40 = vsel %vm1744_vm8, 1.0, %v5585_v56 }
 0x2a7   : > { %v1767_v41 = vpack.c.bf16 %v4194_v28, %v4193_v40  ;;  %4539 = vmatpush3.bf16.msra.mxu0 %v4943_v6  ;;  %v4946_v6 = vld [vmem:[%s6260_s6 + $0x28] sm:$0xff]  }
 0x2a8   : > { %v1735_v42 = vpop.permute.xlu1 %1734  ;;  %v1732_v43 = vpop.permute.xlu0 %1731  ;;  %4572 = vmatprep.subr.bf16.mxu0 %v4944_v4 }
 0x2a9   : > { %vm1747_vm9 = vcmp.eq.s32.totalorder %v1735_v42, %v6312_v51  ;;  %vm1746_vm10 = vcmp.eq.s32.totalorder %v1732_v43, %v6312_v51 }
 0x2aa   : > { %v4196_v45 = vsel %vm1747_vm9, 1.0, %v5585_v56  ;;  %v4195_v46 = vsel %vm1746_vm10, 1.0, %v5585_v56  ;;  %4517 = vmatmul.mubr.msk.bf16.vlgmr.msra.gmra.mxu1 %vm1632_vm5, %v1767_v41 }
 0x2ab   : > { %v1768_v47 = vpack.c.bf16 %v4196_v45, %v4195_v46  ;;  %4549 = vmatpush3.bf16.msra.mxu1 %v4928_v29  ;;  %v6411_v46 = vld [vmem:[#allocation3 + $0x20] sm:$0xff] }
 0x2ac   : > { %v1741_v48 = vpop.permute.xlu1 %1740  ;;  %v1738_v49 = vpop.permute.xlu0 %1737  ;;  %4550 = vmatprep.subr.bf16.mxu1 %v4929_v44 }
 0x2ad   : > { %vm1749_vm11 = vcmp.eq.s32.totalorder %v1741_v48, %v6312_v51  ;;  %vm1748_vm13 = vcmp.eq.s32.totalorder %v1738_v49, %v6312_v51  ;;  %4520 = vmatprep.mubr.msk.bf16.mxu1 %vm1632_vm5, %v1768_v47  ;;  %v6413_v47 = vld [vmem:[#allocation3 + $0x28] sm:$0xff]  ;;  %v6415_v48 = vld [vmem:[#allocation3 + $0x30] sm:$0xff] }
 0x2ae   : > { %v4198_v53 = vsel %vm1749_vm11, 1.0, %v5585_v56  ;;  %v4197_v54 = vsel %vm1748_vm13, 1.0, %v5585_v56 }
 0x2af   : > { %v1769_v55 = vpack.c.bf16 %v4198_v53, %v4197_v54  ;;  %4551 = vmatpush3.bf16.msra.mxu1 %v4929_v44  ;;  %v6417_v53 = vld [vmem:[#allocation3 + $0x10] sm:$0xff] }
 0x2b0   : > { %4552 = vmatprep.subr.bf16.mxu1 %v4930_v52 }
 0x2b2   : > { %4521 = vmatmul.mubr.msk.bf16.gmra.mxu1 %vm1632_vm5, %v1769_v55 }
 0x2b3   : > { %4553 = vmatpush3.bf16.msra.mxu1 %v4930_v52 }
 0x2b4   : > { %4554 = vmatprep.subr.bf16.mxu1 %v4931_v57 }
 0x2b7   : > { %4555 = vmatpush3.bf16.msra.mxu1 %v4931_v57 }
 0x2b8   : > { %4556 = vmatprep.subr.bf16.mxu1 %v4932_v58 }
 0x2bb   : > { %4557 = vmatpush3.bf16.msra.mxu1 %v4932_v58 }
 0x2bc   : > { %4558 = vmatprep.subr.bf16.mxu1 %v4933_v59 }
 0x2bf   : > { %4559 = vmatpush3.bf16.msra.mxu1 %v4933_v59 }
 0x2c0   : > { %4560 = vmatprep.subr.bf16.mxu1 %v4934_v60 }
 0x2c3   : > { %4561 = vmatpush3.bf16.msra.mxu1 %v4934_v60 }
 0x2c4   : > { %4562 = vmatprep.subr.bf16.mxu1 %v4935_v61 }
 0x2c7   : > { %4563 = vmatpush3.bf16.msra.mxu1 %v4935_v61 }
 0x34a   : > { %v4496_v7 = vpop.f32.mrf.mxu1 }
 0x34c   : > { %v1679_v8 = vpop.f32.mrf.mxu1 }
 0x34e   : > { %v4497_v9 = vpop.f32.mrf.mxu1 }
 0x34f   : > { %v1913_v12 = vpack.c.bf16 %v4497_v9, %v4496_v7  ;;  %v4947_v7 = vld [vmem:[%s6260_s6 + $0x20] sm:$0xff]   ;;  %v4949_v9 = vld [vmem:[%s6260_s6 + $0x10] sm:$0xff]  }
 0x350   : > { %v1682_v10 = vpop.f32.mrf.mxu1 }
 0x351   : > { %v1912_v11 = vpack.c.bf16 %v1682_v10, %v1679_v8  ;;  %v4948_v8 = vld [vmem:[%s6260_s6 + $0x18] sm:$0xff]   ;;  %v4950_v10 = vld [vmem:[%s6260_s6 + $0x8] sm:$0xff]  }
 0x352   : > { %v4500_v13 = vpop.f32.mrf.mxu1 }
 0x353   : > { %4564 = vmatprep.mubr.bf16.mxu1 %v1912_v11  ;;  %v4951_v11 = vld [vmem:[%s6260_s6] sm:$0xff]   ;;  %s6762_s6 = scalar_lea.vmem [#allocation7], %s6183_s2 }
 0x354   : > { %v1695_v14 = vpop.f32.mrf.mxu1  ;;  %4565 = vmatmul.mubr.bf16.vlgmr.msra.gmra.mxu1 %v1913_v12  ;;  %v4952_v12 = vld [vmem:[%s6192_s18 + $0x38] sm:$0xff]  }
 0x355   : > { %4596 = vmatprep.subr.bf16.mxu1 %v4952_v12 }
 0x356   : > { %v4501_v15 = vpop.f32.mrf.mxu1  ;;  %4597 = vmatpush3.bf16.msra.mxu1 %v4952_v12  ;;  %v4958_v12 = vld [vmem:[%s6192_s18 + $0x8] sm:$0xff]  }
 0x357   : > { %v1915_v18 = vpack.c.bf16 %v4501_v15, %v4500_v13  ;;  %v4953_v13 = vld [vmem:[%s6192_s18 + $0x30] sm:$0xff]   ;;  %v4955_v15 = vld [vmem:[%s6192_s18 + $0x20] sm:$0xff]  }
 0x358   : > { %v1698_v16 = vpop.f32.mrf.mxu1  ;;  %4598 = vmatprep.subr.bf16.mxu1 %v4953_v13 }
 0x359   : > { %v1914_v17 = vpack.c.bf16 %v1698_v16, %v1695_v14  ;;  %v4954_v14 = vld [vmem:[%s6192_s18 + $0x28] sm:$0xff]   ;;  %v4956_v16 = vld [vmem:[%s6192_s18 + $0x18] sm:$0xff]  }
 0x35a   : > { %v4506_v19 = vpop.f32.mrf.mxu1  ;;  %4599 = vmatpush3.bf16.msra.mxu1 %v4953_v13  ;;  %v4959_v13 = vld [vmem:[%s6192_s18] sm:$0xff]  }
 0x35b   : > { %4568 = vmatprep.mubr.bf16.mxu1 %v1914_v17  ;;  %4600 = vmatprep.subr.bf16.mxu1 %v4954_v14 }
 0x35c   : > { %v1881_v20 = vpop.f32.mrf.mxu1  ;;  %4569 = vmatmul.mubr.bf16.gmra.mxu1 %v1915_v18 }
 0x35e   : > { %v4507_v21 = vpop.f32.mrf.mxu1  ;;  %4601 = vmatpush3.bf16.msra.mxu1 %v4954_v14 }
 0x35f   : > { %4602 = vmatprep.subr.bf16.mxu1 %v4955_v15 }
 0x360   : > { %v1884_v22 = vpop.f32.mrf.mxu1 }
 0x362   : > { %v4510_v23 = vpop.f32.mrf.mxu1  ;;  %4603 = vmatpush3.bf16.msra.mxu1 %v4955_v15 }
 0x363   : > { %4604 = vmatprep.subr.bf16.mxu1 %v4956_v16 }
 0x364   : > { %v1897_v25 = vpop.f32.mrf.mxu1 }
 0x366   : > { %v4511_v26 = vpop.f32.mrf.mxu1  ;;  %4605 = vmatpush3.bf16.msra.mxu1 %v4956_v16  ;;  %v4232_v16 = vld [vmem:[%s6762_s6] ss:$0 sm:$0xff] }
 0x368   : > { %v1900_v27 = vpop.f32.mrf.mxu1 }
 0x36a   : > { %v4518_v29 = vpop.f32.mrf.mxu1 }
 0x36b   : > { %v1987_v38 = vadd.f32 %v4518_v29, %v6403_v34  ;;  %v4231_v29 = vld [vmem:[%s1514_s14] ss:$0 sm:$0xff]  ;;  %s6767_s14 = sld [smem:[#allocation45_spill]] }
 0x36c   : > { %v1978_v30 = vpop.f32.mrf.mxu1 }
 0x36d   : > { %v1979_v36 = vadd.f32 %v1978_v30, %v6399_v32  ;;  %v2011_v44 = vadd.f32 %v4506_v19, %v1987_v38 }
 0x36e   : > { %v4519_v24 = vpop.f32.mrf.mxu1 }
 0x36f   : > { %v1990_v37 = vadd.f32 %v4519_v24, %v6401_v33  ;;  %v2009_v42 = vadd.f32 %v1979_v36, %v1881_v20 }
 0x370   : > { %v1981_v39 = vpop.f32.mrf.mxu1 }
 0x371   : > { %v1982_v28 = vadd.f32 %v1981_v39, %v6405_v35  ;;  %v2012_v40 = vadd.f32 %v4507_v21, %v1990_v37 }
 0x372   : > { %v4522_v41 = vpop.f32.mrf.mxu1 }
 0x373   : > { %v2010_v43 = vadd.f32 %v1982_v28, %v1884_v22  ;;  %v2018_v54 = vpack.c.bf16 %v2012_v40, %v2011_v44  ;;  %v2003_v58 = vadd.f32 %v4522_v41, %v6415_v48 }
 0x374   : > { %v1994_v45 = vpop.f32.mrf.mxu1 }
 0x375   : > { %v2017_v49 = vpack.c.bf16 %v2010_v43, %v2009_v42  ;;  %v1995_v55 = vadd.f32 %v1994_v45, %v6411_v46  ;;  %v2015_v0 = vadd.f32 %v4510_v23, %v2003_v58 }
 0x376   : > { %v4523_v52 = vpop.f32.mrf.mxu1 }
 0x377   : > { %v2006_v57 = vadd.f32 %v4523_v52, %v6413_v47  ;;  %4540 = vmatprep.mubr.bf16.mxu0 %v2017_v49  ;;  %v2013_v62 = vadd.f32 %v1995_v55, %v1897_v25 }
 0x378   : > { %v1997_v59 = vpop.f32.mrf.mxu1  ;;  %4541 = vmatmul.mubr.bf16.vlgmr.msra.gmra.mxu0 %v2018_v54 }
 0x379   : > { %v1998_v60 = vadd.f32 %v1997_v59, %v6417_v53  ;;  %v2016_v61 = vadd.f32 %v4511_v26, %v2006_v57  ;;  %4573 = vmatpush3.bf16.msra.mxu0 %v4944_v4 }
 0x37a   : > { %4574 = vmatprep.subr.bf16.mxu0 %v4945_v5 }
 0x37b   : > { %v2014_v63 = vadd.f32 %v1998_v60, %v1900_v27  ;;  %v2020_v3 = vpack.c.bf16 %v2016_v61, %v2015_v0 }
 0x37d   : > { %v2019_v2 = vpack.c.bf16 %v2014_v63, %v2013_v62  ;;  %4575 = vmatpush3.bf16.msra.mxu0 %v4945_v5 }
 0x37e   : > { %4576 = vmatprep.subr.bf16.mxu0 %v4946_v6 }
 0x37f   : > { %4544 = vmatprep.mubr.bf16.mxu0 %v2019_v2 }
 0x380   : > { %4545 = vmatmul.mubr.bf16.gmra.mxu0 %v2020_v3 }
 0x381   : > { %4577 = vmatpush3.bf16.msra.mxu0 %v4946_v6 }
 0x382   : > { %4578 = vmatprep.subr.bf16.mxu0 %v4947_v7 }
 0x385   : > { %4579 = vmatpush3.bf16.msra.mxu0 %v4947_v7 }
 0x386   : > { %4580 = vmatprep.subr.bf16.mxu0 %v4948_v8 }
 0x389   : > { %4581 = vmatpush3.bf16.msra.mxu0 %v4948_v8 }
 0x38a   : > { %4582 = vmatprep.subr.bf16.mxu0 %v4949_v9 }
 0x38d   : > { %4583 = vmatpush3.bf16.msra.mxu0 %v4949_v9 }
 0x38e   : > { %4584 = vmatprep.subr.bf16.mxu0 %v4950_v10 }
 0x391   : > { %4585 = vmatpush3.bf16.msra.mxu0 %v4950_v10 }
 0x392   : > { %4586 = vmatprep.subr.bf16.mxu0 %v4951_v11 }
 0x395   : > { %4587 = vmatpush3.bf16.msra.mxu0 %v4951_v11  ;;  %v4957_v11 = vld [vmem:[%s6192_s18 + $0x10] sm:$0xff]   ;;  %s6763_s18 = sld [smem:[#allocation42_spill]] }
 0x396   : > { %4606 = vmatprep.subr.bf16.mxu1 %v4957_v11 }
 0x397   : > { %4607 = vmatpush3.bf16.msra.mxu1 %v4957_v11 }
 0x398   : > { %4608 = vmatprep.subr.bf16.mxu1 %v4958_v12 }
 0x39b   : > { %4609 = vmatpush3.bf16.msra.mxu1 %v4958_v12 }
 0x39c   : > { %4610 = vmatprep.subr.bf16.mxu1 %v4959_v13 }
 0x39f   : > { %4611 = vmatpush3.bf16.msra.mxu1 %v4959_v13 }
 0x414   : > { %v4566_v17 = vpop.f32.mrf.mxu1 }
 0x416   : > { %v2232_v18 = vpop.f32.mrf.mxu1 }
 0x418   : > { %v4567_v19 = vpop.f32.mrf.mxu1 }
 0x41a   : > { %v2235_v20 = vpop.f32.mrf.mxu1 }
 0x41c   : > { %v4570_v22 = vpop.f32.mrf.mxu1 }
 0x41e   : > { %v2248_v24 = vpop.f32.mrf.mxu1 }
 0x420   : > { %v4571_v42 = vpop.f32.mrf.mxu1 }
 0x422   : > { %v2251_v60 = vpop.f32.mrf.mxu1 }
 0x438   : > { %v4542_v21 = vpop.f32.mrf.mxu0 }
 0x439   : > { %v2241_v26 = vadd.f32 %v4566_v17, %v4542_v21 }
 0x43a   : > { %v2119_v23 = vpop.f32.mrf.mxu0 }
 0x43b   : > { %v2233_v25 = vadd.f32 %v2232_v18, %v2119_v23  ;;  %v2272_v28 = vadd.f32 %v4231_v29, %v2241_v26 }
 0x43c   : > { %v4543_v27 = vpop.f32.mrf.mxu0 }
 0x43d   : > { %v2244_v30 = vadd.f32 %v4567_v19, %v4543_v27  ;;  %v2270_v37 = vadd.f32 %v4231_v29, %v2233_v25  ;;  %v2280_v54 = vmax.f32 %v2272_v28, 0.0 }
 0x43e   : > { %v2122_v36 = vpop.f32.mrf.mxu0 }
 0x43f   : > { %v2273_v38 = vadd.f32 %v4231_v29, %v2244_v30  ;;  %v2236_v39 = vadd.f32 %v2235_v20, %v2122_v36  ;;  %v2278_v45 = vmax.f32 %v2270_v37, 0.0 }
 0x440   : > { %v4546_v40 = vpop.f32.mrf.mxu0 }
 0x441   : > { %v2271_v41 = vadd.f32 %v4231_v29, %v2236_v39  ;;  %v2281_v43 = vmax.f32 %v2273_v38, 0.0  ;;  %v2257_v55 = vadd.f32 %v4570_v22, %v4546_v40 }
 0x442   : > { %v2135_v44 = vpop.f32.mrf.mxu0 }
 0x443   : > { %v2279_v49 = vmax.f32 %v2271_v41, 0.0  ;;  %v2249_v52 = vadd.f32 %v2248_v24, %v2135_v44  ;;  %v2287_v61 = vpack.c.bf16 %v2281_v43, %v2280_v54  ;;  %v2276_v3 = vadd.f32 %v4231_v29, %v2257_v55 }
 0x444   : > { %v4547_v57 = vpop.f32.mrf.mxu0  ;;  %v6445_v54 = vshrl.u32 %v1578_v50, 7  ;;  %v4960_v50 = vld [vmem:[%s6200_s13 + $0x38] sm:$0xff]  }
 0x445   : > { %v2260_v58 = vadd.f32 %v4571_v42, %v4547_v57  ;;  %v2286_v59 = vpack.c.bf16 %v2279_v49, %v2278_v45  ;;  %v2274_v63 = vadd.f32 %v4231_v29, %v2249_v52  ;;  %v2284_v8 = vmax.f32 %v2276_v3, 0.0  ;;  %v6449_v57 = vld [vmem:[%s6763_s18] ss:$0 sm:$0xff]  ;;  %4638 = vmatprep.subr.bf16.mxu1 %v4960_v50 }
 0x446   : > { %v2138_v62 = vpop.f32.mrf.mxu0  ;;  %v2592_v55 = vadd.s32 8, %v6445_v54  ;;  %vm2600_vm14 = vcmp.eq.s32.totalorder %v6445_v54, %v6449_v57 }
 0x447   : > { %v2277_v0 = vadd.f32 %v4231_v29, %v2260_v58  ;;  %v2252_v2 = vadd.f32 %v2251_v60, %v2138_v62  ;;  %4588 = vmatprep.mubr.bf16.mxu0 %v2286_v59  ;;  %v2282_v6 = vmax.f32 %v2274_v63, 0.0  ;;  %v4251_v58 = vsel %vm2600_vm14, 1.0, %v5585_v56  ;;  %v4962_v62 = vld [vmem:[%s6200_s13 + $0x28] sm:$0xff]   ;;  %v4241_v63 = vld [vmem:[%s6764_s17] ss:$0 sm:$0xff] }
 0x448   : > { %4589 = vmatmul.mubr.bf16.vlgmr.msra.gmra.mxu0 %v2287_v61  ;;  %vm2601_vm15 = vcmp.eq.s32.totalorder %v2592_v55, %v6449_v57  ;;  %v4961_v61 = vld [vmem:[%s6200_s13 + $0x30] sm:$0xff]  }
 0x449   : > { %v2275_v4 = vadd.f32 %v4231_v29, %v2252_v2  ;;  %v2285_v5 = vmax.f32 %v2277_v0, 0.0  ;;  %v4252_v59 = vsel %vm2601_vm15, 1.0, %v5585_v56 }
 0x44a   : > { %v2612_v60 = vpack.c.bf16 %v4252_v59, %v4251_v58 }
 0x44b   : > { %v2283_v7 = vmax.f32 %v2275_v4, 0.0  ;;  %v2289_v10 = vpack.c.bf16 %v2285_v5, %v2284_v8 }
 0x44d   : > { %v2288_v9 = vpack.c.bf16 %v2283_v7, %v2282_v6 }
 0x44f   : > { %4592 = vmatprep.mubr.bf16.mxu0 %v2288_v9 }
 0x450   : > { %4593 = vmatmul.mubr.bf16.gmra.mxu0 %v2289_v10 }
 0x451   : > { %4628 = vmatprep.mubr.msk.bf16.mxu0 %vm2618_vm1, %v2612_v60 }
 0x508   : > { %v4590_v14 = vpop.f32.mrf.mxu0 }
 0x509   : > { %v2404_v20 = vadd.f32 %v4590_v14, %v4232_v16 }
 0x50a   : > { %v2395_v15 = vpop.f32.mrf.mxu0 }
 0x50b   : > { %v2396_v18 = vadd.f32 %v4232_v16, %v2395_v15  ;;  %v2428_v29 = vmax.f32 %v2404_v20, 0.0 }
 0x50c   : > { %v4591_v17 = vpop.f32.mrf.mxu0 }
 0x50d   : > { %v2407_v19 = vadd.f32 %v4591_v17, %v4232_v16  ;;  %v2426_v26 = vmax.f32 %v2396_v18, 0.0 }
 0x50e   : > { %v2398_v21 = vpop.f32.mrf.mxu0 }
 0x50f   : > { %v2399_v22 = vadd.f32 %v4232_v16, %v2398_v21  ;;  %v2429_v23 = vmax.f32 %v2407_v19, 0.0 }
 0x510   : > { %v4594_v25 = vpop.f32.mrf.mxu0 }
 0x511   : > { %v2427_v27 = vmax.f32 %v2399_v22, 0.0  ;;  %v2435_v36 = vpack.c.bf16 %v2429_v23, %v2428_v29  ;;  %v2420_v28 = vadd.f32 %v4594_v25, %v4232_v16  ;;  %v2594_v23 = vadd.s32 24, %v6445_v54  ;;  %v2683_v25 = vpop.permute.xlu1 %2682 }
 0x512   : > { %v2411_v30 = vpop.f32.mrf.mxu0  ;;  %vm2691_vm4 = vcmp.eq.s32.totalorder %v2683_v25, %v6312_v51 }
 0x513   : > { %v2434_v24 = vpack.c.bf16 %v2427_v27, %v2426_v26  ;;  %v2412_v38 = vadd.f32 %v4232_v16, %v2411_v30  ;;  %v2432_v45 = vmax.f32 %v2420_v28, 0.0  ;;  %v2680_v26 = vpop.permute.xlu0 %2679  ;;  %vm2603_vm3 = vcmp.eq.s32.totalorder %v2594_v23, %v6449_v57 }
 0x514   : > { %v4595_v37 = vpop.f32.mrf.mxu0  ;;  %vm2690_vm6 = vcmp.eq.s32.totalorder %v2680_v26, %v6312_v51  ;;  %v4254_v27 = vsel %vm2603_vm3, 1.0, %v5585_v56  ;;  %v4258_v29 = vsel %vm2691_vm4, 1.0, %v5585_v56 }
 0x515   : > { %v2423_v39 = vadd.f32 %v4595_v37, %v4232_v16  ;;  %4612 = vmatprep.mubr.bf16.mxu1 %v2434_v24  ;;  %v2430_v43 = vmax.f32 %v2412_v38, 0.0  ;;  %v4257_v30 = vsel %vm2690_vm6, 1.0, %v5585_v56 }
 0x516   : > { %v2414_v40 = vpop.f32.mrf.mxu0  ;;  %4613 = vmatmul.mubr.bf16.vlgmr.msra.gmra.mxu1 %v2435_v36  ;;  %v2689_v36 = vpop.permute.xlu1 %2688  ;;  %v2702_v38 = vpack.c.bf16 %v4258_v29, %v4257_v30 }
 0x517   : > { %v2415_v41 = vadd.f32 %v4232_v16, %v2414_v40  ;;  %v2433_v42 = vmax.f32 %v2423_v39, 0.0  ;;  %4639 = vmatpush3.bf16.msra.mxu1 %v4960_v50  ;;  %v2686_v37 = vpop.permute.xlu0 %2685  ;;  %vm2693_vm7 = vcmp.eq.s32.totalorder %v2689_v36, %v6312_v51 }
 0x518   : > { %4640 = vmatprep.subr.bf16.mxu1 %v4961_v61  ;;  %vm2692_vm8 = vcmp.eq.s32.totalorder %v2686_v37, %v6312_v51  ;;  %v4260_v39 = vsel %vm2693_vm7, 1.0, %v5585_v56  ;;  %v4964_v51 = vld [vmem:[%s6200_s13 + $0x18] sm:$0xff]  }
 0x519   : > { %v2431_v44 = vmax.f32 %v2415_v41, 0.0  ;;  %v2437_v52 = vpack.c.bf16 %v2433_v42, %v2432_v45  ;;  %v4259_v28 = vsel %vm2692_vm8, 1.0, %v5585_v56  ;;  %v4966_v41 = vld [vmem:[%s6200_s13 + $0x8] sm:$0xff]   ;;  %v4967_v42 = vld [vmem:[%s6200_s13] sm:$0xff]   ;;  %v4981_v37 = vld [vmem:[%s6216_s1 + $0x10] sm:$0xff]  }
 0x51a   : > { %v2703_v40 = vpack.c.bf16 %v4260_v39, %v4259_v28  ;;  %v4970_v45 = vld [vmem:[%s6208_s3 + $0x28] sm:$0xff]  }
 0x51b   : > { %v2436_v49 = vpack.c.bf16 %v2431_v44, %v2430_v43  ;;  %4641 = vmatpush3.bf16.msra.mxu1 %v4961_v61  ;;  %v4968_v43 = vld [vmem:[%s6208_s3 + $0x38] sm:$0xff]   ;;  %v4969_v44 = vld [vmem:[%s6208_s3 + $0x30] sm:$0xff]   ;;  %v4983_v39 = vld [vmem:[%s6216_s1] sm:$0xff]  }
 0x51c   : > { %4642 = vmatprep.subr.bf16.mxu1 %v4962_v62 }
 0x51d   : > { %4616 = vmatprep.mubr.bf16.mxu1 %v2436_v49  ;;  %v4971_v49 = vld [vmem:[%s6208_s3 + $0x20] sm:$0xff]  }
 0x51e   : > { %4617 = vmatmul.mubr.bf16.gmra.mxu1 %v2437_v52  ;;  %v4972_v52 = vld [vmem:[%s6208_s3 + $0x18] sm:$0xff]  }
 0x51f   : > { %4643 = vmatpush3.bf16.msra.mxu1 %v4962_v62 }
 0x5d6   : > { %v4614_v0 = vpop.f32.mrf.mxu1 }
 0x5d7   : > { %v2552_v2 = vadd.f32 %v4614_v0, %v4241_v63 }
 0x5d8   : > { %v2543_v3 = vpop.f32.mrf.mxu1 }
 0x5d9   : > { %v2576_v4 = vadd.f32 %v2552_v2, %v6403_v34  ;;  %v2544_v5 = vadd.f32 %v4241_v63, %v2543_v3  ;;  %v6516_v3 = vld [vmem:[#allocation2 + $0x10] sm:$0xff] }
 0x5da   : > { %v4615_v6 = vpop.f32.mrf.mxu1 }
 0x5db   : > { %2584 = vst [vmem:[#allocation3 + $0x8] sm:$0xff] %v2576_v4  ;;  %v2574_v7 = vadd.f32 %v2544_v5, %v6399_v32  ;;  %v2555_v8 = vadd.f32 %v4615_v6, %v4241_v63 }
 0x5dc   : > { %v2546_v9 = vpop.f32.mrf.mxu1 }
 0x5dd   : > { %2582 = vst [vmem:[#allocation3] sm:$0xff] %v2574_v7  ;;  %v2577_v10 = vadd.f32 %v2555_v8, %v6401_v33  ;;  %v2547_v11 = vadd.f32 %v4241_v63, %v2546_v9  ;;  %v6524_v7 = vld [vmem:[#allocation2 + $0x18] sm:$0xff] }
 0x5de   : > { %v4618_v12 = vpop.f32.mrf.mxu1 }
 0x5df   : > { %2585 = vst [vmem:[#allocation3 + $0x18] sm:$0xff] %v2577_v10  ;;  %v2575_v13 = vadd.f32 %v2547_v11, %v6405_v35  ;;  %v2568_v14 = vadd.f32 %v4618_v12, %v4241_v63 }
 0x5e0   : > { %v2559_v15 = vpop.f32.mrf.mxu1 }
 0x5e1   : > { %2583 = vst [vmem:[#allocation3 + $0x38] sm:$0xff] %v2575_v13  ;;  %v2580_v34 = vadd.f32 %v2568_v14, %v6415_v48  ;;  %v2560_v16 = vadd.f32 %v4241_v63, %v2559_v15  ;;  %v2593_v48 = vadd.s32 16, %v6445_v54 }
 0x5e2   : > { %v4619_v17 = vpop.f32.mrf.mxu1 }
 0x5e3   : > { %2588 = vst [vmem:[#allocation3 + $0x30] sm:$0xff] %v2580_v34  ;;  %v2578_v32 = vadd.f32 %v2560_v16, %v6411_v46  ;;  %v2571_v18 = vadd.f32 %v4619_v17, %v4241_v63  ;;  %v2615_v46 = vpack.c.bf16 %v2555_v8, %v2552_v2  ;;  %vm2602_vm2 = vcmp.eq.s32.totalorder %v2593_v48, %v6449_v57  ;;  %v4973_v34 = vld [vmem:[%s6208_s3 + $0x10] sm:$0xff]   ;;  %v4975_v17 = vld [vmem:[%s6208_s3] sm:$0xff]  }
 0x5e4   : > { %v2562_v19 = vpop.f32.mrf.mxu1 }
 0x5e5   : > { %2586 = vst [vmem:[#allocation3 + $0x20] sm:$0xff] %v2578_v32  ;;  %v2581_v33 = vadd.f32 %v2571_v18, %v6413_v47  ;;  %v2617_v20 = vpack.c.bf16 %v2571_v18, %v2568_v14  ;;  %v2563_v21 = vadd.f32 %v4241_v63, %v2562_v19  ;;  %v2614_v47 = vpack.c.bf16 %v2547_v11, %v2544_v5  ;;  %v6512_v63 = vld [vmem:[#allocation2 + $0x8] sm:$0xff]  ;;  %v6520_v5 = vld [vmem:[#allocation2] sm:$0xff]  ;;  %v4978_v19 = vld [vmem:[%s6216_s1 + $0x28] sm:$0xff]  }
 0x5e6   : > { %v4976_v32 = vld [vmem:[%s6216_s1 + $0x38] sm:$0xff]   ;;  %v4977_v18 = vld [vmem:[%s6216_s1 + $0x30] sm:$0xff]  }
 0x5e7   : > { %2589 = vst [vmem:[#allocation3 + $0x28] sm:$0xff] %v2581_v33  ;;  %v2579_v35 = vadd.f32 %v2563_v21, %v6417_v53  ;;  %v2616_v22 = vpack.c.bf16 %v2563_v21, %v2560_v16  ;;  %4620 = vmatprep.subr.bf16.mxu0 %v2617_v20  ;;  %v4253_v53 = vsel %vm2602_vm2, 1.0, %v5585_v56  ;;  %v4974_v16 = vld [vmem:[%s6208_s3 + $0x8] sm:$0xff]   ;;  %s6766_s3 = scalar_lea.vmem [#allocation16], %s6183_s2 }
 0x5e8   : > { %4621 = vmatpush3.bf16.msra.mxu0 %v2617_v20  ;;  %v2613_v24 = vpack.c.bf16 %v4254_v27, %v4253_v53  ;;  %v4979_v33 = vld [vmem:[%s6216_s1 + $0x20] sm:$0xff]   ;;  %v4980_v20 = vld [vmem:[%s6216_s1 + $0x18] sm:$0xff]  }
 0x5e9   : > { %2587 = vst [vmem:[#allocation3 + $0x10] sm:$0xff] %v2579_v35  ;;  %4622 = vmatprep.subr.bf16.mxu0 %v2616_v22 }
 0x5ec   : > { %4623 = vmatpush3.bf16.msra.mxu0 %v2616_v22 }
 0x5ed   : > { %4624 = vmatprep.subr.bf16.mxu0 %v2615_v46 }
 0x5f0   : > { %4625 = vmatpush3.bf16.msra.mxu0 %v2615_v46 }
 0x5f1   : > { %4626 = vmatprep.subr.bf16.mxu0 %v2614_v47 }
 0x5f4   : > { %4627 = vmatpush3.bf16.msra.mxu0 %v2614_v47 }
 0x5f5   : > { %4795 = vmatprep.subr.msk.bf16.mxu0 %vm1843_vm0, %v6288_v31  ;;  %v4963_v31 = vld [vmem:[%s6200_s13 + $0x20] sm:$0xff]  }
 0x5f6   : > { %4644 = vmatprep.subr.bf16.mxu1 %v4963_v31 }
 0x5f7   : > { %4629 = vmatmul.mubr.msk.bf16.vlgmr.msra.gmra.mxu0 %vm2618_vm1, %v2613_v24  ;;  %4645 = vmatpush3.bf16.msra.mxu1 %v4963_v31  ;;  %v4272_v31 = vld [vmem:[%s6766_s3] ss:$0 sm:$0xff] }
 0x5f8   : > { %4633 = vmatpush3.bf16.msra.mxu0 %v6324_v1  ;;  %4634 = vmatprep.mubr.msk.bf16.mxu0 %vm1830_vm12, %v2702_v38  ;;  %v4965_v1 = vld [vmem:[%s6200_s13 + $0x10] sm:$0xff]   ;;  %s6765_s13 = scalar_lea.vmem [#allocation13], %s6183_s2 }
 0x5f9   : > { %4646 = vmatprep.subr.bf16.mxu1 %v4964_v51  ;;  %4658 = vmatprep.subr.bf16.mxu0 %v4968_v43  ;;  %v4263_v22 = vld [vmem:[%s6765_s13] ss:$0 sm:$0xff]  ;;  %v4982_v38 = vld [vmem:[%s6216_s1 + $0x8] sm:$0xff]   ;;  %s6771_s1 = scalar_lea.vmem [#allocation27], %s6183_s2 }
 0x5fb   : > { %4647 = vmatpush3.bf16.msra.mxu1 %v4964_v51 }
 0x5fc   : > { %4648 = vmatprep.subr.bf16.mxu1 %v4965_v1 }
 0x5ff   : > { %4635 = vmatmul.mubr.msk.bf16.vlgmr.msra.gmra.mxu0 %vm1830_vm12, %v2703_v40  ;;  %4649 = vmatpush3.bf16.msra.mxu1 %v4965_v1  ;;  %vm5586_vm12 = vmmov 0  }
 0x600   : > { %4650 = vmatprep.subr.bf16.mxu1 %v4966_v41  ;;  %4659 = vmatpush3.bf16.msra.mxu0 %v4968_v43 }
 0x601   : > { %4660 = vmatprep.subr.bf16.mxu0 %v4969_v44 }
 0x603   : > { %4651 = vmatpush3.bf16.msra.mxu1 %v4966_v41 }
 0x604   : > { %4652 = vmatprep.subr.bf16.mxu1 %v4967_v42  ;;  %4661 = vmatpush3.bf16.msra.mxu0 %v4969_v44 }
 0x605   : > { %4662 = vmatprep.subr.bf16.mxu0 %v4970_v45 }
 0x607   : > { %4653 = vmatpush3.bf16.msra.mxu1 %v4967_v42 }
 0x608   : > { %4663 = vmatpush3.bf16.msra.mxu0 %v4970_v45  ;;  %4678 = vmatprep.subr.bf16.mxu1 %v4976_v32 }
 0x609   : > { %4664 = vmatprep.subr.bf16.mxu0 %v4971_v49 }
 0x60c   : > { %4665 = vmatpush3.bf16.msra.mxu0 %v4971_v49 }
 0x60d   : > { %4666 = vmatprep.subr.bf16.mxu0 %v4972_v52 }
 0x610   : > { %4667 = vmatpush3.bf16.msra.mxu0 %v4972_v52 }
 0x611   : > { %4668 = vmatprep.subr.bf16.mxu0 %v4973_v34 }
 0x614   : > { %4669 = vmatpush3.bf16.msra.mxu0 %v4973_v34  ;;  %v4988_v34 = vld [vmem:[%s6219_s8 + $0x18] sm:$0xff]  }
 0x615   : > { %4670 = vmatprep.subr.bf16.mxu0 %v4974_v16 }
 0x618   : > { %4671 = vmatpush3.bf16.msra.mxu0 %v4974_v16  ;;  %v4989_v16 = vld [vmem:[%s6219_s8 + $0x10] sm:$0xff]  }
 0x619   : > { %4672 = vmatprep.subr.bf16.mxu0 %v4975_v17 }
 0x61c   : > { %4673 = vmatpush3.bf16.msra.mxu0 %v4975_v17 }
 0x61d   : > { %4698 = vmatprep.subr.bf16.mxu0 %v5585_v56 }
 0x6b7   : > { %v6500_v55 = vpop.f32.mrf.mxu0 }
 0x6b8   : > { %v2761_v8 = vadd.f32 %v6524_v7, %v6500_v55 }
 0x6b9   : > { %v6502_v57 = vpop.f32.mrf.mxu0 }
 0x6ba   : > { %v2759_v4 = vadd.f32 %v6516_v3, %v6502_v57 }
 0x6bb   : > { %v6504_v58 = vpop.f32.mrf.mxu0 }
 0x6bc   : > { %v3161_v59 = vpack.c.bf16 %v6504_v58, %v6500_v55  ;;  %v2762_v0 = vadd.f32 %v6512_v63, %v6504_v58 }
 0x6bd   : > { %v6508_v60 = vpop.f32.mrf.mxu0 }
 0x6be   : > { %v3160_v50 = vpack.c.bf16 %v6508_v60, %v6502_v57  ;;  %v2760_v6 = vadd.f32 %v6520_v5, %v6508_v60 }
 0x6bf   : > { %v4636_v61 = vpop.f32.mrf.mxu0 }
 0x6c0   : > { %v2765_v13 = vadd.f32 %v4636_v61, %v2761_v8  ;;  %v4281_v61 = vld [vmem:[%s1522_s5] ss:$0 sm:$0xff]  ;;  %s6769_s5 = scalar_lea.vmem [#allocation21], %s6183_s2 }
 0x6c1   : > { %v2744_v62 = vpop.f32.mrf.mxu0 }
 0x6c2   : > { %v2763_v11 = vadd.f32 %v2759_v4, %v2744_v62 }
 0x6c3   : > { %v4637_v2 = vpop.f32.mrf.mxu0 }
 0x6c4   : > { %v2766_v9 = vadd.f32 %v4637_v2, %v2762_v0 }
 0x6c5   : > { %v2747_v10 = vpop.f32.mrf.mxu0 }
 0x6c6   : > { %v2764_v12 = vadd.f32 %v2760_v6, %v2747_v10  ;;  %v2768_v15 = vpack.c.bf16 %v2766_v9, %v2765_v13 }
 0x6c8   : > { %v2767_v14 = vpack.c.bf16 %v2764_v12, %v2763_v11 }
 0x6ca   : > { %4654 = vmatprep.mubr.bf16.mxu1 %v2767_v14  ;;  %v4984_v14 = vld [vmem:[%s6219_s8 + $0x38] sm:$0xff]  }
 0x6cb   : > { %4655 = vmatmul.mubr.bf16.vlgmr.msra.gmra.mxu1 %v2768_v15  ;;  %v4987_v15 = vld [vmem:[%s6219_s8 + $0x20] sm:$0xff]  }
 0x6cc   : > { %4679 = vmatpush3.bf16.msra.mxu1 %v4976_v32 }
 0x6cd   : > { %4680 = vmatprep.subr.bf16.mxu1 %v4977_v18 }
 0x6d0   : > { %4681 = vmatpush3.bf16.msra.mxu1 %v4977_v18 }
 0x6d1   : > { %4682 = vmatprep.subr.bf16.mxu1 %v4978_v19 }
 0x6d4   : > { %4683 = vmatpush3.bf16.msra.mxu1 %v4978_v19 }
 0x6d5   : > { %4684 = vmatprep.subr.bf16.mxu1 %v4979_v33 }
 0x6d8   : > { %4685 = vmatpush3.bf16.msra.mxu1 %v4979_v33  ;;  %v4990_v33 = vld [vmem:[%s6219_s8 + $0x8] sm:$0xff]  }
 0x6d9   : > { %4686 = vmatprep.subr.bf16.mxu1 %v4980_v20 }
 0x6dc   : > { %4687 = vmatpush3.bf16.msra.mxu1 %v4980_v20  ;;  %v4991_v20 = vld [vmem:[%s6219_s8] sm:$0xff]  }
 0x6dd   : > { %4688 = vmatprep.subr.bf16.mxu1 %v4981_v37 }
 0x6e0   : > { %4689 = vmatpush3.bf16.msra.mxu1 %v4981_v37  ;;  %v4999_v37 = vld [vmem:[%s6227_s7] sm:$0xff]  }
 0x6e1   : > { %4690 = vmatprep.subr.bf16.mxu1 %v4982_v38 }
 0x6e4   : > { %4691 = vmatpush3.bf16.msra.mxu1 %v4982_v38  ;;  %v5000_v38 = vld [vmem:[%s6235_s11 + $0x38] sm:$0xff]  }
 0x6e5   : > { %4692 = vmatprep.subr.bf16.mxu1 %v4983_v39 }
 0x6e8   : > { %4693 = vmatpush3.bf16.msra.mxu1 %v4983_v39  ;;  %v5001_v39 = vld [vmem:[%s6235_s11 + $0x30] sm:$0xff]  }
 0x6e9   : > { %4734 = vmatprep.subr.bf16.mxu1 %v5585_v56 }
 0x78b   : > { %v4656_v21 = vpop.f32.mrf.mxu1 }
 0x78c   : > { %v2883_v25 = vadd.f32 %v4656_v21, %v4263_v22  ;;  %v4992_v21 = vld [vmem:[%s6227_s7 + $0x38] sm:$0xff]  }
 0x78d   : > { %v2874_v35 = vpop.f32.mrf.mxu1 }
 0x78e   : > { %v2875_v23 = vadd.f32 %v4263_v22, %v2874_v35  ;;  %v2891_v30 = vmax.f32 %v2883_v25, 0.0  ;;  %v4993_v35 = vld [vmem:[%s6227_s7 + $0x30] sm:$0xff]  }
 0x78f   : > { %v4657_v48 = vpop.f32.mrf.mxu1 }
 0x790   : > { %v2886_v46 = vadd.f32 %v4657_v48, %v4263_v22  ;;  %v2889_v27 = vmax.f32 %v2875_v23, 0.0  ;;  %v4995_v48 = vld [vmem:[%s6227_s7 + $0x20] sm:$0xff]   ;;  %v4996_v23 = vld [vmem:[%s6227_s7 + $0x18] sm:$0xff]  }
 0x791   : > { %v2877_v26 = vpop.f32.mrf.mxu1 }
 0x792   : > { %v2878_v47 = vadd.f32 %v4263_v22, %v2877_v26  ;;  %v2892_v53 = vmax.f32 %v2886_v46, 0.0  ;;  %v4994_v22 = vld [vmem:[%s6227_s7 + $0x28] sm:$0xff]   ;;  %v4997_v46 = vld [vmem:[%s6227_s7 + $0x10] sm:$0xff]  }
 0x794   : > { %v2890_v29 = vmax.f32 %v2878_v47, 0.0  ;;  %v2894_v36 = vpack.c.bf16 %v2892_v53, %v2891_v30  ;;  %v5012_v53 = vld [vmem:[#allocation4] sm:$0xf] }
 0x796   : > { %v2893_v24 = vpack.c.bf16 %v2890_v29, %v2889_v27 }
 0x798   : > { %4674 = vmatprep.mubr.bf16.mxu0 %v2893_v24 }
 0x799   : > { %4675 = vmatmul.mubr.bf16.vlgmr.msra.gmra.mxu0 %v2894_v36  ;;  %v4998_v36 = vld [vmem:[%s6227_s7 + $0x8] sm:$0xff]  }
 0x79a   : > { %4699 = vmatpush3.bf16.msra.mxu0 %v3161_v59  ;;  %v4290_v59 = vld [vmem:[%s6767_s14] ss:$0 sm:$0xff]  ;;  %4702 = vmatprep.mubr.msk.bf16.mxu0 %vm5586_vm12, %v5585_v56 }
 0x79b   : > { %4700 = vmatprep.subr.bf16.mxu0 %v5585_v56  ;;  %vm3154_vm0 = vcmp.eq.s32.totalorder %v6445_v54, %v4290_v59 }
 0x79c   : > { %v4291_v60 = vsel %vm3154_vm0, 1.0, %v5585_v56 }
 0x79e   : > { %4701 = vmatpush3.bf16.msra.mxu0 %v3160_v50  ;;  %v3157_v50 = vpack.c.bf16 %v4291_v60, %v4291_v60 }
 0x79f   : > { %4706 = vmatprep.subr.bf16.mxu0 %v5585_v56 }
 0x7a1   : > { %4703 = vmatmul.mubr.msk.bf16.vlgmr.msra.gmra.mxu0 %vm1632_vm5, %v3157_v50 }
 0x7a2   : > { %4710 = vmatprep.mubr.msk.bf16.mxu0 %vm5586_vm12, %v5585_v56 }
 0x859   : > { %v4676_v28 = vpop.f32.mrf.mxu0 }
 0x85a   : > { %v3009_v42 = vadd.f32 %v4676_v28, %v4272_v31  ;;  %v5002_v28 = vld [vmem:[%s6235_s11 + $0x28] sm:$0xff]  }
 0x85b   : > { %v3000_v40 = vpop.f32.mrf.mxu0 }
 0x85c   : > { %v3001_v1 = vadd.f32 %v4272_v31, %v3000_v40  ;;  %v3017_v55 = vmax.f32 %v3009_v42, 0.0  ;;  %v5003_v40 = vld [vmem:[%s6235_s11 + $0x20] sm:$0xff]  }
 0x85d   : > { %v4677_v51 = vpop.f32.mrf.mxu0 }
 0x85e   : > { %v3012_v41 = vadd.f32 %v4677_v51, %v4272_v31  ;;  %v3015_v49 = vmax.f32 %v3001_v1, 0.0  ;;  %v5005_v51 = vld [vmem:[%s6235_s11 + $0x10] sm:$0xff]  }
 0x85f   : > { %v3003_v43 = vpop.f32.mrf.mxu0  ;;  %v4294_v1 = vld [vmem:[%s6769_s5] ss:$0 sm:$0xff] }
 0x860   : > { %v3004_v44 = vadd.f32 %v4272_v31, %v3003_v43  ;;  %v3018_v45 = vmax.f32 %v3012_v41, 0.0  ;;  %v5004_v31 = vld [vmem:[%s6235_s11 + $0x18] sm:$0xff]  }
 0x861   : > { %v3199_v17 = vpop.f32.mrf.mxu0 }
 0x862   : > { %v3016_v52 = vmax.f32 %v3004_v44, 0.0  ;;  %v3020_v58 = vpack.c.bf16 %v3018_v45, %v3017_v55  ;;  %v5006_v55 = vld [vmem:[%s6235_s11 + $0x8] sm:$0xff]  }
 0x863   : > { %v4704_v32 = vpop.f32.mrf.mxu0 }
 0x864   : > { %v3019_v57 = vpack.c.bf16 %v3016_v52, %v3015_v49 }
 0x865   : > { %v3202_v18 = vpop.f32.mrf.mxu0 }
 0x866   : > { %4694 = vmatprep.mubr.bf16.mxu1 %v3019_v57  ;;  %v5007_v57 = vld [vmem:[%s6235_s11] sm:$0xff]  }
 0x867   : > { %4695 = vmatmul.mubr.bf16.vlgmr.msra.gmra.mxu1 %v3020_v58  ;;  %v4705_v19 = vpop.f32.mrf.mxu0  ;;  %v4303_v58 = vld [vmem:[%s6770_s26] ss:$0 sm:$0xff] }
 0x868   : > { %4750 = vmatprep.mubr.msk.bf16.mxu1 %vm5586_vm12, %v5585_v56  ;;  %4735 = vmatpush3.bf16.msra.mxu1 %v4992_v21 }
 0x869   : > { %4736 = vmatprep.subr.bf16.mxu1 %v5585_v56 }
 0x86c   : > { %4737 = vmatpush3.bf16.msra.mxu1 %v4993_v35 }
 0x86d   : > { %4738 = vmatprep.subr.bf16.mxu1 %v5585_v56 }
 0x870   : > { %4739 = vmatpush3.bf16.msra.mxu1 %v4994_v22 }
 0x871   : > { %4740 = vmatprep.subr.bf16.mxu1 %v5585_v56 }
 0x874   : > { %4741 = vmatpush3.bf16.msra.mxu1 %v4995_v48 }
 0x875   : > { %4742 = vmatprep.subr.bf16.mxu1 %v5585_v56 }
 0x878   : > { %4743 = vmatpush3.bf16.msra.mxu1 %v4996_v23 }
 0x879   : > { %4744 = vmatprep.subr.bf16.mxu1 %v5585_v56 }
 0x87c   : > { %4745 = vmatpush3.bf16.msra.mxu1 %v4997_v46 }
 0x87d   : > { %4746 = vmatprep.subr.bf16.mxu1 %v5585_v56 }
 0x880   : > { %4747 = vmatpush3.bf16.msra.mxu1 %v4998_v36 }
 0x881   : > { %4748 = vmatprep.subr.bf16.mxu1 %v5585_v56 }
 0x884   : > { %4749 = vmatpush3.bf16.msra.mxu1 %v4999_v37 }
 0x927   : > { %v4696_v62 = vpop.f32.mrf.mxu1 }
 0x928   : > { %v3135_v0 = vadd.f32 %v4696_v62, %v4281_v61 }
 0x929   : > { %v3126_v54 = vpop.f32.mrf.mxu1 }
 0x92a   : > { %v6567_v2 = vadd.f32 %v6524_v7, %v3135_v0  ;;  %v3127_v4 = vadd.f32 %v4281_v61, %v3126_v54 }
 0x92b   : > { %v4697_v6 = vpop.f32.mrf.mxu1 }
 0x92c   : > { %3147 = vst [vmem:[#allocation2 + $0x18] sm:$0xff] %v6567_v2  ;;  %v6571_v8 = vadd.f32 %v6516_v3, %v3127_v4  ;;  %v3138_v9 = vadd.f32 %v4697_v6, %v4281_v61 }
 0x92d   : > { %v3129_v10 = vpop.f32.mrf.mxu1 }
 0x92e   : > { %3145 = vst [vmem:[#allocation2 + $0x10] sm:$0xff] %v6571_v8  ;;  %v6575_v11 = vadd.f32 %v6512_v63, %v3138_v9  ;;  %v3159_v12 = vpack.c.bf16 %v3138_v9, %v3135_v0  ;;  %v3130_v13 = vadd.f32 %v4281_v61, %v3129_v10  ;;  %v4985_v63 = vld [vmem:[%s6219_s8 + $0x30] sm:$0xff]  }
 0x930   : > { %3148 = vst [vmem:[#allocation2 + $0x8] sm:$0xff] %v6575_v11  ;;  %v6579_v7 = vadd.f32 %v6520_v5, %v3130_v13  ;;  %4707 = vmatpush3.bf16.msra.mxu0 %v3159_v12  ;;  %v3158_v3 = vpack.c.bf16 %v3130_v13, %v3127_v4  ;;  %v4986_v5 = vld [vmem:[%s6219_s8 + $0x28] sm:$0xff]   ;;  %v4312_v4 = vld [vmem:[%s6771_s1] ss:$0 sm:$0xff] }
 0x931   : > { %4708 = vmatprep.subr.bf16.mxu0 %v5585_v56 }
 0x932   : > { %3146 = vst [vmem:[#allocation2] sm:$0xff] %v6579_v7 }
 0x934   : > { %4709 = vmatpush3.bf16.msra.mxu0 %v3158_v3 }
 0x935   : > { %4714 = vmatprep.subr.bf16.mxu0 %v5585_v56 }
 0x937   : > { %4711 = vmatmul.mubr.msk.bf16.vlgmr.msra.gmra.mxu0 %vm1632_vm5, %v3157_v50 }
 0x938   : > { %4715 = vmatpush3.bf16.msra.mxu0 %v4984_v14  ;;  %4730 = vmatprep.mubr.msk.bf16.mxu0 %vm5586_vm12, %v5585_v56 }
 0x939   : > { %4716 = vmatprep.subr.bf16.mxu0 %v5585_v56 }
 0x93c   : > { %4717 = vmatpush3.bf16.msra.mxu0 %v4985_v63 }
 0x93d   : > { %4718 = vmatprep.subr.bf16.mxu0 %v5585_v56 }
 0x940   : > { %4719 = vmatpush3.bf16.msra.mxu0 %v4986_v5 }
 0x941   : > { %4720 = vmatprep.subr.bf16.mxu0 %v5585_v56 }
 0x944   : > { %4721 = vmatpush3.bf16.msra.mxu0 %v4987_v15 }
 0x945   : > { %4722 = vmatprep.subr.bf16.mxu0 %v5585_v56 }
 0x948   : > { %4723 = vmatpush3.bf16.msra.mxu0 %v4988_v34 }
 0x949   : > { %4724 = vmatprep.subr.bf16.mxu0 %v5585_v56 }
 0x94c   : > { %4725 = vmatpush3.bf16.msra.mxu0 %v4989_v16 }
 0x94d   : > { %4726 = vmatprep.subr.bf16.mxu0 %v5585_v56 }
 0x950   : > { %4727 = vmatpush3.bf16.msra.mxu0 %v4990_v33 }
 0x951   : > { %4728 = vmatprep.subr.bf16.mxu0 %v5585_v56 }
 0x954   : > { %4729 = vmatpush3.bf16.msra.mxu0 %v4991_v20 }
 0x955   : > { %4754 = vmatprep.subr.bf16.mxu0 %v5585_v56 }
 0x9f7   : > { %v3239_v25 = vpop.f32.mrf.mxu0 }
 0x9f8   : > { %v3240_v26 = vadd.f32 %v3239_v25, %v3199_v17 }
 0x9f9   : > { %v4712_v47 = vpop.f32.mrf.mxu0 }
 0x9fa   : > { %v3245_v27 = vadd.f32 %v5012_v53, %v3240_v26 }
 0x9fb   : > { %v3242_v29 = vpop.f32.mrf.mxu0 }
 0x9fc   : > { %v3246_v30 = vpack.c.bf16 %v3245_v27, %v3245_v27 }
 0x9fd   : > { %v4713_v24 = vpop.f32.mrf.mxu0 }
 0x9fe   : > { %4731 = vmatmul.mubr.bf16.vlgmr.msra.gmra.mxu0 %v3246_v30 }
 0x9ff   : > { %4770 = vmatprep.mubr.msk.bf16.mxu0 %vm5586_vm12, %v5585_v56  ;;  %4755 = vmatpush3.bf16.msra.mxu0 %v5000_v38 }
 0xa00   : > { %4756 = vmatprep.subr.bf16.mxu0 %v5585_v56 }
 0xa03   : > { %4757 = vmatpush3.bf16.msra.mxu0 %v5001_v39 }
 0xa04   : > { %4758 = vmatprep.subr.bf16.mxu0 %v5585_v56 }
 0xa07   : > { %4759 = vmatpush3.bf16.msra.mxu0 %v5002_v28 }
 0xa08   : > { %4760 = vmatprep.subr.bf16.mxu0 %v5585_v56 }
 0xa0b   : > { %4761 = vmatpush3.bf16.msra.mxu0 %v5003_v40 }
 0xa0c   : > { %4762 = vmatprep.subr.bf16.mxu0 %v5585_v56 }
 0xa0f   : > { %4763 = vmatpush3.bf16.msra.mxu0 %v5004_v31 }
 0xa10   : > { %4764 = vmatprep.subr.bf16.mxu0 %v5585_v56 }
 0xa13   : > { %4765 = vmatpush3.bf16.msra.mxu0 %v5005_v51 }
 0xa14   : > { %4766 = vmatprep.subr.bf16.mxu0 %v5585_v56 }
 0xa17   : > { %4767 = vmatpush3.bf16.msra.mxu0 %v5006_v55 }
 0xa18   : > { %4768 = vmatprep.subr.bf16.mxu0 %v5585_v56 }
 0xa1b   : > { %4769 = vmatpush3.bf16.msra.mxu0 %v5007_v57 }
 0xabe   : > { %v3352_v41 = vpop.f32.mrf.mxu0 }
 0xabf   : > { %v3353_v42 = vadd.f32 %v4294_v1, %v3352_v41 }
 0xac0   : > { %v4732_v43 = vpop.f32.mrf.mxu0 }
 0xac1   : > { %v3358_v44 = vmax.f32 %v3353_v42, 0.0 }
 0xac2   : > { %v3355_v45 = vpop.f32.mrf.mxu0 }
 0xac3   : > { %v3359_v49 = vpack.c.bf16 %v3358_v44, %v3358_v44 }
 0xac4   : > { %v4733_v52 = vpop.f32.mrf.mxu0 }
 0xac5   : > { %4751 = vmatmul.mubr.bf16.vlgmr.msra.gmra.mxu1 %v3359_v49 }
 0xb85   : > { %v3465_v59 = vpop.f32.mrf.mxu1 }
 0xb86   : > { %v3466_v60 = vadd.f32 %v4303_v58, %v3465_v59 }
 0xb87   : > { %v4752_v50 = vpop.f32.mrf.mxu1 }
 0xb88   : > { %v3471_v61 = vmax.f32 %v3466_v60, 0.0 }
 0xb89   : > { %v3468_v62 = vpop.f32.mrf.mxu1 }
 0xb8a   : > { %v3472_v0 = vpack.c.bf16 %v3471_v61, %v3471_v61 }
 0xb8b   : > { %v4753_v54 = vpop.f32.mrf.mxu1 }
 0xb8c   : > { %4771 = vmatmul.mubr.bf16.vlgmr.msra.gmra.mxu0 %v3472_v0 }
 0xc4c   : > { %v3578_v6 = vpop.f32.mrf.mxu0 }
 0xc4d   : > { %v3579_v9 = vadd.f32 %v4312_v4, %v3578_v6 }
 0xc4e   : > { %v4772_v10 = vpop.f32.mrf.mxu0  ;;  %3589 = sbr.rel (%p4321_p3) target bundleno = 3390 (0xd3e), region = 216 }
 0xc4f   : > { %v3584_v12 = vadd.f32 %v5012_v53, %v3579_v9 }
 0xc50   : > { %v3581_v13 = vpop.f32.mrf.mxu0 }
 0xc51   : > { %3585 = vst [vmem:[#allocation4] sm:$0xf] %v3584_v12 }
 0xc52   : > { %v4773_v56 = vpop.f32.mrf.mxu0 }
 0xc53   : > { %v5013_v3 = vld [vmem:[#allocation28 + $0x38] sm:$0xff]   ;;  %v3590_v14 = vpack.c.bf16 %v6579_v7, %v6571_v8  ;;  %v5014_v63 = vld [vmem:[#allocation28 + $0x30] sm:$0xff]   ;;  %v5015_v5 = vld [vmem:[#allocation28 + $0x28] sm:$0xff]   ;;  %v3591_v7 = vpack.c.bf16 %v6575_v11, %v6567_v2 }
 0xc54   : > { %4774 = vmatprep.subr.bf16.mxu0 %v5013_v3  ;;  %v5016_v15 = vld [vmem:[#allocation28 + $0x20] sm:$0xff]   ;;  %v5017_v34 = vld [vmem:[#allocation28 + $0x18] sm:$0xff]   ;;  %v5018_v16 = vld [vmem:[#allocation28 + $0x10] sm:$0xff]  }
 0xc55   : > { %4790 = vmatprep.mubr.bf16.mxu0 %v3590_v14  ;;  %4775 = vmatpush3.bf16.msra.mxu0 %v5013_v3  ;;  %v5019_v17 = vld [vmem:[#allocation28 + $0x8] sm:$0xff]   ;;  %v5020_v8 = vld [vmem:[#allocation28] sm:$0xff]  }
 0xc56   : > { %4776 = vmatprep.subr.bf16.mxu0 %v5014_v63  ;;  %v4322_v32 = vld [vmem:[#allocation30] ss:$0 sm:$0xff] }
 0xc59   : > { %4777 = vmatpush3.bf16.msra.mxu0 %v5014_v63 }
 0xc5a   : > { %4778 = vmatprep.subr.bf16.mxu0 %v5015_v5 }
 0xc5d   : > { %4779 = vmatpush3.bf16.msra.mxu0 %v5015_v5 }
 0xc5e   : > { %4780 = vmatprep.subr.bf16.mxu0 %v5016_v15 }
 0xc61   : > { %4781 = vmatpush3.bf16.msra.mxu0 %v5016_v15 }
 0xc62   : > { %4782 = vmatprep.subr.bf16.mxu0 %v5017_v34 }
 0xc65   : > { %4783 = vmatpush3.bf16.msra.mxu0 %v5017_v34 }
 0xc66   : > { %4784 = vmatprep.subr.bf16.mxu0 %v5018_v16 }
 0xc69   : > { %4785 = vmatpush3.bf16.msra.mxu0 %v5018_v16 }
 0xc6a   : > { %4786 = vmatprep.subr.bf16.mxu0 %v5019_v17 }
 0xc6d   : > { %4787 = vmatpush3.bf16.msra.mxu0 %v5019_v17 }
 0xc6e   : > { %4788 = vmatprep.subr.bf16.mxu0 %v5020_v8 }
 0xc71   : > { %4789 = vmatpush3.bf16.msra.mxu0 %v5020_v8 }
 0xc74   : > { %4791 = vmatmul.mubr.bf16.vlgmr.msra.gmra.mxu0 %v3591_v7 }
 0xd34   : > { %v4792_v18 = vpop.f32.mrf.mxu0 }
 0xd35   : > { %v3706_v19 = vadd.f32 %v4792_v18, %v4322_v32 }
 0xd36   : > { %v3697_v33 = vpop.f32.mrf.mxu0 }
 0xd37   : > { %3714 = vst [vmem:[%s6772_s22 + $0x10] sm:$0xff] %v3706_v19  ;;  %v3698_v20 = vadd.f32 %v4322_v32, %v3697_v33 }
 0xd38   : > { %v4793_v21 = vpop.f32.mrf.mxu0 }
 0xd39   : > { %3712 = vst [vmem:[%s6772_s22] sm:$0xff] %v3698_v20  ;;  %v3709_v35 = vadd.f32 %v4793_v21, %v4322_v32 }
 0xd3a   : > { %v3700_v22 = vpop.f32.mrf.mxu0 }
 0xd3b   : > { %3715 = vst [vmem:[%s6772_s22 + $0x18] sm:$0xff] %v3709_v35  ;;  %v3701_v48 = vadd.f32 %v4322_v32, %v3700_v22 }
 0xd3d   : > { %3713 = vst [vmem:[%s6772_s22 + $0x8] sm:$0xff] %v3701_v48 }
 0xd3e PF: > { %s6773_s18 = sld [smem:[#allocation64_spill]]  ;;  %s6776_s0 = smov %s5525_s16 }
 0xd3f   : > { %s6774_s15 = sld [smem:[#allocation63_spill]] }
 0xd40   : > { %s6775_s2 = sld [smem:[#allocation65_spill]] }
 0xd44   : > { %p91_p8 = scmp.ge.s32.totalorder %s6773_s18, 4  }
 0xd46   : > { %s6777_s16 = smov %s6775_s2  ;;  %93 = sbr.rel (!%p91_p8) target bundleno = 75 (0x4b), region = 397 }
 0xd4b   :  { %3727 = vsyncpa [#allocation6], 1 }
 0xd4c   :  { %3729 = vsyncpa [#allocation6 + $0x1], 1 }
 0xd4d   :  { %3730 = vsyncpa [#allocation8], 1 }
 0xd4e   :  { %3732 = vsyncpa [#allocation8 + $0x1], 1 }
 0xd4f   :  { %3733 = vsyncpa [#allocation11], 1 }
 0xd50   :  { %3735 = vsyncpa [#allocation11 + $0x1], 1 }
 0xd51   :  { %3736 = vsyncpa [#allocation14], 1 }
 0xd52   :  { %3738 = vsyncpa [#allocation14 + $0x1], 1 }
 0xd53   :  { %3739 = vsyncpa [#allocation17], 1 }
 0xd54   :  { %3741 = vsyncpa [#allocation17 + $0x1], 1 }
 0xd55   :  { %3742 = vsyncpa [#allocation20], 1 }
 0xd56   :  { %3744 = vsyncpa [#allocation20 + $0x1], 1 }
 0xd57   :  { %3745 = vsyncpa [#allocation23], 1 }
 0xd58   :  { %3747 = vsyncpa [#allocation23 + $0x1], 1 }
 0xd59   :  { %3748 = vsyncpa [#allocation26], 1 }
 0xd5a   :  { %3750 = vsyncpa [#allocation26 + $0x1], 1 }
 0xd5b   :  { %3751 = vsyncpa [#allocation29], 1 }

</bundles_post_ra>
